<compile_context>
chip_gen: v6e
topology: v6e:2x2x1
jax: 0.10.0
libtpu: 0.0.40
codegen_flags: <defaults>
</compile_context>

<pallas_src>
import functools

import jax
import jax.numpy as jnp
from jax.experimental import pallas as pl
from jax.experimental.pallas import tpu as pltpu


# ----------------------------------------------------------------------------
# Shared LSTM cell math (gate order i, f, g, o — matches torch.nn.LSTM)
# ----------------------------------------------------------------------------
def _lstm_cell(gates, c_prev):
    H = gates.shape[-1] // 4
    i_g = jax.nn.sigmoid(gates[:, 0 * H:1 * H])
    f_g = jax.nn.sigmoid(gates[:, 1 * H:2 * H])
    g_g = jnp.tanh(gates[:, 2 * H:3 * H])
    o_g = jax.nn.sigmoid(gates[:, 3 * H:4 * H])
    c_new = f_g * c_prev + i_g * g_g
    h_new = o_g * jnp.tanh(c_new)
    return h_new, c_new


# ----------------------------------------------------------------------------
# Pallas kernel: one grid step == one time chunk; both directions in one body.
# Forward walks chunk tc (local s = 0..Tc-1); backward walks chunk n_chunks-1-tc
# in reverse local order, so globally it visits t = T-1 .. 0.  The `t < lens`
# mask freezes state at zero over padding (PyTorch packed-reverse semantics).
# ----------------------------------------------------------------------------
def _bilstm_chunk_kernel(lens_ref, gxf_ref, gxb_ref, whh_ref, b_ref,
                         seqf_ref, seqb_ref, poolf_ref, poolb_ref,
                         hf_ref, cf_ref, hb_ref, cb_ref):
    Tc, B, _ = gxf_ref.shape
    H = seqf_ref.shape[-1]
    tc = pl.program_id(0)
    n_chunks = pl.num_programs(0)

    @pl.when(tc == 0)
    def _init():
        hf_ref[...] = jnp.zeros_like(hf_ref)
        cf_ref[...] = jnp.zeros_like(cf_ref)
        hb_ref[...] = jnp.zeros_like(hb_ref)
        cb_ref[...] = jnp.zeros_like(cb_ref)
        poolf_ref[...] = jnp.zeros_like(poolf_ref)
        poolb_ref[...] = jnp.zeros_like(poolb_ref)

    lens = lens_ref[...]                       # (B, 1) int32 — read once per chunk
    whh_all = whh_ref[...]                     # (2, H, 4H) bf16 — resident
    whh_f, whh_b = whh_all[0], whh_all[1]
    b_all = b_ref[...]                         # (2, 4H) f32 — bias fused in-kernel
    b_f, b_b = b_all[0:1, :], b_all[1:2, :]

    t0_f = tc * Tc                             # global time offset (forward chunk)
    t0_b = (n_chunks - 1 - tc) * Tc            # global time offset (backward chunk)

    h_f = hf_ref[...]
    c_f = cf_ref[...]
    h_b = hb_ref[...]
    c_b = cb_ref[...]
    acc_f = jnp.zeros((B, H), jnp.float32)
    acc_b = jnp.zeros((B, H), jnp.float32)

    # Static intra-chunk unroll: all gx/seq indices are compile-time constants.
    for s in range(Tc):
        sb = Tc - 1 - s                        # backward local index (reverse walk)

        # Two independent MXU chains per step — the scheduler overlaps them.
        gates_f = (gxf_ref[s].astype(jnp.float32) + b_f
                   + jnp.dot(h_f.astype(jnp.bfloat16), whh_f,
                             preferred_element_type=jnp.float32))
        gates_b = (gxb_ref[sb].astype(jnp.float32) + b_b
                   + jnp.dot(h_b.astype(jnp.bfloat16), whh_b,
                             preferred_element_type=jnp.float32))

        hf_new, cf_new = _lstm_cell(gates_f, c_f)
        hb_new, cb_new = _lstm_cell(gates_b, c_b)

        mask_f = lens > (t0_f + s)             # (B, 1) -> broadcasts to (B, H)
        mask_b = lens > (t0_b + sb)

        h_f = jnp.where(mask_f, hf_new, h_f)
        c_f = jnp.where(mask_f, cf_new, c_f)
        out_f = jnp.where(mask_f, hf_new, 0.0)
        h_b = jnp.where(mask_b, hb_new, h_b)
        c_b = jnp.where(mask_b, cb_new, c_b)
        out_b = jnp.where(mask_b, hb_new, 0.0)

        seqf_ref[s] = out_f.astype(seqf_ref.dtype)
        seqb_ref[sb] = out_b.astype(seqb_ref.dtype)
        acc_f = acc_f + out_f
        acc_b = acc_b + out_b

    # Carry state to the next chunk; accumulate pool into resident output blocks.
    hf_ref[...] = h_f
    cf_ref[...] = c_f
    hb_ref[...] = h_b
    cb_ref[...] = c_b
    poolf_ref[...] += acc_f
    poolb_ref[...] += acc_b

    @pl.when(tc == n_chunks - 1)
    def _finalize():
        # Fused masked mean; clamp lens to avoid inf/nan for empty sequences.
        inv_len = 1.0 / jnp.maximum(lens.astype(jnp.float32), 1.0)
        poolf_ref[...] = poolf_ref[...] * inv_len
        poolb_ref[...] = poolb_ref[...] * inv_len


# ----------------------------------------------------------------------------
# Wrapper: one pallas_call per layer, grid over time chunks ("arbitrary").
# ----------------------------------------------------------------------------
def _bilstm_pallas_layer(gx_f, gx_b, w_hh_st, b_st, lens2d, hidden, time_chunk):
    """gx_f/gx_b: (T,B,4H) bf16 precomputed x@W_ih per direction (no bias).

    Returns seq_f, seq_b: (T,B,H) f32 (zeros at padded steps, forward time order)
    and pool_f, pool_b: (B,H) f32 masked means.
    """
    T, B, G = gx_f.shape
    H = hidden
    assert T % time_chunk == 0, (T, time_chunk)
    Tc = time_chunk
    n_chunks = T // Tc

    seq_f, seq_b, pool_f, pool_b = pl.pallas_call(
        _bilstm_chunk_kernel,
        out_shape=(jax.ShapeDtypeStruct((T, B, H), jnp.float32),
                   jax.ShapeDtypeStruct((T, B, H), jnp.float32),
                   jax.ShapeDtypeStruct((B, H), jnp.float32),
                   jax.ShapeDtypeStruct((B, H), jnp.float32)),
        grid_spec=pltpu.PrefetchScalarGridSpec(
            num_scalar_prefetch=0,
            grid=(n_chunks,),                                   # time-chunk axis
            in_specs=[
                pl.BlockSpec((B, 1), lambda i: (0, 0)),                         # lens
                pl.BlockSpec((Tc, B, G), lambda i: (i, 0, 0)),                  # gx fwd chunk
                pl.BlockSpec((Tc, B, G), lambda i: (n_chunks - 1 - i, 0, 0)),   # gx bwd chunk
                pl.BlockSpec((2, H, G), lambda i: (0, 0, 0)),                   # W_hh (both dirs)
                pl.BlockSpec((2, G), lambda i: (0, 0)),                         # bias (both dirs)
            ],
            out_specs=[
                pl.BlockSpec((Tc, B, H), lambda i: (i, 0, 0)),                  # seq fwd
                pl.BlockSpec((Tc, B, H), lambda i: (n_chunks - 1 - i, 0, 0)),   # seq bwd
                pl.BlockSpec((B, H), lambda i: (0, 0)),                         # pool fwd (resident)
                pl.BlockSpec((B, H), lambda i: (0, 0)),                         # pool bwd (resident)
            ],
            scratch_shapes=[pltpu.VMEM((B, H), jnp.float32)] * 4,  # h_f, c_f, h_b, c_b
        ),
        compiler_params=pltpu.CompilerParams(
            dimension_semantics=("arbitrary",),          # recurrence carried via scratch
            vmem_limit_bytes=32 * 1024 * 1024),          # explicit budget (safe on v5e..v7x)
    )(lens2d, gx_f, gx_b, w_hh_st.astype(jnp.bfloat16), b_st)
    return seq_f, seq_b, pool_f, pool_b


# ----------------------------------------------------------------------------
# Hoisted input projection (one big MXU matmul per layer/direction, no bias).
# `feats` is a list of time-major slabs whose concat along the feature axis is
# the layer input — so concat(fwd, bwd) is never materialized between layers.
# ----------------------------------------------------------------------------
def _input_gates(feats, w_ih_dir):
    off = 0
    gx = None
    for x in feats:
        f = x.shape[-1]
        term = jnp.einsum('tbf,fg->tbg', x, w_ih_dir[off:off + f],
                          preferred_element_type=jnp.float32)
        gx = term if gx is None else gx + term
        off += f
    return gx.astype(jnp.bfloat16)   # bf16 halves HBM traffic & VMEM footprint


# ----------------------------------------------------------------------------
# Parameter init (deterministic synthetic weights, gate order i, f, g, o)
# ----------------------------------------------------------------------------
def init_params(key, in_dim, hidden, num_layers):
    params = []
    scale = 1.0 / jnp.sqrt(jnp.float32(hidden))
    for layer in range(num_layers):
        d_in = in_dim if layer == 0 else 2 * hidden
        key, k1, k2, k3 = jax.random.split(key, 4)
        w_ih = jax.random.normal(k1, (2, d_in, 4 * hidden), jnp.float32) * scale
        w_hh = jax.random.normal(k2, (2, hidden, 4 * hidden), jnp.float32) * scale
        b = jax.random.normal(k3, (2, 4 * hidden), jnp.float32) * scale  # b_ih + b_hh
        params.append((w_ih, w_hh, b))
    return tuple(params)


# ----------------------------------------------------------------------------
# Forward: equivalent of BiLSTMLayer.forward(input_x, lens)
# ----------------------------------------------------------------------------
@functools.partial(jax.jit, static_argnums=(3, 4, 5))
def bilstm_layer_forward(x_btd, lens, params, hidden, num_layers, time_chunk):
    """x_btd: (B, T, in_dim) f32, lens: (B,) int -> (B, 2*hidden) f32."""
    B = x_btd.shape[0]
    lens2d = lens.astype(jnp.int32).reshape(B, 1)
    feats = [jnp.transpose(x_btd, (1, 0, 2))]            # time-major (T, B, D)
    pool_f = pool_b = None
    for layer in range(num_layers):
        w_ih_st, w_hh_st, b_st = params[layer]            # (2,D,4H), (2,H,4H), (2,4H)
        gx_f = _input_gates(feats, w_ih_st[0])
        gx_b = _input_gates(feats, w_ih_st[1])
        seq_f, seq_b, pool_f, pool_b = _bilstm_pallas_layer(
            gx_f, gx_b, w_hh_st, b_st, lens2d, hidden, time_chunk)
        feats = [seq_f, seq_b]                            # consumed split (no concat copy)
        # (inter-layer dropout intentionally omitted -> inference semantics)
    return jnp.concatenate([pool_f, pool_b], axis=-1)     # (B, 2H)


# ----------------------------------------------------------------------------
# Pure-JAX (lax.scan) reference with the same bf16 casts, for validation.
# ----------------------------------------------------------------------------
def _reference_forward(x_btd, lens, params, hidden, num_layers):
    lens_i = lens.astype(jnp.int32)
    B = x_btd.shape[0]
    feats = [jnp.transpose(x_btd, (1, 0, 2))]
    T = feats[0].shape[0]
    pools = None
    for layer in range(num_layers):
        w_ih_st, w_hh_st, b_st = params[layer]
        seqs = []
        for d in range(2):
            gx = _input_gates(feats, w_ih_st[d])                   # (T,B,4H) bf16
            whh = w_hh_st[d].astype(jnp.bfloat16)
            bias = b_st[d]
            gx_d = jnp.flip(gx, axis=0) if d == 1 else gx
            tidx = (T - 1 - jnp.arange(T)) if d == 1 else jnp.arange(T)

            def step(carry, inp, whh=whh, bias=bias):
                h, c = carry
                gx_t, t = inp
                gates = (gx_t.astype(jnp.float32) + bias[None, :]
                         + jnp.dot(h.astype(jnp.bfloat16), whh,
                                   preferred_element_type=jnp.float32))
                h_new, c_new = _lstm_cell(gates, c)
                mask = lens_i[:, None] > t
                h = jnp.where(mask, h_new, h)
                c = jnp.where(mask, c_new, c)
                return (h, c), jnp.where(mask, h_new, 0.0)

            zeros = jnp.zeros((B, hidden), jnp.float32)
            _, outs = jax.lax.scan(step, (zeros, zeros), (gx_d, tidx))
            outs = jnp.flip(outs, axis=0) if d == 1 else outs
            seqs.append(outs)
        feats = seqs
        denom = jnp.maximum(lens_i.astype(jnp.float32), 1.0)[:, None]
        pools = [s.sum(axis=0) / denom for s in seqs]
    return jnp.concatenate(pools, axis=-1)


# ----------------------------------------------------------------------------
if __name__ == "__main__":
    B, T, IN_DIM, HIDDEN, NUM_LAYERS = 2, 8, 16, 32, 2   # dropout = 0.0
    TIME_CHUNK = 4                                        # grid = (T // TIME_CHUNK,)

    key = jax.random.PRNGKey(0)
    kx, kp = jax.random.split(key)
    x = jax.random.normal(kx, (B, T, IN_DIM), jnp.float32)
    lens = jnp.array([8, 5], dtype=jnp.int32)             # valid lengths <= T

    params = init_params(kp, IN_DIM, HIDDEN, NUM_LAYERS)

    out = bilstm_layer_forward(x, lens, params, HIDDEN, NUM_LAYERS, TIME_CHUNK)
    out = jax.block_until_ready(out)

    assert out.shape == (B, 2 * HIDDEN), out.shape
    assert bool(jnp.all(jnp.isfinite(out)))

    ref = _reference_forward(x, lens, params, HIDDEN, NUM_LAYERS)
    max_err = float(jnp.max(jnp.abs(out - ref)))
    assert max_err < 5e-3, f"mismatch vs lax.scan reference: {max_err}"

    print("KERNEL_OK")
</pallas_src>

<mosaic_0001>
module attributes {stable_mosaic.version = 11 : i64} {
  func.func @_bilstm_chunk_kernel(%arg0: i32, %arg1: memref<2x1xi32, #tpu.memory_space<vmem>>, %arg2: memref<4x2x128xbf16, #tpu.memory_space<vmem>>, %arg3: memref<4x2x128xbf16, #tpu.memory_space<vmem>>, %arg4: memref<2x32x128xbf16, #tpu.memory_space<vmem>>, %arg5: memref<2x128xf32, #tpu.memory_space<vmem>>, %arg6: memref<4x2x32xf32, #tpu.memory_space<vmem>>, %arg7: memref<4x2x32xf32, #tpu.memory_space<vmem>>, %arg8: memref<2x32xf32, #tpu.memory_space<vmem>>, %arg9: memref<2x32xf32, #tpu.memory_space<vmem>>, %arg10: memref<2x32xf32, #tpu.memory_space<vmem>>, %arg11: memref<2x32xf32, #tpu.memory_space<vmem>>, %arg12: memref<2x32xf32, #tpu.memory_space<vmem>>, %arg13: memref<2x32xf32, #tpu.memory_space<vmem>>) attributes {dimension_semantics = [#tpu.dimension_semantics<arbitrary>], iteration_bounds = array<i64: 2>, scalar_prefetch = 0 : i64, scratch_operands = 4 : i64, tpu.core_type = #tpu.core_type<tc>, window_params = [{pipeline_mode = #tpu.pipeline_mode<synchronous>, transform_indices = @transform_0, window_bounds = array<i64: 2, 1>}, {transform_indices = @transform_1, window_bounds = array<i64: 4, 2, 128>}, {transform_indices = @transform_2, window_bounds = array<i64: 4, 2, 128>}, {pipeline_mode = #tpu.pipeline_mode<synchronous>, transform_indices = @transform_3, window_bounds = array<i64: 2, 32, 128>}, {pipeline_mode = #tpu.pipeline_mode<synchronous>, transform_indices = @transform_4, window_bounds = array<i64: 2, 128>}, {transform_indices = @transform_5, window_bounds = array<i64: 4, 2, 32>}, {transform_indices = @transform_6, window_bounds = array<i64: 4, 2, 32>}, {pipeline_mode = #tpu.pipeline_mode<synchronous>, transform_indices = @transform_7, window_bounds = array<i64: 2, 32>}, {pipeline_mode = #tpu.pipeline_mode<synchronous>, transform_indices = @transform_8, window_bounds = array<i64: 2, 32>}]} {
    %c0_i32 = arith.constant 0 : i32
    %0 = arith.cmpi eq, %arg0, %c0_i32 : i32
    %1 = arith.extui %0 : i1 to i32
    %c0_i32_0 = arith.constant 0 : i32
    %2 = arith.cmpi ne, %1, %c0_i32_0 : i32
    scf.if %2 {
      %cst_126 = arith.constant 0.000000e+00 : f32
      %434 = vector.broadcast %cst_126 : f32 to vector<2x32xf32>
      %c0_127 = arith.constant 0 : index
      %c0_128 = arith.constant 0 : index
      %435 = vector.load %arg10[%c0_127, %c0_128] : memref<2x32xf32, #tpu.memory_space<vmem>>, vector<2x32xf32>
      tpu.vector_store %arg10[%c0_127, %c0_128], %434 {strides = array<i32>} : memref<2x32xf32, #tpu.memory_space<vmem>>, vector<2x32xf32>,
      %cst_129 = arith.constant 0.000000e+00 : f32
      %436 = vector.broadcast %cst_129 : f32 to vector<2x32xf32>
      %c0_130 = arith.constant 0 : index
      %c0_131 = arith.constant 0 : index
      %437 = vector.load %arg11[%c0_130, %c0_131] : memref<2x32xf32, #tpu.memory_space<vmem>>, vector<2x32xf32>
      tpu.vector_store %arg11[%c0_130, %c0_131], %436 {strides = array<i32>} : memref<2x32xf32, #tpu.memory_space<vmem>>, vector<2x32xf32>,
      %cst_132 = arith.constant 0.000000e+00 : f32
      %438 = vector.broadcast %cst_132 : f32 to vector<2x32xf32>
      %c0_133 = arith.constant 0 : index
      %c0_134 = arith.constant 0 : index
      %439 = vector.load %arg12[%c0_133, %c0_134] : memref<2x32xf32, #tpu.memory_space<vmem>>, vector<2x32xf32>
      tpu.vector_store %arg12[%c0_133, %c0_134], %438 {strides = array<i32>} : memref<2x32xf32, #tpu.memory_space<vmem>>, vector<2x32xf32>,
      %cst_135 = arith.constant 0.000000e+00 : f32
      %440 = vector.broadcast %cst_135 : f32 to vector<2x32xf32>
      %c0_136 = arith.constant 0 : index
      %c0_137 = arith.constant 0 : index
      %441 = vector.load %arg13[%c0_136, %c0_137] : memref<2x32xf32, #tpu.memory_space<vmem>>, vector<2x32xf32>
      tpu.vector_store %arg13[%c0_136, %c0_137], %440 {strides = array<i32>} : memref<2x32xf32, #tpu.memory_space<vmem>>, vector<2x32xf32>,
      %cst_138 = arith.constant 0.000000e+00 : f32
      %442 = vector.broadcast %cst_138 : f32 to vector<2x32xf32>
      %c0_139 = arith.constant 0 : index
      %c0_140 = arith.constant 0 : index
      %443 = vector.load %arg8[%c0_139, %c0_140] : memref<2x32xf32, #tpu.memory_space<vmem>>, vector<2x32xf32>
      tpu.vector_store %arg8[%c0_139, %c0_140], %442 {strides = array<i32>} : memref<2x32xf32, #tpu.memory_space<vmem>>, vector<2x32xf32>,
      %cst_141 = arith.constant 0.000000e+00 : f32
      %444 = vector.broadcast %cst_141 : f32 to vector<2x32xf32>
      %c0_142 = arith.constant 0 : index
      %c0_143 = arith.constant 0 : index
      %445 = vector.load %arg9[%c0_142, %c0_143] : memref<2x32xf32, #tpu.memory_space<vmem>>, vector<2x32xf32>
      tpu.vector_store %arg9[%c0_142, %c0_143], %444 {strides = array<i32>} : memref<2x32xf32, #tpu.memory_space<vmem>>, vector<2x32xf32>,
    } else {
    }
    %c0 = arith.constant 0 : index
    %c0_1 = arith.constant 0 : index
    %3 = vector.load %arg1[%c0, %c0_1] : memref<2x1xi32, #tpu.memory_space<vmem>>, vector<2x1xi32>
    %c0_2 = arith.constant 0 : index
    %c0_3 = arith.constant 0 : index
    %c0_4 = arith.constant 0 : index
    %4 = vector.load %arg4[%c0_2, %c0_3, %c0_4] : memref<2x32x128xbf16, #tpu.memory_space<vmem>>, vector<2x32x128xbf16>
    %5 = vector.extract_strided_slice %4 {offsets = [0, 0, 0], sizes = [1, 32, 128], strides = [1, 1, 1]} : vector<2x32x128xbf16> to vector<1x32x128xbf16>
    %6 = vector.shape_cast %5 : vector<1x32x128xbf16> to vector<32x128xbf16>
    %7 = vector.extract_strided_slice %4 {offsets = [1, 0, 0], sizes = [1, 32, 128], strides = [1, 1, 1]} : vector<2x32x128xbf16> to vector<1x32x128xbf16>
    %8 = vector.shape_cast %7 : vector<1x32x128xbf16> to vector<32x128xbf16>
    %c0_5 = arith.constant 0 : index
    %c0_6 = arith.constant 0 : index
    %9 = vector.load %arg5[%c0_5, %c0_6] : memref<2x128xf32, #tpu.memory_space<vmem>>, vector<2x128xf32>
    %10 = vector.extract_strided_slice %9 {offsets = [0, 0], sizes = [1, 128], strides = [1, 1]} : vector<2x128xf32> to vector<1x128xf32>
    %11 = vector.extract_strided_slice %9 {offsets = [1, 0], sizes = [1, 128], strides = [1, 1]} : vector<2x128xf32> to vector<1x128xf32>
    %c4_i32 = arith.constant 4 : i32
    %12 = arith.muli %arg0, %c4_i32 : i32
    %c1_i32 = arith.constant 1 : i32
    %13 = arith.subi %c1_i32, %arg0 : i32
    %c4_i32_7 = arith.constant 4 : i32
    %14 = arith.muli %13, %c4_i32_7 : i32
    %c0_8 = arith.constant 0 : index
    %c0_9 = arith.constant 0 : index
    %15 = vector.load %arg10[%c0_8, %c0_9] : memref<2x32xf32, #tpu.memory_space<vmem>>, vector<2x32xf32>
    %c0_10 = arith.constant 0 : index
    %c0_11 = arith.constant 0 : index
    %16 = vector.load %arg11[%c0_10, %c0_11] : memref<2x32xf32, #tpu.memory_space<vmem>>, vector<2x32xf32>
    %c0_12 = arith.constant 0 : index
    %c0_13 = arith.constant 0 : index
    %17 = vector.load %arg12[%c0_12, %c0_13] : memref<2x32xf32, #tpu.memory_space<vmem>>, vector<2x32xf32>
    %c0_14 = arith.constant 0 : index
    %c0_15 = arith.constant 0 : index
    %18 = vector.load %arg13[%c0_14, %c0_15] : memref<2x32xf32, #tpu.memory_space<vmem>>, vector<2x32xf32>
    %cst = arith.constant 0.000000e+00 : f32
    %19 = vector.broadcast %cst : f32 to vector<2x32xf32>
    %cst_16 = arith.constant 0.000000e+00 : f32
    %20 = vector.broadcast %cst_16 : f32 to vector<2x32xf32>
    %c0_17 = arith.constant 0 : index
    %c0_18 = arith.constant 0 : index
    %c0_19 = arith.constant 0 : index
    %21 = vector.load %arg2[%c0_17, %c0_18, %c0_19] : memref<4x2x128xbf16, #tpu.memory_space<vmem>>, vector<1x2x128xbf16>
    %22 = vector.shape_cast %21 : vector<1x2x128xbf16> to vector<2x128xbf16>
    %23 = arith.extf %22 : vector<2x128xbf16> to vector<2x128xf32>
    %24 = vector.broadcast %10 : vector<1x128xf32> to vector<2x128xf32>
    %25 = arith.addf %23, %24 : vector<2x128xf32>
    %26 = arith.truncf %15 : vector<2x32xf32> to vector<2x32xbf16>
    %cst_20 = arith.constant dense<0.000000e+00> : vector<2x128xf32>
    %27 = tpu.matmul %26, %6, %cst_20 {dimension_numbers = #tpu.dot_dimension_numbers<[1], [0], [0], [1], [0, 0, 1, 1], [], []>} : vector<2x32xbf16>, vector<32x128xbf16>, vector<2x128xf32> -> vector<2x128xf32>
    %28 = arith.addf %25, %27 : vector<2x128xf32>
    %c3 = arith.constant 3 : index
    %c0_21 = arith.constant 0 : index
    %c0_22 = arith.constant 0 : index
    %29 = vector.load %arg3[%c3, %c0_21, %c0_22] : memref<4x2x128xbf16, #tpu.memory_space<vmem>>, vector<1x2x128xbf16>
    %30 = vector.shape_cast %29 : vector<1x2x128xbf16> to vector<2x128xbf16>
    %31 = arith.extf %30 : vector<2x128xbf16> to vector<2x128xf32>
    %32 = vector.broadcast %11 : vector<1x128xf32> to vector<2x128xf32>
    %33 = arith.addf %31, %32 : vector<2x128xf32>
    %34 = arith.truncf %17 : vector<2x32xf32> to vector<2x32xbf16>
    %cst_23 = arith.constant dense<0.000000e+00> : vector<2x128xf32>
    %35 = tpu.matmul %34, %8, %cst_23 {dimension_numbers = #tpu.dot_dimension_numbers<[1], [0], [0], [1], [0, 0, 1, 1], [], []>} : vector<2x32xbf16>, vector<32x128xbf16>, vector<2x128xf32> -> vector<2x128xf32>
    %36 = arith.addf %33, %35 : vector<2x128xf32>
    %37 = vector.extract_strided_slice %28 {offsets = [0, 0], sizes = [2, 32], strides = [1, 1]} : vector<2x128xf32> to vector<2x32xf32>
    %38 = arith.negf %37 : vector<2x32xf32>
    %39 = math.exp %38 : vector<2x32xf32>
    %cst_24 = arith.constant 1.000000e+00 : f32
    %40 = vector.broadcast %cst_24 : f32 to vector<2x32xf32>
    %41 = arith.addf %40, %39 : vector<2x32xf32>
    %42 = arith.divf %40, %41 : vector<2x32xf32>
    %43 = vector.extract_strided_slice %28 {offsets = [0, 32], sizes = [2, 32], strides = [1, 1]} : vector<2x128xf32> to vector<2x32xf32>
    %44 = arith.negf %43 : vector<2x32xf32>
    %45 = math.exp %44 : vector<2x32xf32>
    %cst_25 = arith.constant 1.000000e+00 : f32
    %46 = vector.broadcast %cst_25 : f32 to vector<2x32xf32>
    %47 = arith.addf %46, %45 : vector<2x32xf32>
    %48 = arith.divf %46, %47 : vector<2x32xf32>
    %49 = vector.extract_strided_slice %28 {offsets = [0, 64], sizes = [2, 32], strides = [1, 1]} : vector<2x128xf32> to vector<2x32xf32>
    %50 = math.tanh %49 : vector<2x32xf32>
    %51 = vector.extract_strided_slice %28 {offsets = [0, 96], sizes = [2, 32], strides = [1, 1]} : vector<2x128xf32> to vector<2x32xf32>
    %52 = arith.negf %51 : vector<2x32xf32>
    %53 = math.exp %52 : vector<2x32xf32>
    %cst_26 = arith.constant 1.000000e+00 : f32
    %54 = vector.broadcast %cst_26 : f32 to vector<2x32xf32>
    %55 = arith.addf %54, %53 : vector<2x32xf32>
    %56 = arith.divf %54, %55 : vector<2x32xf32>
    %57 = arith.mulf %48, %16 : vector<2x32xf32>
    %58 = arith.mulf %42, %50 : vector<2x32xf32>
    %59 = arith.addf %57, %58 : vector<2x32xf32>
    %60 = math.tanh %59 : vector<2x32xf32>
    %61 = arith.mulf %56, %60 : vector<2x32xf32>
    %62 = vector.extract_strided_slice %36 {offsets = [0, 0], sizes = [2, 32], strides = [1, 1]} : vector<2x128xf32> to vector<2x32xf32>
    %63 = arith.negf %62 : vector<2x32xf32>
    %64 = math.exp %63 : vector<2x32xf32>
    %cst_27 = arith.constant 1.000000e+00 : f32
    %65 = vector.broadcast %cst_27 : f32 to vector<2x32xf32>
    %66 = arith.addf %65, %64 : vector<2x32xf32>
    %67 = arith.divf %65, %66 : vector<2x32xf32>
    %68 = vector.extract_strided_slice %36 {offsets = [0, 32], sizes = [2, 32], strides = [1, 1]} : vector<2x128xf32> to vector<2x32xf32>
    %69 = arith.negf %68 : vector<2x32xf32>
    %70 = math.exp %69 : vector<2x32xf32>
    %cst_28 = arith.constant 1.000000e+00 : f32
    %71 = vector.broadcast %cst_28 : f32 to vector<2x32xf32>
    %72 = arith.addf %71, %70 : vector<2x32xf32>
    %73 = arith.divf %71, %72 : vector<2x32xf32>
    %74 = vector.extract_strided_slice %36 {offsets = [0, 64], sizes = [2, 32], strides = [1, 1]} : vector<2x128xf32> to vector<2x32xf32>
    %75 = math.tanh %74 : vector<2x32xf32>
    %76 = vector.extract_strided_slice %36 {offsets = [0, 96], sizes = [2, 32], strides = [1, 1]} : vector<2x128xf32> to vector<2x32xf32>
    %77 = arith.negf %76 : vector<2x32xf32>
    %78 = math.exp %77 : vector<2x32xf32>
    %cst_29 = arith.constant 1.000000e+00 : f32
    %79 = vector.broadcast %cst_29 : f32 to vector<2x32xf32>
    %80 = arith.addf %79, %78 : vector<2x32xf32>
    %81 = arith.divf %79, %80 : vector<2x32xf32>
    %82 = arith.mulf %73, %18 : vector<2x32xf32>
    %83 = arith.mulf %67, %75 : vector<2x32xf32>
    %84 = arith.addf %82, %83 : vector<2x32xf32>
    %85 = math.tanh %84 : vector<2x32xf32>
    %86 = arith.mulf %81, %85 : vector<2x32xf32>
    %c0_i32_30 = arith.constant 0 : i32
    %87 = arith.addi %12, %c0_i32_30 : i32
    %88 = vector.broadcast %87 : i32 to vector<2x1xi32>
    %89 = arith.cmpi sgt, %3, %88 : vector<2x1xi32>
    %c3_i32 = arith.constant 3 : i32
    %90 = arith.addi %14, %c3_i32 : i32
    %91 = vector.broadcast %90 : i32 to vector<2x1xi32>
    %92 = arith.cmpi sgt, %3, %91 : vector<2x1xi32>
    %93 = vector.shape_cast %89 : vector<2x1xi1> to vector<2x1xi1>
    %94 = vector.broadcast %93 : vector<2x1xi1> to vector<2x32xi1>
    %95 = arith.select %94, %61, %15 : vector<2x32xi1>, vector<2x32xf32>
    %96 = vector.shape_cast %89 : vector<2x1xi1> to vector<2x1xi1>
    %97 = vector.broadcast %96 : vector<2x1xi1> to vector<2x32xi1>
    %98 = arith.select %97, %59, %16 : vector<2x32xi1>, vector<2x32xf32>
    %cst_31 = arith.constant 0.000000e+00 : f32
    %99 = vector.shape_cast %89 : vector<2x1xi1> to vector<2x1xi1>
    %100 = vector.broadcast %99 : vector<2x1xi1> to vector<2x32xi1>
    %101 = vector.broadcast %cst_31 : f32 to vector<2x32xf32>
    %102 = arith.select %100, %61, %101 : vector<2x32xi1>, vector<2x32xf32>
    %103 = vector.shape_cast %92 : vector<2x1xi1> to vector<2x1xi1>
    %104 = vector.broadcast %103 : vector<2x1xi1> to vector<2x32xi1>
    %105 = arith.select %104, %86, %17 : vector<2x32xi1>, vector<2x32xf32>
    %106 = vector.shape_cast %92 : vector<2x1xi1> to vector<2x1xi1>
    %107 = vector.broadcast %106 : vector<2x1xi1> to vector<2x32xi1>
    %108 = arith.select %107, %84, %18 : vector<2x32xi1>, vector<2x32xf32>
    %cst_32 = arith.constant 0.000000e+00 : f32
    %109 = vector.shape_cast %92 : vector<2x1xi1> to vector<2x1xi1>
    %110 = vector.broadcast %109 : vector<2x1xi1> to vector<2x32xi1>
    %111 = vector.broadcast %cst_32 : f32 to vector<2x32xf32>
    %112 = arith.select %110, %86, %111 : vector<2x32xi1>, vector<2x32xf32>
    %c0_33 = arith.constant 0 : index
    %c0_34 = arith.constant 0 : index
    %c0_35 = arith.constant 0 : index
    %113 = vector.load %arg6[%c0_33, %c0_34, %c0_35] : memref<4x2x32xf32, #tpu.memory_space<vmem>>, vector<1x2x32xf32>
    %114 = vector.shape_cast %113 : vector<1x2x32xf32> to vector<2x32xf32>
    %115 = vector.shape_cast %102 : vector<2x32xf32> to vector<1x2x32xf32>
    tpu.vector_store %arg6[%c0_33, %c0_34, %c0_35], %115 {strides = array<i32>} : memref<4x2x32xf32, #tpu.memory_space<vmem>>, vector<1x2x32xf32>,
    %c3_36 = arith.constant 3 : index
    %c0_37 = arith.constant 0 : index
    %c0_38 = arith.constant 0 : index
    %116 = vector.load %arg7[%c3_36, %c0_37, %c0_38] : memref<4x2x32xf32, #tpu.memory_space<vmem>>, vector<1x2x32xf32>
    %117 = vector.shape_cast %116 : vector<1x2x32xf32> to vector<2x32xf32>
    %118 = vector.shape_cast %112 : vector<2x32xf32> to vector<1x2x32xf32>
    tpu.vector_store %arg7[%c3_36, %c0_37, %c0_38], %118 {strides = array<i32>} : memref<4x2x32xf32, #tpu.memory_space<vmem>>, vector<1x2x32xf32>,
    %119 = arith.addf %19, %102 : vector<2x32xf32>
    %120 = arith.addf %20, %112 : vector<2x32xf32>
    %c1 = arith.constant 1 : index
    %c0_39 = arith.constant 0 : index
    %c0_40 = arith.constant 0 : index
    %121 = vector.load %arg2[%c1, %c0_39, %c0_40] : memref<4x2x128xbf16, #tpu.memory_space<vmem>>, vector<1x2x128xbf16>
    %122 = vector.shape_cast %121 : vector<1x2x128xbf16> to vector<2x128xbf16>
    %123 = arith.extf %122 : vector<2x128xbf16> to vector<2x128xf32>
    %124 = vector.broadcast %10 : vector<1x128xf32> to vector<2x128xf32>
    %125 = arith.addf %123, %124 : vector<2x128xf32>
    %126 = arith.truncf %95 : vector<2x32xf32> to vector<2x32xbf16>
    %cst_41 = arith.constant dense<0.000000e+00> : vector<2x128xf32>
    %127 = tpu.matmul %126, %6, %cst_41 {dimension_numbers = #tpu.dot_dimension_numbers<[1], [0], [0], [1], [0, 0, 1, 1], [], []>} : vector<2x32xbf16>, vector<32x128xbf16>, vector<2x128xf32> -> vector<2x128xf32>
    %128 = arith.addf %125, %127 : vector<2x128xf32>
    %c2 = arith.constant 2 : index
    %c0_42 = arith.constant 0 : index
    %c0_43 = arith.constant 0 : index
    %129 = vector.load %arg3[%c2, %c0_42, %c0_43] : memref<4x2x128xbf16, #tpu.memory_space<vmem>>, vector<1x2x128xbf16>
    %130 = vector.shape_cast %129 : vector<1x2x128xbf16> to vector<2x128xbf16>
    %131 = arith.extf %130 : vector<2x128xbf16> to vector<2x128xf32>
    %132 = vector.broadcast %11 : vector<1x128xf32> to vector<2x128xf32>
    %133 = arith.addf %131, %132 : vector<2x128xf32>
    %134 = arith.truncf %105 : vector<2x32xf32> to vector<2x32xbf16>
    %cst_44 = arith.constant dense<0.000000e+00> : vector<2x128xf32>
    %135 = tpu.matmul %134, %8, %cst_44 {dimension_numbers = #tpu.dot_dimension_numbers<[1], [0], [0], [1], [0, 0, 1, 1], [], []>} : vector<2x32xbf16>, vector<32x128xbf16>, vector<2x128xf32> -> vector<2x128xf32>
    %136 = arith.addf %133, %135 : vector<2x128xf32>
    %137 = vector.extract_strided_slice %128 {offsets = [0, 0], sizes = [2, 32], strides = [1, 1]} : vector<2x128xf32> to vector<2x32xf32>
    %138 = arith.negf %137 : vector<2x32xf32>
    %139 = math.exp %138 : vector<2x32xf32>
    %cst_45 = arith.constant 1.000000e+00 : f32
    %140 = vector.broadcast %cst_45 : f32 to vector<2x32xf32>
    %141 = arith.addf %140, %139 : vector<2x32xf32>
    %142 = arith.divf %140, %141 : vector<2x32xf32>
    %143 = vector.extract_strided_slice %128 {offsets = [0, 32], sizes = [2, 32], strides = [1, 1]} : vector<2x128xf32> to vector<2x32xf32>
    %144 = arith.negf %143 : vector<2x32xf32>
    %145 = math.exp %144 : vector<2x32xf32>
    %cst_46 = arith.constant 1.000000e+00 : f32
    %146 = vector.broadcast %cst_46 : f32 to vector<2x32xf32>
    %147 = arith.addf %146, %145 : vector<2x32xf32>
    %148 = arith.divf %146, %147 : vector<2x32xf32>
    %149 = vector.extract_strided_slice %128 {offsets = [0, 64], sizes = [2, 32], strides = [1, 1]} : vector<2x128xf32> to vector<2x32xf32>
    %150 = math.tanh %149 : vector<2x32xf32>
    %151 = vector.extract_strided_slice %128 {offsets = [0, 96], sizes = [2, 32], strides = [1, 1]} : vector<2x128xf32> to vector<2x32xf32>
    %152 = arith.negf %151 : vector<2x32xf32>
    %153 = math.exp %152 : vector<2x32xf32>
    %cst_47 = arith.constant 1.000000e+00 : f32
    %154 = vector.broadcast %cst_47 : f32 to vector<2x32xf32>
    %155 = arith.addf %154, %153 : vector<2x32xf32>
    %156 = arith.divf %154, %155 : vector<2x32xf32>
    %157 = arith.mulf %148, %98 : vector<2x32xf32>
    %158 = arith.mulf %142, %150 : vector<2x32xf32>
    %159 = arith.addf %157, %158 : vector<2x32xf32>
    %160 = math.tanh %159 : vector<2x32xf32>
    %161 = arith.mulf %156, %160 : vector<2x32xf32>
    %162 = vector.extract_strided_slice %136 {offsets = [0, 0], sizes = [2, 32], strides = [1, 1]} : vector<2x128xf32> to vector<2x32xf32>
    %163 = arith.negf %162 : vector<2x32xf32>
    %164 = math.exp %163 : vector<2x32xf32>
    %cst_48 = arith.constant 1.000000e+00 : f32
    %165 = vector.broadcast %cst_48 : f32 to vector<2x32xf32>
    %166 = arith.addf %165, %164 : vector<2x32xf32>
    %167 = arith.divf %165, %166 : vector<2x32xf32>
    %168 = vector.extract_strided_slice %136 {offsets = [0, 32], sizes = [2, 32], strides = [1, 1]} : vector<2x128xf32> to vector<2x32xf32>
    %169 = arith.negf %168 : vector<2x32xf32>
    %170 = math.exp %169 : vector<2x32xf32>
    %cst_49 = arith.constant 1.000000e+00 : f32
    %171 = vector.broadcast %cst_49 : f32 to vector<2x32xf32>
    %172 = arith.addf %171, %170 : vector<2x32xf32>
    %173 = arith.divf %171, %172 : vector<2x32xf32>
    %174 = vector.extract_strided_slice %136 {offsets = [0, 64], sizes = [2, 32], strides = [1, 1]} : vector<2x128xf32> to vector<2x32xf32>
    %175 = math.tanh %174 : vector<2x32xf32>
    %176 = vector.extract_strided_slice %136 {offsets = [0, 96], sizes = [2, 32], strides = [1, 1]} : vector<2x128xf32> to vector<2x32xf32>
    %177 = arith.negf %176 : vector<2x32xf32>
    %178 = math.exp %177 : vector<2x32xf32>
    %cst_50 = arith.constant 1.000000e+00 : f32
    %179 = vector.broadcast %cst_50 : f32 to vector<2x32xf32>
    %180 = arith.addf %179, %178 : vector<2x32xf32>
    %181 = arith.divf %179, %180 : vector<2x32xf32>
    %182 = arith.mulf %173, %108 : vector<2x32xf32>
    %183 = arith.mulf %167, %175 : vector<2x32xf32>
    %184 = arith.addf %182, %183 : vector<2x32xf32>
    %185 = math.tanh %184 : vector<2x32xf32>
    %186 = arith.mulf %181, %185 : vector<2x32xf32>
    %c1_i32_51 = arith.constant 1 : i32
    %187 = arith.addi %12, %c1_i32_51 : i32
    %188 = vector.broadcast %187 : i32 to vector<2x1xi32>
    %189 = arith.cmpi sgt, %3, %188 : vector<2x1xi32>
    %c2_i32 = arith.constant 2 : i32
    %190 = arith.addi %14, %c2_i32 : i32
    %191 = vector.broadcast %190 : i32 to vector<2x1xi32>
    %192 = arith.cmpi sgt, %3, %191 : vector<2x1xi32>
    %193 = vector.shape_cast %189 : vector<2x1xi1> to vector<2x1xi1>
    %194 = vector.broadcast %193 : vector<2x1xi1> to vector<2x32xi1>
    %195 = arith.select %194, %161, %95 : vector<2x32xi1>, vector<2x32xf32>
    %196 = vector.shape_cast %189 : vector<2x1xi1> to vector<2x1xi1>
    %197 = vector.broadcast %196 : vector<2x1xi1> to vector<2x32xi1>
    %198 = arith.select %197, %159, %98 : vector<2x32xi1>, vector<2x32xf32>
    %cst_52 = arith.constant 0.000000e+00 : f32
    %199 = vector.shape_cast %189 : vector<2x1xi1> to vector<2x1xi1>
    %200 = vector.broadcast %199 : vector<2x1xi1> to vector<2x32xi1>
    %201 = vector.broadcast %cst_52 : f32 to vector<2x32xf32>
    %202 = arith.select %200, %161, %201 : vector<2x32xi1>, vector<2x32xf32>
    %203 = vector.shape_cast %192 : vector<2x1xi1> to vector<2x1xi1>
    %204 = vector.broadcast %203 : vector<2x1xi1> to vector<2x32xi1>
    %205 = arith.select %204, %186, %105 : vector<2x32xi1>, vector<2x32xf32>
    %206 = vector.shape_cast %192 : vector<2x1xi1> to vector<2x1xi1>
    %207 = vector.broadcast %206 : vector<2x1xi1> to vector<2x32xi1>
    %208 = arith.select %207, %184, %108 : vector<2x32xi1>, vector<2x32xf32>
    %cst_53 = arith.constant 0.000000e+00 : f32
    %209 = vector.shape_cast %192 : vector<2x1xi1> to vector<2x1xi1>
    %210 = vector.broadcast %209 : vector<2x1xi1> to vector<2x32xi1>
    %211 = vector.broadcast %cst_53 : f32 to vector<2x32xf32>
    %212 = arith.select %210, %186, %211 : vector<2x32xi1>, vector<2x32xf32>
    %c1_54 = arith.constant 1 : index
    %c0_55 = arith.constant 0 : index
    %c0_56 = arith.constant 0 : index
    %213 = vector.load %arg6[%c1_54, %c0_55, %c0_56] : memref<4x2x32xf32, #tpu.memory_space<vmem>>, vector<1x2x32xf32>
    %214 = vector.shape_cast %213 : vector<1x2x32xf32> to vector<2x32xf32>
    %215 = vector.shape_cast %202 : vector<2x32xf32> to vector<1x2x32xf32>
    tpu.vector_store %arg6[%c1_54, %c0_55, %c0_56], %215 {strides = array<i32>} : memref<4x2x32xf32, #tpu.memory_space<vmem>>, vector<1x2x32xf32>,
    %c2_57 = arith.constant 2 : index
    %c0_58 = arith.constant 0 : index
    %c0_59 = arith.constant 0 : index
    %216 = vector.load %arg7[%c2_57, %c0_58, %c0_59] : memref<4x2x32xf32, #tpu.memory_space<vmem>>, vector<1x2x32xf32>
    %217 = vector.shape_cast %216 : vector<1x2x32xf32> to vector<2x32xf32>
    %218 = vector.shape_cast %212 : vector<2x32xf32> to vector<1x2x32xf32>
    tpu.vector_store %arg7[%c2_57, %c0_58, %c0_59], %218 {strides = array<i32>} : memref<4x2x32xf32, #tpu.memory_space<vmem>>, vector<1x2x32xf32>,
    %219 = arith.addf %119, %202 : vector<2x32xf32>
    %220 = arith.addf %120, %212 : vector<2x32xf32>
    %c2_60 = arith.constant 2 : index
    %c0_61 = arith.constant 0 : index
    %c0_62 = arith.constant 0 : index
    %221 = vector.load %arg2[%c2_60, %c0_61, %c0_62] : memref<4x2x128xbf16, #tpu.memory_space<vmem>>, vector<1x2x128xbf16>
    %222 = vector.shape_cast %221 : vector<1x2x128xbf16> to vector<2x128xbf16>
    %223 = arith.extf %222 : vector<2x128xbf16> to vector<2x128xf32>
    %224 = vector.broadcast %10 : vector<1x128xf32> to vector<2x128xf32>
    %225 = arith.addf %223, %224 : vector<2x128xf32>
    %226 = arith.truncf %195 : vector<2x32xf32> to vector<2x32xbf16>
    %cst_63 = arith.constant dense<0.000000e+00> : vector<2x128xf32>
    %227 = tpu.matmul %226, %6, %cst_63 {dimension_numbers = #tpu.dot_dimension_numbers<[1], [0], [0], [1], [0, 0, 1, 1], [], []>} : vector<2x32xbf16>, vector<32x128xbf16>, vector<2x128xf32> -> vector<2x128xf32>
    %228 = arith.addf %225, %227 : vector<2x128xf32>
    %c1_64 = arith.constant 1 : index
    %c0_65 = arith.constant 0 : index
    %c0_66 = arith.constant 0 : index
    %229 = vector.load %arg3[%c1_64, %c0_65, %c0_66] : memref<4x2x128xbf16, #tpu.memory_space<vmem>>, vector<1x2x128xbf16>
    %230 = vector.shape_cast %229 : vector<1x2x128xbf16> to vector<2x128xbf16>
    %231 = arith.extf %230 : vector<2x128xbf16> to vector<2x128xf32>
    %232 = vector.broadcast %11 : vector<1x128xf32> to vector<2x128xf32>
    %233 = arith.addf %231, %232 : vector<2x128xf32>
    %234 = arith.truncf %205 : vector<2x32xf32> to vector<2x32xbf16>
    %cst_67 = arith.constant dense<0.000000e+00> : vector<2x128xf32>
    %235 = tpu.matmul %234, %8, %cst_67 {dimension_numbers = #tpu.dot_dimension_numbers<[1], [0], [0], [1], [0, 0, 1, 1], [], []>} : vector<2x32xbf16>, vector<32x128xbf16>, vector<2x128xf32> -> vector<2x128xf32>
    %236 = arith.addf %233, %235 : vector<2x128xf32>
    %237 = vector.extract_strided_slice %228 {offsets = [0, 0], sizes = [2, 32], strides = [1, 1]} : vector<2x128xf32> to vector<2x32xf32>
    %238 = arith.negf %237 : vector<2x32xf32>
    %239 = math.exp %238 : vector<2x32xf32>
    %cst_68 = arith.constant 1.000000e+00 : f32
    %240 = vector.broadcast %cst_68 : f32 to vector<2x32xf32>
    %241 = arith.addf %240, %239 : vector<2x32xf32>
    %242 = arith.divf %240, %241 : vector<2x32xf32>
    %243 = vector.extract_strided_slice %228 {offsets = [0, 32], sizes = [2, 32], strides = [1, 1]} : vector<2x128xf32> to vector<2x32xf32>
    %244 = arith.negf %243 : vector<2x32xf32>
    %245 = math.exp %244 : vector<2x32xf32>
    %cst_69 = arith.constant 1.000000e+00 : f32
    %246 = vector.broadcast %cst_69 : f32 to vector<2x32xf32>
    %247 = arith.addf %246, %245 : vector<2x32xf32>
    %248 = arith.divf %246, %247 : vector<2x32xf32>
    %249 = vector.extract_strided_slice %228 {offsets = [0, 64], sizes = [2, 32], strides = [1, 1]} : vector<2x128xf32> to vector<2x32xf32>
    %250 = math.tanh %249 : vector<2x32xf32>
    %251 = vector.extract_strided_slice %228 {offsets = [0, 96], sizes = [2, 32], strides = [1, 1]} : vector<2x128xf32> to vector<2x32xf32>
    %252 = arith.negf %251 : vector<2x32xf32>
    %253 = math.exp %252 : vector<2x32xf32>
    %cst_70 = arith.constant 1.000000e+00 : f32
    %254 = vector.broadcast %cst_70 : f32 to vector<2x32xf32>
    %255 = arith.addf %254, %253 : vector<2x32xf32>
    %256 = arith.divf %254, %255 : vector<2x32xf32>
    %257 = arith.mulf %248, %198 : vector<2x32xf32>
    %258 = arith.mulf %242, %250 : vector<2x32xf32>
    %259 = arith.addf %257, %258 : vector<2x32xf32>
    %260 = math.tanh %259 : vector<2x32xf32>
    %261 = arith.mulf %256, %260 : vector<2x32xf32>
    %262 = vector.extract_strided_slice %236 {offsets = [0, 0], sizes = [2, 32], strides = [1, 1]} : vector<2x128xf32> to vector<2x32xf32>
    %263 = arith.negf %262 : vector<2x32xf32>
    %264 = math.exp %263 : vector<2x32xf32>
    %cst_71 = arith.constant 1.000000e+00 : f32
    %265 = vector.broadcast %cst_71 : f32 to vector<2x32xf32>
    %266 = arith.addf %265, %264 : vector<2x32xf32>
    %267 = arith.divf %265, %266 : vector<2x32xf32>
    %268 = vector.extract_strided_slice %236 {offsets = [0, 32], sizes = [2, 32], strides = [1, 1]} : vector<2x128xf32> to vector<2x32xf32>
    %269 = arith.negf %268 : vector<2x32xf32>
    %270 = math.exp %269 : vector<2x32xf32>
    %cst_72 = arith.constant 1.000000e+00 : f32
    %271 = vector.broadcast %cst_72 : f32 to vector<2x32xf32>
    %272 = arith.addf %271, %270 : vector<2x32xf32>
    %273 = arith.divf %271, %272 : vector<2x32xf32>
    %274 = vector.extract_strided_slice %236 {offsets = [0, 64], sizes = [2, 32], strides = [1, 1]} : vector<2x128xf32> to vector<2x32xf32>
    %275 = math.tanh %274 : vector<2x32xf32>
    %276 = vector.extract_strided_slice %236 {offsets = [0, 96], sizes = [2, 32], strides = [1, 1]} : vector<2x128xf32> to vector<2x32xf32>
    %277 = arith.negf %276 : vector<2x32xf32>
    %278 = math.exp %277 : vector<2x32xf32>
    %cst_73 = arith.constant 1.000000e+00 : f32
    %279 = vector.broadcast %cst_73 : f32 to vector<2x32xf32>
    %280 = arith.addf %279, %278 : vector<2x32xf32>
    %281 = arith.divf %279, %280 : vector<2x32xf32>
    %282 = arith.mulf %273, %208 : vector<2x32xf32>
    %283 = arith.mulf %267, %275 : vector<2x32xf32>
    %284 = arith.addf %282, %283 : vector<2x32xf32>
    %285 = math.tanh %284 : vector<2x32xf32>
    %286 = arith.mulf %281, %285 : vector<2x32xf32>
    %c2_i32_74 = arith.constant 2 : i32
    %287 = arith.addi %12, %c2_i32_74 : i32
    %288 = vector.broadcast %287 : i32 to vector<2x1xi32>
    %289 = arith.cmpi sgt, %3, %288 : vector<2x1xi32>
    %c1_i32_75 = arith.constant 1 : i32
    %290 = arith.addi %14, %c1_i32_75 : i32
    %291 = vector.broadcast %290 : i32 to vector<2x1xi32>
    %292 = arith.cmpi sgt, %3, %291 : vector<2x1xi32>
    %293 = vector.shape_cast %289 : vector<2x1xi1> to vector<2x1xi1>
    %294 = vector.broadcast %293 : vector<2x1xi1> to vector<2x32xi1>
    %295 = arith.select %294, %261, %195 : vector<2x32xi1>, vector<2x32xf32>
    %296 = vector.shape_cast %289 : vector<2x1xi1> to vector<2x1xi1>
    %297 = vector.broadcast %296 : vector<2x1xi1> to vector<2x32xi1>
    %298 = arith.select %297, %259, %198 : vector<2x32xi1>, vector<2x32xf32>
    %cst_76 = arith.constant 0.000000e+00 : f32
    %299 = vector.shape_cast %289 : vector<2x1xi1> to vector<2x1xi1>
    %300 = vector.broadcast %299 : vector<2x1xi1> to vector<2x32xi1>
    %301 = vector.broadcast %cst_76 : f32 to vector<2x32xf32>
    %302 = arith.select %300, %261, %301 : vector<2x32xi1>, vector<2x32xf32>
    %303 = vector.shape_cast %292 : vector<2x1xi1> to vector<2x1xi1>
    %304 = vector.broadcast %303 : vector<2x1xi1> to vector<2x32xi1>
    %305 = arith.select %304, %286, %205 : vector<2x32xi1>, vector<2x32xf32>
    %306 = vector.shape_cast %292 : vector<2x1xi1> to vector<2x1xi1>
    %307 = vector.broadcast %306 : vector<2x1xi1> to vector<2x32xi1>
    %308 = arith.select %307, %284, %208 : vector<2x32xi1>, vector<2x32xf32>
    %cst_77 = arith.constant 0.000000e+00 : f32
    %309 = vector.shape_cast %292 : vector<2x1xi1> to vector<2x1xi1>
    %310 = vector.broadcast %309 : vector<2x1xi1> to vector<2x32xi1>
    %311 = vector.broadcast %cst_77 : f32 to vector<2x32xf32>
    %312 = arith.select %310, %286, %311 : vector<2x32xi1>, vector<2x32xf32>
    %c2_78 = arith.constant 2 : index
    %c0_79 = arith.constant 0 : index
    %c0_80 = arith.constant 0 : index
    %313 = vector.load %arg6[%c2_78, %c0_79, %c0_80] : memref<4x2x32xf32, #tpu.memory_space<vmem>>, vector<1x2x32xf32>
    %314 = vector.shape_cast %313 : vector<1x2x32xf32> to vector<2x32xf32>
    %315 = vector.shape_cast %302 : vector<2x32xf32> to vector<1x2x32xf32>
    tpu.vector_store %arg6[%c2_78, %c0_79, %c0_80], %315 {strides = array<i32>} : memref<4x2x32xf32, #tpu.memory_space<vmem>>, vector<1x2x32xf32>,
    %c1_81 = arith.constant 1 : index
    %c0_82 = arith.constant 0 : index
    %c0_83 = arith.constant 0 : index
    %316 = vector.load %arg7[%c1_81, %c0_82, %c0_83] : memref<4x2x32xf32, #tpu.memory_space<vmem>>, vector<1x2x32xf32>
    %317 = vector.shape_cast %316 : vector<1x2x32xf32> to vector<2x32xf32>
    %318 = vector.shape_cast %312 : vector<2x32xf32> to vector<1x2x32xf32>
    tpu.vector_store %arg7[%c1_81, %c0_82, %c0_83], %318 {strides = array<i32>} : memref<4x2x32xf32, #tpu.memory_space<vmem>>, vector<1x2x32xf32>,
    %319 = arith.addf %219, %302 : vector<2x32xf32>
    %320 = arith.addf %220, %312 : vector<2x32xf32>
    %c3_84 = arith.constant 3 : index
    %c0_85 = arith.constant 0 : index
    %c0_86 = arith.constant 0 : index
    %321 = vector.load %arg2[%c3_84, %c0_85, %c0_86] : memref<4x2x128xbf16, #tpu.memory_space<vmem>>, vector<1x2x128xbf16>
    %322 = vector.shape_cast %321 : vector<1x2x128xbf16> to vector<2x128xbf16>
    %323 = arith.extf %322 : vector<2x128xbf16> to vector<2x128xf32>
    %324 = vector.broadcast %10 : vector<1x128xf32> to vector<2x128xf32>
    %325 = arith.addf %323, %324 : vector<2x128xf32>
    %326 = arith.truncf %295 : vector<2x32xf32> to vector<2x32xbf16>
    %cst_87 = arith.constant dense<0.000000e+00> : vector<2x128xf32>
    %327 = tpu.matmul %326, %6, %cst_87 {dimension_numbers = #tpu.dot_dimension_numbers<[1], [0], [0], [1], [0, 0, 1, 1], [], []>} : vector<2x32xbf16>, vector<32x128xbf16>, vector<2x128xf32> -> vector<2x128xf32>
    %328 = arith.addf %325, %327 : vector<2x128xf32>
    %c0_88 = arith.constant 0 : index
    %c0_89 = arith.constant 0 : index
    %c0_90 = arith.constant 0 : index
    %329 = vector.load %arg3[%c0_88, %c0_89, %c0_90] : memref<4x2x128xbf16, #tpu.memory_space<vmem>>, vector<1x2x128xbf16>
    %330 = vector.shape_cast %329 : vector<1x2x128xbf16> to vector<2x128xbf16>
    %331 = arith.extf %330 : vector<2x128xbf16> to vector<2x128xf32>
    %332 = vector.broadcast %11 : vector<1x128xf32> to vector<2x128xf32>
    %333 = arith.addf %331, %332 : vector<2x128xf32>
    %334 = arith.truncf %305 : vector<2x32xf32> to vector<2x32xbf16>
    %cst_91 = arith.constant dense<0.000000e+00> : vector<2x128xf32>
    %335 = tpu.matmul %334, %8, %cst_91 {dimension_numbers = #tpu.dot_dimension_numbers<[1], [0], [0], [1], [0, 0, 1, 1], [], []>} : vector<2x32xbf16>, vector<32x128xbf16>, vector<2x128xf32> -> vector<2x128xf32>
    %336 = arith.addf %333, %335 : vector<2x128xf32>
    %337 = vector.extract_strided_slice %328 {offsets = [0, 0], sizes = [2, 32], strides = [1, 1]} : vector<2x128xf32> to vector<2x32xf32>
    %338 = arith.negf %337 : vector<2x32xf32>
    %339 = math.exp %338 : vector<2x32xf32>
    %cst_92 = arith.constant 1.000000e+00 : f32
    %340 = vector.broadcast %cst_92 : f32 to vector<2x32xf32>
    %341 = arith.addf %340, %339 : vector<2x32xf32>
    %342 = arith.divf %340, %341 : vector<2x32xf32>
    %343 = vector.extract_strided_slice %328 {offsets = [0, 32], sizes = [2, 32], strides = [1, 1]} : vector<2x128xf32> to vector<2x32xf32>
    %344 = arith.negf %343 : vector<2x32xf32>
    %345 = math.exp %344 : vector<2x32xf32>
    %cst_93 = arith.constant 1.000000e+00 : f32
    %346 = vector.broadcast %cst_93 : f32 to vector<2x32xf32>
    %347 = arith.addf %346, %345 : vector<2x32xf32>
    %348 = arith.divf %346, %347 : vector<2x32xf32>
    %349 = vector.extract_strided_slice %328 {offsets = [0, 64], sizes = [2, 32], strides = [1, 1]} : vector<2x128xf32> to vector<2x32xf32>
    %350 = math.tanh %349 : vector<2x32xf32>
    %351 = vector.extract_strided_slice %328 {offsets = [0, 96], sizes = [2, 32], strides = [1, 1]} : vector<2x128xf32> to vector<2x32xf32>
    %352 = arith.negf %351 : vector<2x32xf32>
    %353 = math.exp %352 : vector<2x32xf32>
    %cst_94 = arith.constant 1.000000e+00 : f32
    %354 = vector.broadcast %cst_94 : f32 to vector<2x32xf32>
    %355 = arith.addf %354, %353 : vector<2x32xf32>
    %356 = arith.divf %354, %355 : vector<2x32xf32>
    %357 = arith.mulf %348, %298 : vector<2x32xf32>
    %358 = arith.mulf %342, %350 : vector<2x32xf32>
    %359 = arith.addf %357, %358 : vector<2x32xf32>
    %360 = math.tanh %359 : vector<2x32xf32>
    %361 = arith.mulf %356, %360 : vector<2x32xf32>
    %362 = vector.extract_strided_slice %336 {offsets = [0, 0], sizes = [2, 32], strides = [1, 1]} : vector<2x128xf32> to vector<2x32xf32>
    %363 = arith.negf %362 : vector<2x32xf32>
    %364 = math.exp %363 : vector<2x32xf32>
    %cst_95 = arith.constant 1.000000e+00 : f32
    %365 = vector.broadcast %cst_95 : f32 to vector<2x32xf32>
    %366 = arith.addf %365, %364 : vector<2x32xf32>
    %367 = arith.divf %365, %366 : vector<2x32xf32>
    %368 = vector.extract_strided_slice %336 {offsets = [0, 32], sizes = [2, 32], strides = [1, 1]} : vector<2x128xf32> to vector<2x32xf32>
    %369 = arith.negf %368 : vector<2x32xf32>
    %370 = math.exp %369 : vector<2x32xf32>
    %cst_96 = arith.constant 1.000000e+00 : f32
    %371 = vector.broadcast %cst_96 : f32 to vector<2x32xf32>
    %372 = arith.addf %371, %370 : vector<2x32xf32>
    %373 = arith.divf %371, %372 : vector<2x32xf32>
    %374 = vector.extract_strided_slice %336 {offsets = [0, 64], sizes = [2, 32], strides = [1, 1]} : vector<2x128xf32> to vector<2x32xf32>
    %375 = math.tanh %374 : vector<2x32xf32>
    %376 = vector.extract_strided_slice %336 {offsets = [0, 96], sizes = [2, 32], strides = [1, 1]} : vector<2x128xf32> to vector<2x32xf32>
    %377 = arith.negf %376 : vector<2x32xf32>
    %378 = math.exp %377 : vector<2x32xf32>
    %cst_97 = arith.constant 1.000000e+00 : f32
    %379 = vector.broadcast %cst_97 : f32 to vector<2x32xf32>
    %380 = arith.addf %379, %378 : vector<2x32xf32>
    %381 = arith.divf %379, %380 : vector<2x32xf32>
    %382 = arith.mulf %373, %308 : vector<2x32xf32>
    %383 = arith.mulf %367, %375 : vector<2x32xf32>
    %384 = arith.addf %382, %383 : vector<2x32xf32>
    %385 = math.tanh %384 : vector<2x32xf32>
    %386 = arith.mulf %381, %385 : vector<2x32xf32>
    %c3_i32_98 = arith.constant 3 : i32
    %387 = arith.addi %12, %c3_i32_98 : i32
    %388 = vector.broadcast %387 : i32 to vector<2x1xi32>
    %389 = arith.cmpi sgt, %3, %388 : vector<2x1xi32>
    %c0_i32_99 = arith.constant 0 : i32
    %390 = arith.addi %14, %c0_i32_99 : i32
    %391 = vector.broadcast %390 : i32 to vector<2x1xi32>
    %392 = arith.cmpi sgt, %3, %391 : vector<2x1xi32>
    %393 = vector.shape_cast %389 : vector<2x1xi1> to vector<2x1xi1>
    %394 = vector.broadcast %393 : vector<2x1xi1> to vector<2x32xi1>
    %395 = arith.select %394, %361, %295 : vector<2x32xi1>, vector<2x32xf32>
    %396 = vector.shape_cast %389 : vector<2x1xi1> to vector<2x1xi1>
    %397 = vector.broadcast %396 : vector<2x1xi1> to vector<2x32xi1>
    %398 = arith.select %397, %359, %298 : vector<2x32xi1>, vector<2x32xf32>
    %cst_100 = arith.constant 0.000000e+00 : f32
    %399 = vector.shape_cast %389 : vector<2x1xi1> to vector<2x1xi1>
    %400 = vector.broadcast %399 : vector<2x1xi1> to vector<2x32xi1>
    %401 = vector.broadcast %cst_100 : f32 to vector<2x32xf32>
    %402 = arith.select %400, %361, %401 : vector<2x32xi1>, vector<2x32xf32>
    %403 = vector.shape_cast %392 : vector<2x1xi1> to vector<2x1xi1>
    %404 = vector.broadcast %403 : vector<2x1xi1> to vector<2x32xi1>
    %405 = arith.select %404, %386, %305 : vector<2x32xi1>, vector<2x32xf32>
    %406 = vector.shape_cast %392 : vector<2x1xi1> to vector<2x1xi1>
    %407 = vector.broadcast %406 : vector<2x1xi1> to vector<2x32xi1>
    %408 = arith.select %407, %384, %308 : vector<2x32xi1>, vector<2x32xf32>
    %cst_101 = arith.constant 0.000000e+00 : f32
    %409 = vector.shape_cast %392 : vector<2x1xi1> to vector<2x1xi1>
    %410 = vector.broadcast %409 : vector<2x1xi1> to vector<2x32xi1>
    %411 = vector.broadcast %cst_101 : f32 to vector<2x32xf32>
    %412 = arith.select %410, %386, %411 : vector<2x32xi1>, vector<2x32xf32>
    %c3_102 = arith.constant 3 : index
    %c0_103 = arith.constant 0 : index
    %c0_104 = arith.constant 0 : index
    %413 = vector.load %arg6[%c3_102, %c0_103, %c0_104] : memref<4x2x32xf32, #tpu.memory_space<vmem>>, vector<1x2x32xf32>
    %414 = vector.shape_cast %413 : vector<1x2x32xf32> to vector<2x32xf32>
    %415 = vector.shape_cast %402 : vector<2x32xf32> to vector<1x2x32xf32>
    tpu.vector_store %arg6[%c3_102, %c0_103, %c0_104], %415 {strides = array<i32>} : memref<4x2x32xf32, #tpu.memory_space<vmem>>, vector<1x2x32xf32>,
    %c0_105 = arith.constant 0 : index
    %c0_106 = arith.constant 0 : index
    %c0_107 = arith.constant 0 : index
    %416 = vector.load %arg7[%c0_105, %c0_106, %c0_107] : memref<4x2x32xf32, #tpu.memory_space<vmem>>, vector<1x2x32xf32>
    %417 = vector.shape_cast %416 : vector<1x2x32xf32> to vector<2x32xf32>
    %418 = vector.shape_cast %412 : vector<2x32xf32> to vector<1x2x32xf32>
    tpu.vector_store %arg7[%c0_105, %c0_106, %c0_107], %418 {strides = array<i32>} : memref<4x2x32xf32, #tpu.memory_space<vmem>>, vector<1x2x32xf32>,
    %419 = arith.addf %319, %402 : vector<2x32xf32>
    %420 = arith.addf %320, %412 : vector<2x32xf32>
    %c0_108 = arith.constant 0 : index
    %c0_109 = arith.constant 0 : index
    %421 = vector.load %arg10[%c0_108, %c0_109] : memref<2x32xf32, #tpu.memory_space<vmem>>, vector<2x32xf32>
    tpu.vector_store %arg10[%c0_108, %c0_109], %395 {strides = array<i32>} : memref<2x32xf32, #tpu.memory_space<vmem>>, vector<2x32xf32>,
    %c0_110 = arith.constant 0 : index
    %c0_111 = arith.constant 0 : index
    %422 = vector.load %arg11[%c0_110, %c0_111] : memref<2x32xf32, #tpu.memory_space<vmem>>, vector<2x32xf32>
    tpu.vector_store %arg11[%c0_110, %c0_111], %398 {strides = array<i32>} : memref<2x32xf32, #tpu.memory_space<vmem>>, vector<2x32xf32>,
    %c0_112 = arith.constant 0 : index
    %c0_113 = arith.constant 0 : index
    %423 = vector.load %arg12[%c0_112, %c0_113] : memref<2x32xf32, #tpu.memory_space<vmem>>, vector<2x32xf32>
    tpu.vector_store %arg12[%c0_112, %c0_113], %405 {strides = array<i32>} : memref<2x32xf32, #tpu.memory_space<vmem>>, vector<2x32xf32>,
    %c0_114 = arith.constant 0 : index
    %c0_115 = arith.constant 0 : index
    %424 = vector.load %arg13[%c0_114, %c0_115] : memref<2x32xf32, #tpu.memory_space<vmem>>, vector<2x32xf32>
    tpu.vector_store %arg13[%c0_114, %c0_115], %408 {strides = array<i32>} : memref<2x32xf32, #tpu.memory_space<vmem>>, vector<2x32xf32>,
    %c0_116 = arith.constant 0 : index
    %c0_117 = arith.constant 0 : index
    %425 = vector.load %arg8[%c0_116, %c0_117] : memref<2x32xf32, #tpu.memory_space<vmem>>, vector<2x32xf32>
    %426 = arith.addf %425, %419 : vector<2x32xf32>
    %c0_118 = arith.constant 0 : index
    %c0_119 = arith.constant 0 : index
    %427 = vector.load %arg8[%c0_118, %c0_119] : memref<2x32xf32, #tpu.memory_space<vmem>>, vector<2x32xf32>
    tpu.vector_store %arg8[%c0_118, %c0_119], %426 {strides = array<i32>} : memref<2x32xf32, #tpu.memory_space<vmem>>, vector<2x32xf32>,
    %c0_120 = arith.constant 0 : index
    %c0_121 = arith.constant 0 : index
    %428 = vector.load %arg9[%c0_120, %c0_121] : memref<2x32xf32, #tpu.memory_space<vmem>>, vector<2x32xf32>
    %429 = arith.addf %428, %420 : vector<2x32xf32>
    %c0_122 = arith.constant 0 : index
    %c0_123 = arith.constant 0 : index
    %430 = vector.load %arg9[%c0_122, %c0_123] : memref<2x32xf32, #tpu.memory_space<vmem>>, vector<2x32xf32>
    tpu.vector_store %arg9[%c0_122, %c0_123], %429 {strides = array<i32>} : memref<2x32xf32, #tpu.memory_space<vmem>>, vector<2x32xf32>,
    %c1_i32_124 = arith.constant 1 : i32
    %431 = arith.cmpi eq, %arg0, %c1_i32_124 : i32
    %432 = arith.extui %431 : i1 to i32
    %c0_i32_125 = arith.constant 0 : i32
    %433 = arith.cmpi ne, %432, %c0_i32_125 : i32
    scf.if %433 {
      %434 = arith.sitofp %3 : vector<2x1xi32> to vector<2x1xf32>
      %cst_126 = arith.constant 1.000000e+00 : f32
      %435 = vector.broadcast %cst_126 : f32 to vector<2x1xf32>
      %436 = arith.maximumf %434, %435 : vector<2x1xf32>
      %cst_127 = arith.constant 1.000000e+00 : f32
      %437 = vector.broadcast %cst_127 : f32 to vector<2x1xf32>
      %438 = arith.divf %437, %436 : vector<2x1xf32>
      %c0_128 = arith.constant 0 : index
      %c0_129 = arith.constant 0 : index
      %439 = vector.load %arg8[%c0_128, %c0_129] : memref<2x32xf32, #tpu.memory_space<vmem>>, vector<2x32xf32>
      %440 = vector.broadcast %438 : vector<2x1xf32> to vector<2x32xf32>
      %441 = arith.mulf %439, %440 : vector<2x32xf32>
      %c0_130 = arith.constant 0 : index
      %c0_131 = arith.constant 0 : index
      %442 = vector.load %arg8[%c0_130, %c0_131] : memref<2x32xf32, #tpu.memory_space<vmem>>, vector<2x32xf32>
      tpu.vector_store %arg8[%c0_130, %c0_131], %441 {strides = array<i32>} : memref<2x32xf32, #tpu.memory_space<vmem>>, vector<2x32xf32>,
      %c0_132 = arith.constant 0 : index
      %c0_133 = arith.constant 0 : index
      %443 = vector.load %arg9[%c0_132, %c0_133] : memref<2x32xf32, #tpu.memory_space<vmem>>, vector<2x32xf32>
      %444 = vector.broadcast %438 : vector<2x1xf32> to vector<2x32xf32>
      %445 = arith.mulf %443, %444 : vector<2x32xf32>
      %c0_134 = arith.constant 0 : index
      %c0_135 = arith.constant 0 : index
      %446 = vector.load %arg9[%c0_134, %c0_135] : memref<2x32xf32, #tpu.memory_space<vmem>>, vector<2x32xf32>
      tpu.vector_store %arg9[%c0_134, %c0_135], %445 {strides = array<i32>} : memref<2x32xf32, #tpu.memory_space<vmem>>, vector<2x32xf32>,
    } else {
    }
    return
  }
  func.func @transform_0(%arg0: i32) -> (i32, i32) {
    %c0_i32 = arith.constant 0 : i32
    %c0_i32_0 = arith.constant 0 : i32
    %c0_i32_1 = arith.constant 0 : i32
    return %c0_i32, %c0_i32_0 : i32, i32
  }
  func.func @transform_1(%arg0: i32) -> (i32, i32, i32) {
    %c0_i32 = arith.constant 0 : i32
    %c0_i32_0 = arith.constant 0 : i32
    %c0_i32_1 = arith.constant 0 : i32
    return %arg0, %c0_i32, %c0_i32_0 : i32, i32, i32
  }
  func.func @transform_2(%arg0: i32) -> (i32, i32, i32) {
    %c1_i32 = arith.constant 1 : i32
    %0 = arith.subi %c1_i32, %arg0 : i32
    %c0_i32 = arith.constant 0 : i32
    %c0_i32_0 = arith.constant 0 : i32
    %c0_i32_1 = arith.constant 0 : i32
    return %0, %c0_i32, %c0_i32_0 : i32, i32, i32
  }
  func.func @transform_3(%arg0: i32) -> (i32, i32, i32) {
    %c0_i32 = arith.constant 0 : i32
    %c0_i32_0 = arith.constant 0 : i32
    %c0_i32_1 = arith.constant 0 : i32
    %c0_i32_2 = arith.constant 0 : i32
    return %c0_i32, %c0_i32_0, %c0_i32_1 : i32, i32, i32
  }
  func.func @transform_4(%arg0: i32) -> (i32, i32) {
    %c0_i32 = arith.constant 0 : i32
    %c0_i32_0 = arith.constant 0 : i32
    %c0_i32_1 = arith.constant 0 : i32
    return %c0_i32, %c0_i32_0 : i32, i32
  }
  func.func @transform_5(%arg0: i32) -> (i32, i32, i32) {
    %c0_i32 = arith.constant 0 : i32
    %c0_i32_0 = arith.constant 0 : i32
    %c0_i32_1 = arith.constant 0 : i32
    return %arg0, %c0_i32, %c0_i32_0 : i32, i32, i32
  }
  func.func @transform_6(%arg0: i32) -> (i32, i32, i32) {
    %c1_i32 = arith.constant 1 : i32
    %0 = arith.subi %c1_i32, %arg0 : i32
    %c0_i32 = arith.constant 0 : i32
    %c0_i32_0 = arith.constant 0 : i32
    %c0_i32_1 = arith.constant 0 : i32
    return %0, %c0_i32, %c0_i32_0 : i32, i32, i32
  }
  func.func @transform_7(%arg0: i32) -> (i32, i32) {
    %c0_i32 = arith.constant 0 : i32
    %c0_i32_0 = arith.constant 0 : i32
    %c0_i32_1 = arith.constant 0 : i32
    return %c0_i32, %c0_i32_0 : i32, i32
  }
  func.func @transform_8(%arg0: i32) -> (i32, i32) {
    %c0_i32 = arith.constant 0 : i32
    %c0_i32_0 = arith.constant 0 : i32
    %c0_i32_1 = arith.constant 0 : i32
    return %c0_i32, %c0_i32_0 : i32, i32
  }
}

module attributes {stable_mosaic.version = 11 : i64} {
  func.func @_bilstm_chunk_kernel(%arg0: i32, %arg1: memref<2x1xi32, #tpu.memory_space<vmem>>, %arg2: memref<4x2x128xbf16, #tpu.memory_space<vmem>>, %arg3: memref<4x2x128xbf16, #tpu.memory_space<vmem>>, %arg4: memref<2x32x128xbf16, #tpu.memory_space<vmem>>, %arg5: memref<2x128xf32, #tpu.memory_space<vmem>>, %arg6: memref<4x2x32xf32, #tpu.memory_space<vmem>>, %arg7: memref<4x2x32xf32, #tpu.memory_space<vmem>>, %arg8: memref<2x32xf32, #tpu.memory_space<vmem>>, %arg9: memref<2x32xf32, #tpu.memory_space<vmem>>, %arg10: memref<2x32xf32, #tpu.memory_space<vmem>>, %arg11: memref<2x32xf32, #tpu.memory_space<vmem>>, %arg12: memref<2x32xf32, #tpu.memory_space<vmem>>, %arg13: memref<2x32xf32, #tpu.memory_space<vmem>>) attributes {dimension_semantics = [#tpu.dimension_semantics<arbitrary>], iteration_bounds = array<i64: 2>, scalar_prefetch = 0 : i64, scratch_operands = 4 : i64, tpu.core_type = #tpu.core_type<tc>, window_params = [{pipeline_mode = #tpu.pipeline_mode<synchronous>, transform_indices = @transform_0, window_bounds = array<i64: 2, 1>}, {transform_indices = @transform_1, window_bounds = array<i64: 4, 2, 128>}, {transform_indices = @transform_2, window_bounds = array<i64: 4, 2, 128>}, {pipeline_mode = #tpu.pipeline_mode<synchronous>, transform_indices = @transform_3, window_bounds = array<i64: 2, 32, 128>}, {pipeline_mode = #tpu.pipeline_mode<synchronous>, transform_indices = @transform_4, window_bounds = array<i64: 2, 128>}, {transform_indices = @transform_5, window_bounds = array<i64: 4, 2, 32>}, {transform_indices = @transform_6, window_bounds = array<i64: 4, 2, 32>}, {pipeline_mode = #tpu.pipeline_mode<synchronous>, transform_indices = @transform_7, window_bounds = array<i64: 2, 32>}, {pipeline_mode = #tpu.pipeline_mode<synchronous>, transform_indices = @transform_8, window_bounds = array<i64: 2, 32>}]} {
    %c0_i32 = arith.constant 0 : i32
    %0 = arith.cmpi eq, %arg0, %c0_i32 : i32
    %1 = arith.extui %0 : i1 to i32
    %c0_i32_0 = arith.constant 0 : i32
    %2 = arith.cmpi ne, %1, %c0_i32_0 : i32
    scf.if %2 {
      %cst_126 = arith.constant 0.000000e+00 : f32
      %434 = vector.broadcast %cst_126 : f32 to vector<2x32xf32>
      %c0_127 = arith.constant 0 : index
      %c0_128 = arith.constant 0 : index
      %435 = vector.load %arg10[%c0_127, %c0_128] : memref<2x32xf32, #tpu.memory_space<vmem>>, vector<2x32xf32>
      tpu.vector_store %arg10[%c0_127, %c0_128], %434 {strides = array<i32>} : memref<2x32xf32, #tpu.memory_space<vmem>>, vector<2x32xf32>,
      %cst_129 = arith.constant 0.000000e+00 : f32
      %436 = vector.broadcast %cst_129 : f32 to vector<2x32xf32>
      %c0_130 = arith.constant 0 : index
      %c0_131 = arith.constant 0 : index
      %437 = vector.load %arg11[%c0_130, %c0_131] : memref<2x32xf32, #tpu.memory_space<vmem>>, vector<2x32xf32>
      tpu.vector_store %arg11[%c0_130, %c0_131], %436 {strides = array<i32>} : memref<2x32xf32, #tpu.memory_space<vmem>>, vector<2x32xf32>,
      %cst_132 = arith.constant 0.000000e+00 : f32
      %438 = vector.broadcast %cst_132 : f32 to vector<2x32xf32>
      %c0_133 = arith.constant 0 : index
      %c0_134 = arith.constant 0 : index
      %439 = vector.load %arg12[%c0_133, %c0_134] : memref<2x32xf32, #tpu.memory_space<vmem>>, vector<2x32xf32>
      tpu.vector_store %arg12[%c0_133, %c0_134], %438 {strides = array<i32>} : memref<2x32xf32, #tpu.memory_space<vmem>>, vector<2x32xf32>,
      %cst_135 = arith.constant 0.000000e+00 : f32
      %440 = vector.broadcast %cst_135 : f32 to vector<2x32xf32>
      %c0_136 = arith.constant 0 : index
      %c0_137 = arith.constant 0 : index
      %441 = vector.load %arg13[%c0_136, %c0_137] : memref<2x32xf32, #tpu.memory_space<vmem>>, vector<2x32xf32>
      tpu.vector_store %arg13[%c0_136, %c0_137], %440 {strides = array<i32>} : memref<2x32xf32, #tpu.memory_space<vmem>>, vector<2x32xf32>,
      %cst_138 = arith.constant 0.000000e+00 : f32
      %442 = vector.broadcast %cst_138 : f32 to vector<2x32xf32>
      %c0_139 = arith.constant 0 : index
      %c0_140 = arith.constant 0 : index
      %443 = vector.load %arg8[%c0_139, %c0_140] : memref<2x32xf32, #tpu.memory_space<vmem>>, vector<2x32xf32>
      tpu.vector_store %arg8[%c0_139, %c0_140], %442 {strides = array<i32>} : memref<2x32xf32, #tpu.memory_space<vmem>>, vector<2x32xf32>,
      %cst_141 = arith.constant 0.000000e+00 : f32
      %444 = vector.broadcast %cst_141 : f32 to vector<2x32xf32>
      %c0_142 = arith.constant 0 : index
      %c0_143 = arith.constant 0 : index
      %445 = vector.load %arg9[%c0_142, %c0_143] : memref<2x32xf32, #tpu.memory_space<vmem>>, vector<2x32xf32>
      tpu.vector_store %arg9[%c0_142, %c0_143], %444 {strides = array<i32>} : memref<2x32xf32, #tpu.memory_space<vmem>>, vector<2x32xf32>,
    } else {
    }
    %c0 = arith.constant 0 : index
    %c0_1 = arith.constant 0 : index
    %3 = vector.load %arg1[%c0, %c0_1] : memref<2x1xi32, #tpu.memory_space<vmem>>, vector<2x1xi32>
    %c0_2 = arith.constant 0 : index
    %c0_3 = arith.constant 0 : index
    %c0_4 = arith.constant 0 : index
    %4 = vector.load %arg4[%c0_2, %c0_3, %c0_4] : memref<2x32x128xbf16, #tpu.memory_space<vmem>>, vector<2x32x128xbf16>
    %5 = vector.extract_strided_slice %4 {offsets = [0, 0, 0], sizes = [1, 32, 128], strides = [1, 1, 1]} : vector<2x32x128xbf16> to vector<1x32x128xbf16>
    %6 = vector.shape_cast %5 : vector<1x32x128xbf16> to vector<32x128xbf16>
    %7 = vector.extract_strided_slice %4 {offsets = [1, 0, 0], sizes = [1, 32, 128], strides = [1, 1, 1]} : vector<2x32x128xbf16> to vector<1x32x128xbf16>
    %8 = vector.shape_cast %7 : vector<1x32x128xbf16> to vector<32x128xbf16>
    %c0_5 = arith.constant 0 : index
    %c0_6 = arith.constant 0 : index
    %9 = vector.load %arg5[%c0_5, %c0_6] : memref<2x128xf32, #tpu.memory_space<vmem>>, vector<2x128xf32>
    %10 = vector.extract_strided_slice %9 {offsets = [0, 0], sizes = [1, 128], strides = [1, 1]} : vector<2x128xf32> to vector<1x128xf32>
    %11 = vector.extract_strided_slice %9 {offsets = [1, 0], sizes = [1, 128], strides = [1, 1]} : vector<2x128xf32> to vector<1x128xf32>
    %c4_i32 = arith.constant 4 : i32
    %12 = arith.muli %arg0, %c4_i32 : i32
    %c1_i32 = arith.constant 1 : i32
    %13 = arith.subi %c1_i32, %arg0 : i32
    %c4_i32_7 = arith.constant 4 : i32
    %14 = arith.muli %13, %c4_i32_7 : i32
    %c0_8 = arith.constant 0 : index
    %c0_9 = arith.constant 0 : index
    %15 = vector.load %arg10[%c0_8, %c0_9] : memref<2x32xf32, #tpu.memory_space<vmem>>, vector<2x32xf32>
    %c0_10 = arith.constant 0 : index
    %c0_11 = arith.constant 0 : index
    %16 = vector.load %arg11[%c0_10, %c0_11] : memref<2x32xf32, #tpu.memory_space<vmem>>, vector<2x32xf32>
    %c0_12 = arith.constant 0 : index
    %c0_13 = arith.constant 0 : index
    %17 = vector.load %arg12[%c0_12, %c0_13] : memref<2x32xf32, #tpu.memory_space<vmem>>, vector<2x32xf32>
    %c0_14 = arith.constant 0 : index
    %c0_15 = arith.constant 0 : index
    %18 = vector.load %arg13[%c0_14, %c0_15] : memref<2x32xf32, #tpu.memory_space<vmem>>, vector<2x32xf32>
    %cst = arith.constant 0.000000e+00 : f32
    %19 = vector.broadcast %cst : f32 to vector<2x32xf32>
    %cst_16 = arith.constant 0.000000e+00 : f32
    %20 = vector.broadcast %cst_16 : f32 to vector<2x32xf32>
    %c0_17 = arith.constant 0 : index
    %c0_18 = arith.constant 0 : index
    %c0_19 = arith.constant 0 : index
    %21 = vector.load %arg2[%c0_17, %c0_18, %c0_19] : memref<4x2x128xbf16, #tpu.memory_space<vmem>>, vector<1x2x128xbf16>
    %22 = vector.shape_cast %21 : vector<1x2x128xbf16> to vector<2x128xbf16>
    %23 = arith.extf %22 : vector<2x128xbf16> to vector<2x128xf32>
    %24 = vector.broadcast %10 : vector<1x128xf32> to vector<2x128xf32>
    %25 = arith.addf %23, %24 : vector<2x128xf32>
    %26 = arith.truncf %15 : vector<2x32xf32> to vector<2x32xbf16>
    %cst_20 = arith.constant dense<0.000000e+00> : vector<2x128xf32>
    %27 = tpu.matmul %26, %6, %cst_20 {dimension_numbers = #tpu.dot_dimension_numbers<[1], [0], [0], [1], [0, 0, 1, 1], [], []>} : vector<2x32xbf16>, vector<32x128xbf16>, vector<2x128xf32> -> vector<2x128xf32>
    %28 = arith.addf %25, %27 : vector<2x128xf32>
    %c3 = arith.constant 3 : index
    %c0_21 = arith.constant 0 : index
    %c0_22 = arith.constant 0 : index
    %29 = vector.load %arg3[%c3, %c0_21, %c0_22] : memref<4x2x128xbf16, #tpu.memory_space<vmem>>, vector<1x2x128xbf16>
    %30 = vector.shape_cast %29 : vector<1x2x128xbf16> to vector<2x128xbf16>
    %31 = arith.extf %30 : vector<2x128xbf16> to vector<2x128xf32>
    %32 = vector.broadcast %11 : vector<1x128xf32> to vector<2x128xf32>
    %33 = arith.addf %31, %32 : vector<2x128xf32>
    %34 = arith.truncf %17 : vector<2x32xf32> to vector<2x32xbf16>
    %cst_23 = arith.constant dense<0.000000e+00> : vector<2x128xf32>
    %35 = tpu.matmul %34, %8, %cst_23 {dimension_numbers = #tpu.dot_dimension_numbers<[1], [0], [0], [1], [0, 0, 1, 1], [], []>} : vector<2x32xbf16>, vector<32x128xbf16>, vector<2x128xf32> -> vector<2x128xf32>
    %36 = arith.addf %33, %35 : vector<2x128xf32>
    %37 = vector.extract_strided_slice %28 {offsets = [0, 0], sizes = [2, 32], strides = [1, 1]} : vector<2x128xf32> to vector<2x32xf32>
    %38 = arith.negf %37 : vector<2x32xf32>
    %39 = math.exp %38 : vector<2x32xf32>
    %cst_24 = arith.constant 1.000000e+00 : f32
    %40 = vector.broadcast %cst_24 : f32 to vector<2x32xf32>
    %41 = arith.addf %40, %39 : vector<2x32xf32>
    %42 = arith.divf %40, %41 : vector<2x32xf32>
    %43 = vector.extract_strided_slice %28 {offsets = [0, 32], sizes = [2, 32], strides = [1, 1]} : vector<2x128xf32> to vector<2x32xf32>
    %44 = arith.negf %43 : vector<2x32xf32>
    %45 = math.exp %44 : vector<2x32xf32>
    %cst_25 = arith.constant 1.000000e+00 : f32
    %46 = vector.broadcast %cst_25 : f32 to vector<2x32xf32>
    %47 = arith.addf %46, %45 : vector<2x32xf32>
    %48 = arith.divf %46, %47 : vector<2x32xf32>
    %49 = vector.extract_strided_slice %28 {offsets = [0, 64], sizes = [2, 32], strides = [1, 1]} : vector<2x128xf32> to vector<2x32xf32>
    %50 = math.tanh %49 : vector<2x32xf32>
    %51 = vector.extract_strided_slice %28 {offsets = [0, 96], sizes = [2, 32], strides = [1, 1]} : vector<2x128xf32> to vector<2x32xf32>
    %52 = arith.negf %51 : vector<2x32xf32>
    %53 = math.exp %52 : vector<2x32xf32>
    %cst_26 = arith.constant 1.000000e+00 : f32
    %54 = vector.broadcast %cst_26 : f32 to vector<2x32xf32>
    %55 = arith.addf %54, %53 : vector<2x32xf32>
    %56 = arith.divf %54, %55 : vector<2x32xf32>
    %57 = arith.mulf %48, %16 : vector<2x32xf32>
    %58 = arith.mulf %42, %50 : vector<2x32xf32>
    %59 = arith.addf %57, %58 : vector<2x32xf32>
    %60 = math.tanh %59 : vector<2x32xf32>
    %61 = arith.mulf %56, %60 : vector<2x32xf32>
    %62 = vector.extract_strided_slice %36 {offsets = [0, 0], sizes = [2, 32], strides = [1, 1]} : vector<2x128xf32> to vector<2x32xf32>
    %63 = arith.negf %62 : vector<2x32xf32>
    %64 = math.exp %63 : vector<2x32xf32>
    %cst_27 = arith.constant 1.000000e+00 : f32
    %65 = vector.broadcast %cst_27 : f32 to vector<2x32xf32>
    %66 = arith.addf %65, %64 : vector<2x32xf32>
    %67 = arith.divf %65, %66 : vector<2x32xf32>
    %68 = vector.extract_strided_slice %36 {offsets = [0, 32], sizes = [2, 32], strides = [1, 1]} : vector<2x128xf32> to vector<2x32xf32>
    %69 = arith.negf %68 : vector<2x32xf32>
    %70 = math.exp %69 : vector<2x32xf32>
    %cst_28 = arith.constant 1.000000e+00 : f32
    %71 = vector.broadcast %cst_28 : f32 to vector<2x32xf32>
    %72 = arith.addf %71, %70 : vector<2x32xf32>
    %73 = arith.divf %71, %72 : vector<2x32xf32>
    %74 = vector.extract_strided_slice %36 {offsets = [0, 64], sizes = [2, 32], strides = [1, 1]} : vector<2x128xf32> to vector<2x32xf32>
    %75 = math.tanh %74 : vector<2x32xf32>
    %76 = vector.extract_strided_slice %36 {offsets = [0, 96], sizes = [2, 32], strides = [1, 1]} : vector<2x128xf32> to vector<2x32xf32>
    %77 = arith.negf %76 : vector<2x32xf32>
    %78 = math.exp %77 : vector<2x32xf32>
    %cst_29 = arith.constant 1.000000e+00 : f32
    %79 = vector.broadcast %cst_29 : f32 to vector<2x32xf32>
    %80 = arith.addf %79, %78 : vector<2x32xf32>
    %81 = arith.divf %79, %80 : vector<2x32xf32>
    %82 = arith.mulf %73, %18 : vector<2x32xf32>
    %83 = arith.mulf %67, %75 : vector<2x32xf32>
    %84 = arith.addf %82, %83 : vector<2x32xf32>
    %85 = math.tanh %84 : vector<2x32xf32>
    %86 = arith.mulf %81, %85 : vector<2x32xf32>
    %c0_i32_30 = arith.constant 0 : i32
    %87 = arith.addi %12, %c0_i32_30 : i32
    %88 = vector.broadcast %87 : i32 to vector<2x1xi32>
    %89 = arith.cmpi sgt, %3, %88 : vector<2x1xi32>
    %c3_i32 = arith.constant 3 : i32
    %90 = arith.addi %14, %c3_i32 : i32
    %91 = vector.broadcast %90 : i32 to vector<2x1xi32>
    %92 = arith.cmpi sgt, %3, %91 : vector<2x1xi32>
    %93 = vector.shape_cast %89 : vector<2x1xi1> to vector<2x1xi1>
    %94 = vector.broadcast %93 : vector<2x1xi1> to vector<2x32xi1>
    %95 = arith.select %94, %61, %15 : vector<2x32xi1>, vector<2x32xf32>
    %96 = vector.shape_cast %89 : vector<2x1xi1> to vector<2x1xi1>
    %97 = vector.broadcast %96 : vector<2x1xi1> to vector<2x32xi1>
    %98 = arith.select %97, %59, %16 : vector<2x32xi1>, vector<2x32xf32>
    %cst_31 = arith.constant 0.000000e+00 : f32
    %99 = vector.shape_cast %89 : vector<2x1xi1> to vector<2x1xi1>
    %100 = vector.broadcast %99 : vector<2x1xi1> to vector<2x32xi1>
    %101 = vector.broadcast %cst_31 : f32 to vector<2x32xf32>
    %102 = arith.select %100, %61, %101 : vector<2x32xi1>, vector<2x32xf32>
    %103 = vector.shape_cast %92 : vector<2x1xi1> to vector<2x1xi1>
    %104 = vector.broadcast %103 : vector<2x1xi1> to vector<2x32xi1>
    %105 = arith.select %104, %86, %17 : vector<2x32xi1>, vector<2x32xf32>
    %106 = vector.shape_cast %92 : vector<2x1xi1> to vector<2x1xi1>
    %107 = vector.broadcast %106 : vector<2x1xi1> to vector<2x32xi1>
    %108 = arith.select %107, %84, %18 : vector<2x32xi1>, vector<2x32xf32>
    %cst_32 = arith.constant 0.000000e+00 : f32
    %109 = vector.shape_cast %92 : vector<2x1xi1> to vector<2x1xi1>
    %110 = vector.broadcast %109 : vector<2x1xi1> to vector<2x32xi1>
    %111 = vector.broadcast %cst_32 : f32 to vector<2x32xf32>
    %112 = arith.select %110, %86, %111 : vector<2x32xi1>, vector<2x32xf32>
    %c0_33 = arith.constant 0 : index
    %c0_34 = arith.constant 0 : index
    %c0_35 = arith.constant 0 : index
    %113 = vector.load %arg6[%c0_33, %c0_34, %c0_35] : memref<4x2x32xf32, #tpu.memory_space<vmem>>, vector<1x2x32xf32>
    %114 = vector.shape_cast %113 : vector<1x2x32xf32> to vector<2x32xf32>
    %115 = vector.shape_cast %102 : vector<2x32xf32> to vector<1x2x32xf32>
    tpu.vector_store %arg6[%c0_33, %c0_34, %c0_35], %115 {strides = array<i32>} : memref<4x2x32xf32, #tpu.memory_space<vmem>>, vector<1x2x32xf32>,
    %c3_36 = arith.constant 3 : index
    %c0_37 = arith.constant 0 : index
    %c0_38 = arith.constant 0 : index
    %116 = vector.load %arg7[%c3_36, %c0_37, %c0_38] : memref<4x2x32xf32, #tpu.memory_space<vmem>>, vector<1x2x32xf32>
    %117 = vector.shape_cast %116 : vector<1x2x32xf32> to vector<2x32xf32>
    %118 = vector.shape_cast %112 : vector<2x32xf32> to vector<1x2x32xf32>
    tpu.vector_store %arg7[%c3_36, %c0_37, %c0_38], %118 {strides = array<i32>} : memref<4x2x32xf32, #tpu.memory_space<vmem>>, vector<1x2x32xf32>,
    %119 = arith.addf %19, %102 : vector<2x32xf32>
    %120 = arith.addf %20, %112 : vector<2x32xf32>
    %c1 = arith.constant 1 : index
    %c0_39 = arith.constant 0 : index
    %c0_40 = arith.constant 0 : index
    %121 = vector.load %arg2[%c1, %c0_39, %c0_40] : memref<4x2x128xbf16, #tpu.memory_space<vmem>>, vector<1x2x128xbf16>
    %122 = vector.shape_cast %121 : vector<1x2x128xbf16> to vector<2x128xbf16>
    %123 = arith.extf %122 : vector<2x128xbf16> to vector<2x128xf32>
    %124 = vector.broadcast %10 : vector<1x128xf32> to vector<2x128xf32>
    %125 = arith.addf %123, %124 : vector<2x128xf32>
    %126 = arith.truncf %95 : vector<2x32xf32> to vector<2x32xbf16>
    %cst_41 = arith.constant dense<0.000000e+00> : vector<2x128xf32>
    %127 = tpu.matmul %126, %6, %cst_41 {dimension_numbers = #tpu.dot_dimension_numbers<[1], [0], [0], [1], [0, 0, 1, 1], [], []>} : vector<2x32xbf16>, vector<32x128xbf16>, vector<2x128xf32> -> vector<2x128xf32>
    %128 = arith.addf %125, %127 : vector<2x128xf32>
    %c2 = arith.constant 2 : index
    %c0_42 = arith.constant 0 : index
    %c0_43 = arith.constant 0 : index
    %129 = vector.load %arg3[%c2, %c0_42, %c0_43] : memref<4x2x128xbf16, #tpu.memory_space<vmem>>, vector<1x2x128xbf16>
    %130 = vector.shape_cast %129 : vector<1x2x128xbf16> to vector<2x128xbf16>
    %131 = arith.extf %130 : vector<2x128xbf16> to vector<2x128xf32>
    %132 = vector.broadcast %11 : vector<1x128xf32> to vector<2x128xf32>
    %133 = arith.addf %131, %132 : vector<2x128xf32>
    %134 = arith.truncf %105 : vector<2x32xf32> to vector<2x32xbf16>
    %cst_44 = arith.constant dense<0.000000e+00> : vector<2x128xf32>
    %135 = tpu.matmul %134, %8, %cst_44 {dimension_numbers = #tpu.dot_dimension_numbers<[1], [0], [0], [1], [0, 0, 1, 1], [], []>} : vector<2x32xbf16>, vector<32x128xbf16>, vector<2x128xf32> -> vector<2x128xf32>
    %136 = arith.addf %133, %135 : vector<2x128xf32>
    %137 = vector.extract_strided_slice %128 {offsets = [0, 0], sizes = [2, 32], strides = [1, 1]} : vector<2x128xf32> to vector<2x32xf32>
    %138 = arith.negf %137 : vector<2x32xf32>
    %139 = math.exp %138 : vector<2x32xf32>
    %cst_45 = arith.constant 1.000000e+00 : f32
    %140 = vector.broadcast %cst_45 : f32 to vector<2x32xf32>
    %141 = arith.addf %140, %139 : vector<2x32xf32>
    %142 = arith.divf %140, %141 : vector<2x32xf32>
    %143 = vector.extract_strided_slice %128 {offsets = [0, 32], sizes = [2, 32], strides = [1, 1]} : vector<2x128xf32> to vector<2x32xf32>
    %144 = arith.negf %143 : vector<2x32xf32>
    %145 = math.exp %144 : vector<2x32xf32>
    %cst_46 = arith.constant 1.000000e+00 : f32
    %146 = vector.broadcast %cst_46 : f32 to vector<2x32xf32>
    %147 = arith.addf %146, %145 : vector<2x32xf32>
    %148 = arith.divf %146, %147 : vector<2x32xf32>
    %149 = vector.extract_strided_slice %128 {offsets = [0, 64], sizes = [2, 32], strides = [1, 1]} : vector<2x128xf32> to vector<2x32xf32>
    %150 = math.tanh %149 : vector<2x32xf32>
    %151 = vector.extract_strided_slice %128 {offsets = [0, 96], sizes = [2, 32], strides = [1, 1]} : vector<2x128xf32> to vector<2x32xf32>
    %152 = arith.negf %151 : vector<2x32xf32>
    %153 = math.exp %152 : vector<2x32xf32>
    %cst_47 = arith.constant 1.000000e+00 : f32
    %154 = vector.broadcast %cst_47 : f32 to vector<2x32xf32>
    %155 = arith.addf %154, %153 : vector<2x32xf32>
    %156 = arith.divf %154, %155 : vector<2x32xf32>
    %157 = arith.mulf %148, %98 : vector<2x32xf32>
    %158 = arith.mulf %142, %150 : vector<2x32xf32>
    %159 = arith.addf %157, %158 : vector<2x32xf32>
    %160 = math.tanh %159 : vector<2x32xf32>
    %161 = arith.mulf %156, %160 : vector<2x32xf32>
    %162 = vector.extract_strided_slice %136 {offsets = [0, 0], sizes = [2, 32], strides = [1, 1]} : vector<2x128xf32> to vector<2x32xf32>
    %163 = arith.negf %162 : vector<2x32xf32>
    %164 = math.exp %163 : vector<2x32xf32>
    %cst_48 = arith.constant 1.000000e+00 : f32
    %165 = vector.broadcast %cst_48 : f32 to vector<2x32xf32>
    %166 = arith.addf %165, %164 : vector<2x32xf32>
    %167 = arith.divf %165, %166 : vector<2x32xf32>
    %168 = vector.extract_strided_slice %136 {offsets = [0, 32], sizes = [2, 32], strides = [1, 1]} : vector<2x128xf32> to vector<2x32xf32>
    %169 = arith.negf %168 : vector<2x32xf32>
    %170 = math.exp %169 : vector<2x32xf32>
    %cst_49 = arith.constant 1.000000e+00 : f32
    %171 = vector.broadcast %cst_49 : f32 to vector<2x32xf32>
    %172 = arith.addf %171, %170 : vector<2x32xf32>
    %173 = arith.divf %171, %172 : vector<2x32xf32>
    %174 = vector.extract_strided_slice %136 {offsets = [0, 64], sizes = [2, 32], strides = [1, 1]} : vector<2x128xf32> to vector<2x32xf32>
    %175 = math.tanh %174 : vector<2x32xf32>
    %176 = vector.extract_strided_slice %136 {offsets = [0, 96], sizes = [2, 32], strides = [1, 1]} : vector<2x128xf32> to vector<2x32xf32>
    %177 = arith.negf %176 : vector<2x32xf32>
    %178 = math.exp %177 : vector<2x32xf32>
    %cst_50 = arith.constant 1.000000e+00 : f32
    %179 = vector.broadcast %cst_50 : f32 to vector<2x32xf32>
    %180 = arith.addf %179, %178 : vector<2x32xf32>
    %181 = arith.divf %179, %180 : vector<2x32xf32>
    %182 = arith.mulf %173, %108 : vector<2x32xf32>
    %183 = arith.mulf %167, %175 : vector<2x32xf32>
    %184 = arith.addf %182, %183 : vector<2x32xf32>
    %185 = math.tanh %184 : vector<2x32xf32>
    %186 = arith.mulf %181, %185 : vector<2x32xf32>
    %c1_i32_51 = arith.constant 1 : i32
    %187 = arith.addi %12, %c1_i32_51 : i32
    %188 = vector.broadcast %187 : i32 to vector<2x1xi32>
    %189 = arith.cmpi sgt, %3, %188 : vector<2x1xi32>
    %c2_i32 = arith.constant 2 : i32
    %190 = arith.addi %14, %c2_i32 : i32
    %191 = vector.broadcast %190 : i32 to vector<2x1xi32>
    %192 = arith.cmpi sgt, %3, %191 : vector<2x1xi32>
    %193 = vector.shape_cast %189 : vector<2x1xi1> to vector<2x1xi1>
    %194 = vector.broadcast %193 : vector<2x1xi1> to vector<2x32xi1>
    %195 = arith.select %194, %161, %95 : vector<2x32xi1>, vector<2x32xf32>
    %196 = vector.shape_cast %189 : vector<2x1xi1> to vector<2x1xi1>
    %197 = vector.broadcast %196 : vector<2x1xi1> to vector<2x32xi1>
    %198 = arith.select %197, %159, %98 : vector<2x32xi1>, vector<2x32xf32>
    %cst_52 = arith.constant 0.000000e+00 : f32
    %199 = vector.shape_cast %189 : vector<2x1xi1> to vector<2x1xi1>
    %200 = vector.broadcast %199 : vector<2x1xi1> to vector<2x32xi1>
    %201 = vector.broadcast %cst_52 : f32 to vector<2x32xf32>
    %202 = arith.select %200, %161, %201 : vector<2x32xi1>, vector<2x32xf32>
    %203 = vector.shape_cast %192 : vector<2x1xi1> to vector<2x1xi1>
    %204 = vector.broadcast %203 : vector<2x1xi1> to vector<2x32xi1>
    %205 = arith.select %204, %186, %105 : vector<2x32xi1>, vector<2x32xf32>
    %206 = vector.shape_cast %192 : vector<2x1xi1> to vector<2x1xi1>
    %207 = vector.broadcast %206 : vector<2x1xi1> to vector<2x32xi1>
    %208 = arith.select %207, %184, %108 : vector<2x32xi1>, vector<2x32xf32>
    %cst_53 = arith.constant 0.000000e+00 : f32
    %209 = vector.shape_cast %192 : vector<2x1xi1> to vector<2x1xi1>
    %210 = vector.broadcast %209 : vector<2x1xi1> to vector<2x32xi1>
    %211 = vector.broadcast %cst_53 : f32 to vector<2x32xf32>
    %212 = arith.select %210, %186, %211 : vector<2x32xi1>, vector<2x32xf32>
    %c1_54 = arith.constant 1 : index
    %c0_55 = arith.constant 0 : index
    %c0_56 = arith.constant 0 : index
    %213 = vector.load %arg6[%c1_54, %c0_55, %c0_56] : memref<4x2x32xf32, #tpu.memory_space<vmem>>, vector<1x2x32xf32>
    %214 = vector.shape_cast %213 : vector<1x2x32xf32> to vector<2x32xf32>
    %215 = vector.shape_cast %202 : vector<2x32xf32> to vector<1x2x32xf32>
    tpu.vector_store %arg6[%c1_54, %c0_55, %c0_56], %215 {strides = array<i32>} : memref<4x2x32xf32, #tpu.memory_space<vmem>>, vector<1x2x32xf32>,
    %c2_57 = arith.constant 2 : index
    %c0_58 = arith.constant 0 : index
    %c0_59 = arith.constant 0 : index
    %216 = vector.load %arg7[%c2_57, %c0_58, %c0_59] : memref<4x2x32xf32, #tpu.memory_space<vmem>>, vector<1x2x32xf32>
    %217 = vector.shape_cast %216 : vector<1x2x32xf32> to vector<2x32xf32>
    %218 = vector.shape_cast %212 : vector<2x32xf32> to vector<1x2x32xf32>
    tpu.vector_store %arg7[%c2_57, %c0_58, %c0_59], %218 {strides = array<i32>} : memref<4x2x32xf32, #tpu.memory_space<vmem>>, vector<1x2x32xf32>,
    %219 = arith.addf %119, %202 : vector<2x32xf32>
    %220 = arith.addf %120, %212 : vector<2x32xf32>
    %c2_60 = arith.constant 2 : index
    %c0_61 = arith.constant 0 : index
    %c0_62 = arith.constant 0 : index
    %221 = vector.load %arg2[%c2_60, %c0_61, %c0_62] : memref<4x2x128xbf16, #tpu.memory_space<vmem>>, vector<1x2x128xbf16>
    %222 = vector.shape_cast %221 : vector<1x2x128xbf16> to vector<2x128xbf16>
    %223 = arith.extf %222 : vector<2x128xbf16> to vector<2x128xf32>
    %224 = vector.broadcast %10 : vector<1x128xf32> to vector<2x128xf32>
    %225 = arith.addf %223, %224 : vector<2x128xf32>
    %226 = arith.truncf %195 : vector<2x32xf32> to vector<2x32xbf16>
    %cst_63 = arith.constant dense<0.000000e+00> : vector<2x128xf32>
    %227 = tpu.matmul %226, %6, %cst_63 {dimension_numbers = #tpu.dot_dimension_numbers<[1], [0], [0], [1], [0, 0, 1, 1], [], []>} : vector<2x32xbf16>, vector<32x128xbf16>, vector<2x128xf32> -> vector<2x128xf32>
    %228 = arith.addf %225, %227 : vector<2x128xf32>
    %c1_64 = arith.constant 1 : index
    %c0_65 = arith.constant 0 : index
    %c0_66 = arith.constant 0 : index
    %229 = vector.load %arg3[%c1_64, %c0_65, %c0_66] : memref<4x2x128xbf16, #tpu.memory_space<vmem>>, vector<1x2x128xbf16>
    %230 = vector.shape_cast %229 : vector<1x2x128xbf16> to vector<2x128xbf16>
    %231 = arith.extf %230 : vector<2x128xbf16> to vector<2x128xf32>
    %232 = vector.broadcast %11 : vector<1x128xf32> to vector<2x128xf32>
    %233 = arith.addf %231, %232 : vector<2x128xf32>
    %234 = arith.truncf %205 : vector<2x32xf32> to vector<2x32xbf16>
    %cst_67 = arith.constant dense<0.000000e+00> : vector<2x128xf32>
    %235 = tpu.matmul %234, %8, %cst_67 {dimension_numbers = #tpu.dot_dimension_numbers<[1], [0], [0], [1], [0, 0, 1, 1], [], []>} : vector<2x32xbf16>, vector<32x128xbf16>, vector<2x128xf32> -> vector<2x128xf32>
    %236 = arith.addf %233, %235 : vector<2x128xf32>
    %237 = vector.extract_strided_slice %228 {offsets = [0, 0], sizes = [2, 32], strides = [1, 1]} : vector<2x128xf32> to vector<2x32xf32>
    %238 = arith.negf %237 : vector<2x32xf32>
    %239 = math.exp %238 : vector<2x32xf32>
    %cst_68 = arith.constant 1.000000e+00 : f32
    %240 = vector.broadcast %cst_68 : f32 to vector<2x32xf32>
    %241 = arith.addf %240, %239 : vector<2x32xf32>
    %242 = arith.divf %240, %241 : vector<2x32xf32>
    %243 = vector.extract_strided_slice %228 {offsets = [0, 32], sizes = [2, 32], strides = [1, 1]} : vector<2x128xf32> to vector<2x32xf32>
    %244 = arith.negf %243 : vector<2x32xf32>
    %245 = math.exp %244 : vector<2x32xf32>
    %cst_69 = arith.constant 1.000000e+00 : f32
    %246 = vector.broadcast %cst_69 : f32 to vector<2x32xf32>
    %247 = arith.addf %246, %245 : vector<2x32xf32>
    %248 = arith.divf %246, %247 : vector<2x32xf32>
    %249 = vector.extract_strided_slice %228 {offsets = [0, 64], sizes = [2, 32], strides = [1, 1]} : vector<2x128xf32> to vector<2x32xf32>
    %250 = math.tanh %249 : vector<2x32xf32>
    %251 = vector.extract_strided_slice %228 {offsets = [0, 96], sizes = [2, 32], strides = [1, 1]} : vector<2x128xf32> to vector<2x32xf32>
    %252 = arith.negf %251 : vector<2x32xf32>
    %253 = math.exp %252 : vector<2x32xf32>
    %cst_70 = arith.constant 1.000000e+00 : f32
    %254 = vector.broadcast %cst_70 : f32 to vector<2x32xf32>
    %255 = arith.addf %254, %253 : vector<2x32xf32>
    %256 = arith.divf %254, %255 : vector<2x32xf32>
    %257 = arith.mulf %248, %198 : vector<2x32xf32>
    %258 = arith.mulf %242, %250 : vector<2x32xf32>
    %259 = arith.addf %257, %258 : vector<2x32xf32>
    %260 = math.tanh %259 : vector<2x32xf32>
    %261 = arith.mulf %256, %260 : vector<2x32xf32>
    %262 = vector.extract_strided_slice %236 {offsets = [0, 0], sizes = [2, 32], strides = [1, 1]} : vector<2x128xf32> to vector<2x32xf32>
    %263 = arith.negf %262 : vector<2x32xf32>
    %264 = math.exp %263 : vector<2x32xf32>
    %cst_71 = arith.constant 1.000000e+00 : f32
    %265 = vector.broadcast %cst_71 : f32 to vector<2x32xf32>
    %266 = arith.addf %265, %264 : vector<2x32xf32>
    %267 = arith.divf %265, %266 : vector<2x32xf32>
    %268 = vector.extract_strided_slice %236 {offsets = [0, 32], sizes = [2, 32], strides = [1, 1]} : vector<2x128xf32> to vector<2x32xf32>
    %269 = arith.negf %268 : vector<2x32xf32>
    %270 = math.exp %269 : vector<2x32xf32>
    %cst_72 = arith.constant 1.000000e+00 : f32
    %271 = vector.broadcast %cst_72 : f32 to vector<2x32xf32>
    %272 = arith.addf %271, %270 : vector<2x32xf32>
    %273 = arith.divf %271, %272 : vector<2x32xf32>
    %274 = vector.extract_strided_slice %236 {offsets = [0, 64], sizes = [2, 32], strides = [1, 1]} : vector<2x128xf32> to vector<2x32xf32>
    %275 = math.tanh %274 : vector<2x32xf32>
    %276 = vector.extract_strided_slice %236 {offsets = [0, 96], sizes = [2, 32], strides = [1, 1]} : vector<2x128xf32> to vector<2x32xf32>
    %277 = arith.negf %276 : vector<2x32xf32>
    %278 = math.exp %277 : vector<2x32xf32>
    %cst_73 = arith.constant 1.000000e+00 : f32
    %279 = vector.broadcast %cst_73 : f32 to vector<2x32xf32>
    %280 = arith.addf %279, %278 : vector<2x32xf32>
    %281 = arith.divf %279, %280 : vector<2x32xf32>
    %282 = arith.mulf %273, %208 : vector<2x32xf32>
    %283 = arith.mulf %267, %275 : vector<2x32xf32>
    %284 = arith.addf %282, %283 : vector<2x32xf32>
    %285 = math.tanh %284 : vector<2x32xf32>
    %286 = arith.mulf %281, %285 : vector<2x32xf32>
    %c2_i32_74 = arith.constant 2 : i32
    %287 = arith.addi %12, %c2_i32_74 : i32
    %288 = vector.broadcast %287 : i32 to vector<2x1xi32>
    %289 = arith.cmpi sgt, %3, %288 : vector<2x1xi32>
    %c1_i32_75 = arith.constant 1 : i32
    %290 = arith.addi %14, %c1_i32_75 : i32
    %291 = vector.broadcast %290 : i32 to vector<2x1xi32>
    %292 = arith.cmpi sgt, %3, %291 : vector<2x1xi32>
    %293 = vector.shape_cast %289 : vector<2x1xi1> to vector<2x1xi1>
    %294 = vector.broadcast %293 : vector<2x1xi1> to vector<2x32xi1>
    %295 = arith.select %294, %261, %195 : vector<2x32xi1>, vector<2x32xf32>
    %296 = vector.shape_cast %289 : vector<2x1xi1> to vector<2x1xi1>
    %297 = vector.broadcast %296 : vector<2x1xi1> to vector<2x32xi1>
    %298 = arith.select %297, %259, %198 : vector<2x32xi1>, vector<2x32xf32>
    %cst_76 = arith.constant 0.000000e+00 : f32
    %299 = vector.shape_cast %289 : vector<2x1xi1> to vector<2x1xi1>
    %300 = vector.broadcast %299 : vector<2x1xi1> to vector<2x32xi1>
    %301 = vector.broadcast %cst_76 : f32 to vector<2x32xf32>
    %302 = arith.select %300, %261, %301 : vector<2x32xi1>, vector<2x32xf32>
    %303 = vector.shape_cast %292 : vector<2x1xi1> to vector<2x1xi1>
    %304 = vector.broadcast %303 : vector<2x1xi1> to vector<2x32xi1>
    %305 = arith.select %304, %286, %205 : vector<2x32xi1>, vector<2x32xf32>
    %306 = vector.shape_cast %292 : vector<2x1xi1> to vector<2x1xi1>
    %307 = vector.broadcast %306 : vector<2x1xi1> to vector<2x32xi1>
    %308 = arith.select %307, %284, %208 : vector<2x32xi1>, vector<2x32xf32>
    %cst_77 = arith.constant 0.000000e+00 : f32
    %309 = vector.shape_cast %292 : vector<2x1xi1> to vector<2x1xi1>
    %310 = vector.broadcast %309 : vector<2x1xi1> to vector<2x32xi1>
    %311 = vector.broadcast %cst_77 : f32 to vector<2x32xf32>
    %312 = arith.select %310, %286, %311 : vector<2x32xi1>, vector<2x32xf32>
    %c2_78 = arith.constant 2 : index
    %c0_79 = arith.constant 0 : index
    %c0_80 = arith.constant 0 : index
    %313 = vector.load %arg6[%c2_78, %c0_79, %c0_80] : memref<4x2x32xf32, #tpu.memory_space<vmem>>, vector<1x2x32xf32>
    %314 = vector.shape_cast %313 : vector<1x2x32xf32> to vector<2x32xf32>
    %315 = vector.shape_cast %302 : vector<2x32xf32> to vector<1x2x32xf32>
    tpu.vector_store %arg6[%c2_78, %c0_79, %c0_80], %315 {strides = array<i32>} : memref<4x2x32xf32, #tpu.memory_space<vmem>>, vector<1x2x32xf32>,
    %c1_81 = arith.constant 1 : index
    %c0_82 = arith.constant 0 : index
    %c0_83 = arith.constant 0 : index
    %316 = vector.load %arg7[%c1_81, %c0_82, %c0_83] : memref<4x2x32xf32, #tpu.memory_space<vmem>>, vector<1x2x32xf32>
    %317 = vector.shape_cast %316 : vector<1x2x32xf32> to vector<2x32xf32>
    %318 = vector.shape_cast %312 : vector<2x32xf32> to vector<1x2x32xf32>
    tpu.vector_store %arg7[%c1_81, %c0_82, %c0_83], %318 {strides = array<i32>} : memref<4x2x32xf32, #tpu.memory_space<vmem>>, vector<1x2x32xf32>,
    %319 = arith.addf %219, %302 : vector<2x32xf32>
    %320 = arith.addf %220, %312 : vector<2x32xf32>
    %c3_84 = arith.constant 3 : index
    %c0_85 = arith.constant 0 : index
    %c0_86 = arith.constant 0 : index
    %321 = vector.load %arg2[%c3_84, %c0_85, %c0_86] : memref<4x2x128xbf16, #tpu.memory_space<vmem>>, vector<1x2x128xbf16>
    %322 = vector.shape_cast %321 : vector<1x2x128xbf16> to vector<2x128xbf16>
    %323 = arith.extf %322 : vector<2x128xbf16> to vector<2x128xf32>
    %324 = vector.broadcast %10 : vector<1x128xf32> to vector<2x128xf32>
    %325 = arith.addf %323, %324 : vector<2x128xf32>
    %326 = arith.truncf %295 : vector<2x32xf32> to vector<2x32xbf16>
    %cst_87 = arith.constant dense<0.000000e+00> : vector<2x128xf32>
    %327 = tpu.matmul %326, %6, %cst_87 {dimension_numbers = #tpu.dot_dimension_numbers<[1], [0], [0], [1], [0, 0, 1, 1], [], []>} : vector<2x32xbf16>, vector<32x128xbf16>, vector<2x128xf32> -> vector<2x128xf32>
    %328 = arith.addf %325, %327 : vector<2x128xf32>
    %c0_88 = arith.constant 0 : index
    %c0_89 = arith.constant 0 : index
    %c0_90 = arith.constant 0 : index
    %329 = vector.load %arg3[%c0_88, %c0_89, %c0_90] : memref<4x2x128xbf16, #tpu.memory_space<vmem>>, vector<1x2x128xbf16>
    %330 = vector.shape_cast %329 : vector<1x2x128xbf16> to vector<2x128xbf16>
    %331 = arith.extf %330 : vector<2x128xbf16> to vector<2x128xf32>
    %332 = vector.broadcast %11 : vector<1x128xf32> to vector<2x128xf32>
    %333 = arith.addf %331, %332 : vector<2x128xf32>
    %334 = arith.truncf %305 : vector<2x32xf32> to vector<2x32xbf16>
    %cst_91 = arith.constant dense<0.000000e+00> : vector<2x128xf32>
    %335 = tpu.matmul %334, %8, %cst_91 {dimension_numbers = #tpu.dot_dimension_numbers<[1], [0], [0], [1], [0, 0, 1, 1], [], []>} : vector<2x32xbf16>, vector<32x128xbf16>, vector<2x128xf32> -> vector<2x128xf32>
    %336 = arith.addf %333, %335 : vector<2x128xf32>
    %337 = vector.extract_strided_slice %328 {offsets = [0, 0], sizes = [2, 32], strides = [1, 1]} : vector<2x128xf32> to vector<2x32xf32>
    %338 = arith.negf %337 : vector<2x32xf32>
    %339 = math.exp %338 : vector<2x32xf32>
    %cst_92 = arith.constant 1.000000e+00 : f32
    %340 = vector.broadcast %cst_92 : f32 to vector<2x32xf32>
    %341 = arith.addf %340, %339 : vector<2x32xf32>
    %342 = arith.divf %340, %341 : vector<2x32xf32>
    %343 = vector.extract_strided_slice %328 {offsets = [0, 32], sizes = [2, 32], strides = [1, 1]} : vector<2x128xf32> to vector<2x32xf32>
    %344 = arith.negf %343 : vector<2x32xf32>
    %345 = math.exp %344 : vector<2x32xf32>
    %cst_93 = arith.constant 1.000000e+00 : f32
    %346 = vector.broadcast %cst_93 : f32 to vector<2x32xf32>
    %347 = arith.addf %346, %345 : vector<2x32xf32>
    %348 = arith.divf %346, %347 : vector<2x32xf32>
    %349 = vector.extract_strided_slice %328 {offsets = [0, 64], sizes = [2, 32], strides = [1, 1]} : vector<2x128xf32> to vector<2x32xf32>
    %350 = math.tanh %349 : vector<2x32xf32>
    %351 = vector.extract_strided_slice %328 {offsets = [0, 96], sizes = [2, 32], strides = [1, 1]} : vector<2x128xf32> to vector<2x32xf32>
    %352 = arith.negf %351 : vector<2x32xf32>
    %353 = math.exp %352 : vector<2x32xf32>
    %cst_94 = arith.constant 1.000000e+00 : f32
    %354 = vector.broadcast %cst_94 : f32 to vector<2x32xf32>
    %355 = arith.addf %354, %353 : vector<2x32xf32>
    %356 = arith.divf %354, %355 : vector<2x32xf32>
    %357 = arith.mulf %348, %298 : vector<2x32xf32>
    %358 = arith.mulf %342, %350 : vector<2x32xf32>
    %359 = arith.addf %357, %358 : vector<2x32xf32>
    %360 = math.tanh %359 : vector<2x32xf32>
    %361 = arith.mulf %356, %360 : vector<2x32xf32>
    %362 = vector.extract_strided_slice %336 {offsets = [0, 0], sizes = [2, 32], strides = [1, 1]} : vector<2x128xf32> to vector<2x32xf32>
    %363 = arith.negf %362 : vector<2x32xf32>
    %364 = math.exp %363 : vector<2x32xf32>
    %cst_95 = arith.constant 1.000000e+00 : f32
    %365 = vector.broadcast %cst_95 : f32 to vector<2x32xf32>
    %366 = arith.addf %365, %364 : vector<2x32xf32>
    %367 = arith.divf %365, %366 : vector<2x32xf32>
    %368 = vector.extract_strided_slice %336 {offsets = [0, 32], sizes = [2, 32], strides = [1, 1]} : vector<2x128xf32> to vector<2x32xf32>
    %369 = arith.negf %368 : vector<2x32xf32>
    %370 = math.exp %369 : vector<2x32xf32>
    %cst_96 = arith.constant 1.000000e+00 : f32
    %371 = vector.broadcast %cst_96 : f32 to vector<2x32xf32>
    %372 = arith.addf %371, %370 : vector<2x32xf32>
    %373 = arith.divf %371, %372 : vector<2x32xf32>
    %374 = vector.extract_strided_slice %336 {offsets = [0, 64], sizes = [2, 32], strides = [1, 1]} : vector<2x128xf32> to vector<2x32xf32>
    %375 = math.tanh %374 : vector<2x32xf32>
    %376 = vector.extract_strided_slice %336 {offsets = [0, 96], sizes = [2, 32], strides = [1, 1]} : vector<2x128xf32> to vector<2x32xf32>
    %377 = arith.negf %376 : vector<2x32xf32>
    %378 = math.exp %377 : vector<2x32xf32>
    %cst_97 = arith.constant 1.000000e+00 : f32
    %379 = vector.broadcast %cst_97 : f32 to vector<2x32xf32>
    %380 = arith.addf %379, %378 : vector<2x32xf32>
    %381 = arith.divf %379, %380 : vector<2x32xf32>
    %382 = arith.mulf %373, %308 : vector<2x32xf32>
    %383 = arith.mulf %367, %375 : vector<2x32xf32>
    %384 = arith.addf %382, %383 : vector<2x32xf32>
    %385 = math.tanh %384 : vector<2x32xf32>
    %386 = arith.mulf %381, %385 : vector<2x32xf32>
    %c3_i32_98 = arith.constant 3 : i32
    %387 = arith.addi %12, %c3_i32_98 : i32
    %388 = vector.broadcast %387 : i32 to vector<2x1xi32>
    %389 = arith.cmpi sgt, %3, %388 : vector<2x1xi32>
    %c0_i32_99 = arith.constant 0 : i32
    %390 = arith.addi %14, %c0_i32_99 : i32
    %391 = vector.broadcast %390 : i32 to vector<2x1xi32>
    %392 = arith.cmpi sgt, %3, %391 : vector<2x1xi32>
    %393 = vector.shape_cast %389 : vector<2x1xi1> to vector<2x1xi1>
    %394 = vector.broadcast %393 : vector<2x1xi1> to vector<2x32xi1>
    %395 = arith.select %394, %361, %295 : vector<2x32xi1>, vector<2x32xf32>
    %396 = vector.shape_cast %389 : vector<2x1xi1> to vector<2x1xi1>
    %397 = vector.broadcast %396 : vector<2x1xi1> to vector<2x32xi1>
    %398 = arith.select %397, %359, %298 : vector<2x32xi1>, vector<2x32xf32>
    %cst_100 = arith.constant 0.000000e+00 : f32
    %399 = vector.shape_cast %389 : vector<2x1xi1> to vector<2x1xi1>
    %400 = vector.broadcast %399 : vector<2x1xi1> to vector<2x32xi1>
    %401 = vector.broadcast %cst_100 : f32 to vector<2x32xf32>
    %402 = arith.select %400, %361, %401 : vector<2x32xi1>, vector<2x32xf32>
    %403 = vector.shape_cast %392 : vector<2x1xi1> to vector<2x1xi1>
    %404 = vector.broadcast %403 : vector<2x1xi1> to vector<2x32xi1>
    %405 = arith.select %404, %386, %305 : vector<2x32xi1>, vector<2x32xf32>
    %406 = vector.shape_cast %392 : vector<2x1xi1> to vector<2x1xi1>
    %407 = vector.broadcast %406 : vector<2x1xi1> to vector<2x32xi1>
    %408 = arith.select %407, %384, %308 : vector<2x32xi1>, vector<2x32xf32>
    %cst_101 = arith.constant 0.000000e+00 : f32
    %409 = vector.shape_cast %392 : vector<2x1xi1> to vector<2x1xi1>
    %410 = vector.broadcast %409 : vector<2x1xi1> to vector<2x32xi1>
    %411 = vector.broadcast %cst_101 : f32 to vector<2x32xf32>
    %412 = arith.select %410, %386, %411 : vector<2x32xi1>, vector<2x32xf32>
    %c3_102 = arith.constant 3 : index
    %c0_103 = arith.constant 0 : index
    %c0_104 = arith.constant 0 : index
    %413 = vector.load %arg6[%c3_102, %c0_103, %c0_104] : memref<4x2x32xf32, #tpu.memory_space<vmem>>, vector<1x2x32xf32>
    %414 = vector.shape_cast %413 : vector<1x2x32xf32> to vector<2x32xf32>
    %415 = vector.shape_cast %402 : vector<2x32xf32> to vector<1x2x32xf32>
    tpu.vector_store %arg6[%c3_102, %c0_103, %c0_104], %415 {strides = array<i32>} : memref<4x2x32xf32, #tpu.memory_space<vmem>>, vector<1x2x32xf32>,
    %c0_105 = arith.constant 0 : index
    %c0_106 = arith.constant 0 : index
    %c0_107 = arith.constant 0 : index
    %416 = vector.load %arg7[%c0_105, %c0_106, %c0_107] : memref<4x2x32xf32, #tpu.memory_space<vmem>>, vector<1x2x32xf32>
    %417 = vector.shape_cast %416 : vector<1x2x32xf32> to vector<2x32xf32>
    %418 = vector.shape_cast %412 : vector<2x32xf32> to vector<1x2x32xf32>
    tpu.vector_store %arg7[%c0_105, %c0_106, %c0_107], %418 {strides = array<i32>} : memref<4x2x32xf32, #tpu.memory_space<vmem>>, vector<1x2x32xf32>,
    %419 = arith.addf %319, %402 : vector<2x32xf32>
    %420 = arith.addf %320, %412 : vector<2x32xf32>
    %c0_108 = arith.constant 0 : index
    %c0_109 = arith.constant 0 : index
    %421 = vector.load %arg10[%c0_108, %c0_109] : memref<2x32xf32, #tpu.memory_space<vmem>>, vector<2x32xf32>
    tpu.vector_store %arg10[%c0_108, %c0_109], %395 {strides = array<i32>} : memref<2x32xf32, #tpu.memory_space<vmem>>, vector<2x32xf32>,
    %c0_110 = arith.constant 0 : index
    %c0_111 = arith.constant 0 : index
    %422 = vector.load %arg11[%c0_110, %c0_111] : memref<2x32xf32, #tpu.memory_space<vmem>>, vector<2x32xf32>
    tpu.vector_store %arg11[%c0_110, %c0_111], %398 {strides = array<i32>} : memref<2x32xf32, #tpu.memory_space<vmem>>, vector<2x32xf32>,
    %c0_112 = arith.constant 0 : index
    %c0_113 = arith.constant 0 : index
    %423 = vector.load %arg12[%c0_112, %c0_113] : memref<2x32xf32, #tpu.memory_space<vmem>>, vector<2x32xf32>
    tpu.vector_store %arg12[%c0_112, %c0_113], %405 {strides = array<i32>} : memref<2x32xf32, #tpu.memory_space<vmem>>, vector<2x32xf32>,
    %c0_114 = arith.constant 0 : index
    %c0_115 = arith.constant 0 : index
    %424 = vector.load %arg13[%c0_114, %c0_115] : memref<2x32xf32, #tpu.memory_space<vmem>>, vector<2x32xf32>
    tpu.vector_store %arg13[%c0_114, %c0_115], %408 {strides = array<i32>} : memref<2x32xf32, #tpu.memory_space<vmem>>, vector<2x32xf32>,
    %c0_116 = arith.constant 0 : index
    %c0_117 = arith.constant 0 : index
    %425 = vector.load %arg8[%c0_116, %c0_117] : memref<2x32xf32, #tpu.memory_space<vmem>>, vector<2x32xf32>
    %426 = arith.addf %425, %419 : vector<2x32xf32>
    %c0_118 = arith.constant 0 : index
    %c0_119 = arith.constant 0 : index
    %427 = vector.load %arg8[%c0_118, %c0_119] : memref<2x32xf32, #tpu.memory_space<vmem>>, vector<2x32xf32>
    tpu.vector_store %arg8[%c0_118, %c0_119], %426 {strides = array<i32>} : memref<2x32xf32, #tpu.memory_space<vmem>>, vector<2x32xf32>,
    %c0_120 = arith.constant 0 : index
    %c0_121 = arith.constant 0 : index
    %428 = vector.load %arg9[%c0_120, %c0_121] : memref<2x32xf32, #tpu.memory_space<vmem>>, vector<2x32xf32>
    %429 = arith.addf %428, %420 : vector<2x32xf32>
    %c0_122 = arith.constant 0 : index
    %c0_123 = arith.constant 0 : index
    %430 = vector.load %arg9[%c0_122, %c0_123] : memref<2x32xf32, #tpu.memory_space<vmem>>, vector<2x32xf32>
    tpu.vector_store %arg9[%c0_122, %c0_123], %429 {strides = array<i32>} : memref<2x32xf32, #tpu.memory_space<vmem>>, vector<2x32xf32>,
    %c1_i32_124 = arith.constant 1 : i32
    %431 = arith.cmpi eq, %arg0, %c1_i32_124 : i32
    %432 = arith.extui %431 : i1 to i32
    %c0_i32_125 = arith.constant 0 : i32
    %433 = arith.cmpi ne, %432, %c0_i32_125 : i32
    scf.if %433 {
      %434 = arith.sitofp %3 : vector<2x1xi32> to vector<2x1xf32>
      %cst_126 = arith.constant 1.000000e+00 : f32
      %435 = vector.broadcast %cst_126 : f32 to vector<2x1xf32>
      %436 = arith.maximumf %434, %435 : vector<2x1xf32>
      %cst_127 = arith.constant 1.000000e+00 : f32
      %437 = vector.broadcast %cst_127 : f32 to vector<2x1xf32>
      %438 = arith.divf %437, %436 : vector<2x1xf32>
      %c0_128 = arith.constant 0 : index
      %c0_129 = arith.constant 0 : index
      %439 = vector.load %arg8[%c0_128, %c0_129] : memref<2x32xf32, #tpu.memory_space<vmem>>, vector<2x32xf32>
      %440 = vector.broadcast %438 : vector<2x1xf32> to vector<2x32xf32>
      %441 = arith.mulf %439, %440 : vector<2x32xf32>
      %c0_130 = arith.constant 0 : index
      %c0_131 = arith.constant 0 : index
      %442 = vector.load %arg8[%c0_130, %c0_131] : memref<2x32xf32, #tpu.memory_space<vmem>>, vector<2x32xf32>
      tpu.vector_store %arg8[%c0_130, %c0_131], %441 {strides = array<i32>} : memref<2x32xf32, #tpu.memory_space<vmem>>, vector<2x32xf32>,
      %c0_132 = arith.constant 0 : index
      %c0_133 = arith.constant 0 : index
      %443 = vector.load %arg9[%c0_132, %c0_133] : memref<2x32xf32, #tpu.memory_space<vmem>>, vector<2x32xf32>
      %444 = vector.broadcast %438 : vector<2x1xf32> to vector<2x32xf32>
      %445 = arith.mulf %443, %444 : vector<2x32xf32>
      %c0_134 = arith.constant 0 : index
      %c0_135 = arith.constant 0 : index
      %446 = vector.load %arg9[%c0_134, %c0_135] : memref<2x32xf32, #tpu.memory_space<vmem>>, vector<2x32xf32>
      tpu.vector_store %arg9[%c0_134, %c0_135], %445 {strides = array<i32>} : memref<2x32xf32, #tpu.memory_space<vmem>>, vector<2x32xf32>,
    } else {
    }
    return
  }
  func.func @transform_0(%arg0: i32) -> (i32, i32) {
    %c0_i32 = arith.constant 0 : i32
    %c0_i32_0 = arith.constant 0 : i32
    %c0_i32_1 = arith.constant 0 : i32
    return %c0_i32, %c0_i32_0 : i32, i32
  }
  func.func @transform_1(%arg0: i32) -> (i32, i32, i32) {
    %c0_i32 = arith.constant 0 : i32
    %c0_i32_0 = arith.constant 0 : i32
    %c0_i32_1 = arith.constant 0 : i32
    return %arg0, %c0_i32, %c0_i32_0 : i32, i32, i32
  }
  func.func @transform_2(%arg0: i32) -> (i32, i32, i32) {
    %c1_i32 = arith.constant 1 : i32
    %0 = arith.subi %c1_i32, %arg0 : i32
    %c0_i32 = arith.constant 0 : i32
    %c0_i32_0 = arith.constant 0 : i32
    %c0_i32_1 = arith.constant 0 : i32
    return %0, %c0_i32, %c0_i32_0 : i32, i32, i32
  }
  func.func @transform_3(%arg0: i32) -> (i32, i32, i32) {
    %c0_i32 = arith.constant 0 : i32
    %c0_i32_0 = arith.constant 0 : i32
    %c0_i32_1 = arith.constant 0 : i32
    %c0_i32_2 = arith.constant 0 : i32
    return %c0_i32, %c0_i32_0, %c0_i32_1 : i32, i32, i32
  }
  func.func @transform_4(%arg0: i32) -> (i32, i32) {
    %c0_i32 = arith.constant 0 : i32
    %c0_i32_0 = arith.constant 0 : i32
    %c0_i32_1 = arith.constant 0 : i32
    return %c0_i32, %c0_i32_0 : i32, i32
  }
  func.func @transform_5(%arg0: i32) -> (i32, i32, i32) {
    %c0_i32 = arith.constant 0 : i32
    %c0_i32_0 = arith.constant 0 : i32
    %c0_i32_1 = arith.constant 0 : i32
    return %arg0, %c0_i32, %c0_i32_0 : i32, i32, i32
  }
  func.func @transform_6(%arg0: i32) -> (i32, i32, i32) {
    %c1_i32 = arith.constant 1 : i32
    %0 = arith.subi %c1_i32, %arg0 : i32
    %c0_i32 = arith.constant 0 : i32
    %c0_i32_0 = arith.constant 0 : i32
    %c0_i32_1 = arith.constant 0 : i32
    return %0, %c0_i32, %c0_i32_0 : i32, i32, i32
  }
  func.func @transform_7(%arg0: i32) -> (i32, i32) {
    %c0_i32 = arith.constant 0 : i32
    %c0_i32_0 = arith.constant 0 : i32
    %c0_i32_1 = arith.constant 0 : i32
    return %c0_i32, %c0_i32_0 : i32, i32
  }
  func.func @transform_8(%arg0: i32) -> (i32, i32) {
    %c0_i32 = arith.constant 0 : i32
    %c0_i32_0 = arith.constant 0 : i32
    %c0_i32_1 = arith.constant 0 : i32
    return %c0_i32, %c0_i32_0 : i32, i32
  }
}

</mosaic_0001>

<bundles_post_ra>
// kernel: bilstm_layer_forward.2
= control target key start
LH: loop header
LB: loop body
LE: loop exit
PB: predicated region body
PF: predicated region fallthrough
CT: control target
= control target key end

     0   :  { %14 = vsyncpa [#allocation7], 0  ;;  %s2312_s0 = inlined_call_operand.vmem [shape: s32[2,1], index: 0, kind: input, shape index: {}]   ;;  %s2313_s1 = inlined_call_operand.vmem [shape: bf16[8,2,128], index: 1, kind: input, shape index: {}]   ;;  %s2314_s2 = inlined_call_operand.vmem [shape: bf16[8,2,128], index: 2, kind: input, shape index: {}]   ;;  %s2315_s3 = inlined_call_operand.vmem [shape: bf16[2,32,128], index: 3, kind: input, shape index: {}]   ;;  %s2316_s4 = inlined_call_operand.vmem [shape: f32[2,128], index: 4, kind: input, shape index: {}]   ;;  %s2317_s5 = inlined_call_operand.vmem [shape: f32[8,2,32], index: 5, kind: output, shape index: {0}]   ;;  %s2318_s6 = inlined_call_operand.vmem [shape: f32[8,2,32], index: 6, kind: output, shape index: {1}]   ;;  %s2319_s7 = inlined_call_operand.hbm [shape: f32[2,32], index: 7, kind: output, shape index: {2}]   ;;  %s2320_s8 = inlined_call_operand.hbm [shape: f32[2,32], index: 8, kind: output, shape index: {3}]  }
   0x1   :  { %15 = vsyncpa [#allocation9], 0  ;;  %s1903_s27 = smov 0  }
   0x2 LB: > { %s1909_s28 = sadd.s32 4294967295, %s1845_s27   ;;  %p1542_p0 = scmp.ge.s32.totalorder %s1845_s27, 1  ;;  %s1845_s27 = sphi %s1903_s27, %s21_s27  }
   0x3   : > { %p277_p1 = scmp.lt.s32.totalorder %s1845_s27, 3 }
   0x5   : > { %p278_p2 = pnand %p1542_p0, %p277_p1 }
   0x6   : > { %s1914_s29 = sshll.u32 (!%p278_p2), %s1909_s28, 2  ;;  %s326_s30 = ssub.s32 (!%p278_p2), 1, %s1909_s28 }
   0x7   : > { %281 = sbr.rel (%p278_p2) target bundleno = 2990 (0xbae), region = 40  ;;  %p322_p3 = scmp.lt.s32.totalorder (!%p278_p2), %s1914_s29, 7 }
   0x8   : > { %s1918_s9 = sshll.u32 (!%p278_p2), %s326_s30, 2  ;;  %p1549_p5 = scmp.ne.s32.totalorder (!%p278_p2), %s1909_s28, 0 }
   0x9   : > { %p328_p4 = scmp.lt.s32.totalorder (!%p278_p2), %s1918_s9, 7 }
   0xc   : > { %s323_s10 = scalar_select %p322_p3, %s1914_s29, 7 }
   0xd   : > { %s329_s11 = scalar_select %p328_p4, %s1918_s9, 7 }
   0xe   : > { %s1926_s14 = scalar_lea.vmem %s2313_s1, %s323_s10  ;;  %s1546_s15 = sshll.u32 %s323_s10, 1 }
   0xf   : > { %s1931_s18 = scalar_lea.vmem %s2314_s2, %s329_s11  ;;  %s1936_s21 = scalar_lea.vmem %s2317_s5, %s1546_s15 }
  0x10   : > { %s1548_s22 = sshll.u32 %s329_s11, 1  ;;  %351 = sbr.rel (%p1549_p5) target bundleno = 25 (0x19), region = 44 }
  0x11   : > { %s1941_s25 = scalar_lea.vmem %s2318_s6, %s1548_s22 }
  0x15   : > { %vm352_vm0 = vcmask 254976   ;;  %v1847_v0 = vmov 0.0  }
  0x16   : > { %353 = vst.msk [vmem:[#allocation2] sm:$0x3] %vm352_vm0, %v1847_v0  ;;  %354 = vst.msk [vmem:[#allocation3] sm:$0x3] %vm352_vm0, %v1847_v0 }
  0x17   : > { %355 = vst.msk [vmem:[#allocation4] sm:$0x3] %vm352_vm0, %v1847_v0  ;;  %356 = vst.msk [vmem:[#allocation5] sm:$0x3] %vm352_vm0, %v1847_v0 }
  0x18   : > { %357 = vst.msk [vmem:[#allocation6] sm:$0x3] %vm352_vm0, %v1847_v0  ;;  %358 = vst.msk [vmem:[#allocation8] sm:$0x3] %vm352_vm0, %v1847_v0 }
  0x19 PF: > { %v1947_v1 = vld [vmem:[%s2315_s3 + $0x8] sm:$0xff]   ;;  %v1848_v2 = vmov 0.0   ;;  %v1954_v3 = vld [vmem:[%s2315_s3 + $0x18] sm:$0xff]   ;;  %v1960_v4 = vld [vmem:[%s2315_s3] sm:$0xff]   ;;  %vm1849_vm1 = vmmov 0   ;;  %v378_v5 = vlaneseq  ;;  %vm396_vm2 = vcmask 261120  }
  0x1a   : > { %1615 = vmatprep.subr.bf16.mxu0 %v1848_v2  ;;  %1623 = vmatprep.subr.bf16.mxu1 %v1848_v2  ;;  %v1969_v6 = vld [vmem:[%s2315_s3 + $0x10] sm:$0xff]   ;;  %v1850_v12 = vmov 1983009808   ;;  %s1851_s17 = smov 32   ;;  %v368_v21 = vld [vmem:[%s2316_s4] sm:$0x3]  ;;  %v576_v0 = vstv %s1914_s29 }
  0x1b   : > { %1616 = vmatpush3.bf16.msra.mxu0 %v1947_v1  ;;  %1619 = vmatprep.mubr.msk.bf16.mxu0 %vm1849_vm1, %v1848_v2  ;;  %v379_v11 = vshrl.u32 %v378_v5, 7  ;;  %v515_v13 = vunpack.c.l.s4 %v1850_v12  ;;  %v376_v22 = vld [vmem:[%s1926_s14] sm:$0x1]  ;;  %v1555_v24 = vld [vmem:[%s1931_s18 + $0x3] sm:$0x1]  ;;  %s1852_s22 = smov 64  }
  0x1c   : > { %1624 = vmatpush3.bf16.msra.mxu1 %v1954_v3  ;;  %1617 = vmatprep.subr.bf16.mxu0 %v1848_v2  ;;  %v377_v25 = vunpack.c.l.bf16 %v376_v22  ;;  %v443_v27 = vunpack.c.l.bf16 %v1555_v24  ;;  %v1853_v55 = vmov 0   ;;  %s578_s23 = sadd.s32 3, %s1918_s9  ;;  %v2034_v5 = vld [vmem:[%s2312_s0] sm:$0x3]  ;;  %s1854_s30 = smov 96   ;;  %vm641_vm6 = vcmask 254976  }
  0x1d   : > { %1625 = vmatprep.subr.bf16.mxu1 %v1848_v2  ;;  %1627 = vmatprep.mubr.msk.bf16.mxu1 %vm1849_vm1, %v1848_v2  ;;  %v1974_v7 = vld [vmem:[#allocation2] sm:$0x3]  ;;  %v516_v14 = vunpack.c.0.s8 %v515_v13  ;;  %v1987_v15 = vld [vmem:[#allocation3] sm:$0x3]  ;;  %v380_v20 = vsub.s32 0, %v379_v11  ;;  %v446_v23 = vsub.s32 1, %v379_v11  ;;  %vm577_vm3 = vcmp.gt.s32.totalorder %v2034_v5, %v576_v0 }
  0x1e   : > { %v1976_v8 = vld [vmem:[#allocation4] sm:$0x3]  ;;  %v383_v9 = vpack.c.bf16 %v1974_v7, %v1974_v7  ;;  %v1993_v17 = vld [vmem:[#allocation5] sm:$0x3]  ;;  %1711 = vset.pattern.permute.xlu1 %v1853_v55  ;;  %1710 = vset.pattern.permute.xlu0 %v1853_v55  ;;  %s815_s10 = sadd.s32 1, %s1914_s29  ;;  %s818_s11 = sadd.s32 2, %s1918_s9 }
  0x1f   : > { %1618 = vmatpush3.bf16.msra.mxu0 %v1960_v4  ;;  %v449_v10 = vpack.c.bf16 %v1976_v8, %v1976_v8  ;;  %v1990_v16 = vsub.s32 %v516_v14, %v379_v11  ;;  %v2017_v26 = vrot.slane %v368_v21, %v380_v20  ;;  %v2019_v28 = vrot.slane %v368_v21, %v446_v23  ;;  %s1055_s12 = sadd.s32 2, %s1914_s29  ;;  %s1058_s13 = sadd.s32 1, %s1918_s9 }
  0x20   : > { %1626 = vmatpush3.bf16.msra.mxu1 %v1969_v6  ;;  %1631 = vmatprep.subr.bf16.mxu0 %v1848_v2  ;;  %v581_v11 = vsel %vm577_vm3, 1, %v1853_v55  ;;  %p1584_p6 = scmp.ne.s32.totalorder %s1909_s28, 1 }
  0x21   : > { %1639 = vmatprep.subr.bf16.mxu1 %v1848_v2  ;;  %v520_v18 = vrot.slane %v1987_v15, %v1990_v16  ;;  %v555_v19 = vrot.slane %v1993_v17, %v1990_v16  ;;  %v382_v29 = vadd.f32 %v2017_v26, %v377_v25  ;;  %v448_v30 = vadd.f32 %v2019_v28, %v443_v27 }
  0x22   : > { %1620 = vmatmul.mubr.msk.bf16.vlgmr.msra.gmra.mxu0 %vm396_vm2, %v383_v9 }
  0x23   : > { %1628 = vmatmul.mubr.msk.bf16.vlgmr.msra.gmra.mxu1 %vm396_vm2, %v449_v10  ;;  %1632 = vmatpush3.bf16.msra.mxu0 %v1947_v1  ;;  %v579_v10 = vstv %s578_s23 }
  0x24   : > { %1633 = vmatprep.subr.bf16.mxu0 %v1848_v2  ;;  %1640 = vmatpush3.bf16.msra.mxu1 %v1954_v3  ;;  %vm580_vm4 = vcmp.gt.s32.totalorder %v2034_v5, %v579_v10 }
  0x25   : > { %1635 = vmatprep.mubr.msk.bf16.mxu0 %vm1849_vm1, %v1848_v2  ;;  %1641 = vmatprep.subr.bf16.mxu1 %v1848_v2  ;;  %v611_v13 = vsel %vm580_vm4, 1, %v1853_v55 }
  0x26   : > { %1643 = vmatprep.mubr.msk.bf16.mxu1 %vm1849_vm1, %v1848_v2  ;;  %521 = vrot.lane.b32.xlu1 %v520_v18, %s1851_s17 }
  0x27   : > { %1634 = vmatpush3.bf16.msra.mxu0 %v1960_v4 }
  0x28   : > { %1642 = vmatpush3.bf16.msra.mxu1 %v1969_v6  ;;  %1647 = vmatprep.subr.bf16.mxu0 %v1848_v2 }
  0x29   : > { %1655 = vmatprep.subr.bf16.mxu1 %v1848_v2 }
  0x2a   : > { %556 = vrot.lane.b32.xlu1 %v555_v19, %s1851_s17 }
  0x98   : > { %v522_v56 = vpop.permute.xlu1 %521 }
  0x9c   : > { %v557_v58 = vpop.permute.xlu1 %556 }
  0xe2   : > { %v434_v31 = vpop.f32.mrf.mxu0 }
  0xe3   : > { %v440_v32 = vadd.f32 %v434_v31, %v382_v29  ;;  %v499_v33 = vpop.f32.mrf.mxu1 }
  0xe4   : > { %v505_v34 = vadd.f32 %v499_v33, %v448_v30  ;;  %v1621_v35 = vpop.f32.mrf.mxu0 }
  0xe5   : > { %1716 = vtanh.f32 %v440_v32  ;;  %v1629_v36 = vpop.f32.mrf.mxu1  ;;  %v1559_v43 = vmul.f32 -1.442695, %v440_v32 }
  0xe6   : > { %v437_v37 = vpop.f32.mrf.mxu0  ;;  %1718 = vtanh.f32 %v505_v34  ;;  %v1560_v44 = vmul.f32 -1.442695, %v505_v34 }
  0xe7   : > { %v502_v38 = vpop.f32.mrf.mxu1  ;;  %1720 = vpow2.f32 %v1559_v43  ;;  %v1564_v37 = vld [vmem:[%s1931_s18 + $0x2] sm:$0x1] }
  0xe8   : > { %v1622_v39 = vpop.f32.mrf.mxu0  ;;  %1722 = vpow2.f32 %v1560_v44 }
  0xe9   : > { %v1630_v40 = vpop.f32.mrf.mxu1  ;;  %v698_v39 = vunpack.c.l.bf16 %v1564_v37 }
  0xf2   : > { %v1717_v41 = vpop.eup %1716 }
  0xf3   : > { %526 = vrot.lane.b32.xlu0 %v1717_v41, %s1852_s22  ;;  %v1719_v42 = vpop.eup %1718 }
  0xf4   : > { %v1721_v45 = vpop.eup %1720 }
  0xf5   : > { %v509_v46 = vadd.f32 1.0, %v1721_v45  ;;  %v1723_v47 = vpop.eup %1722 }
  0xf6   : > { %v544_v48 = vadd.f32 1.0, %v1723_v47 }
  0xf7   : > { %561 = vrot.lane.b32.xlu0 %v1719_v42, %s1852_s22  ;;  %1724 = vrcp.f32 %v509_v46  ;;  %v699_v42 = vadd.f32 %v698_v39, %v2019_v28 }
  0xf8   : > { %1726 = vrcp.f32 %v544_v48 }
 0x104   : > { %v1725_v49 = vpop.eup %1724 }
 0x105   : > { %v1727_v52 = vpop.eup %1726  ;;  %v524_v57 = vmul.f32 %v1725_v49, %v522_v56 }
 0x106   : > { %v559_v61 = vmul.f32 %v1727_v52, %v557_v58 }
 0x165   : > { %v527_v50 = vpop.permute.xlu0 %526 }
 0x166   : > { %v529_v51 = vmul.f32 %v1725_v49, %v527_v50 }
 0x168   : > { %531 = vrot.lane.b32.xlu0 %v529_v51, %s1851_s17 }
 0x169   : > { %v562_v53 = vpop.permute.xlu0 %561 }
 0x16a   : > { %v564_v54 = vmul.f32 %v1727_v52, %v562_v53 }
 0x16c   : > { %566 = vrot.lane.b32.xlu1 %v564_v54, %s1851_s17 }
 0x1da   : > { %v532_v59 = vpop.permute.xlu0 %531 }
 0x1db   : > { %v534_v60 = vadd.f32 %v532_v59, %v524_v57 }
 0x1dd   : > { %1728 = vtanh.f32 %v534_v60  ;;  %v605_v22 = vrot.slane %v534_v60, %v1990_v16 }
 0x1de   : > { %v567_v62 = vpop.permute.xlu1 %566 }
 0x1df   : > { %v569_v63 = vadd.f32 %v567_v62, %v559_v61 }
 0x1e1   : > { %1730 = vtanh.f32 %v569_v63  ;;  %v635_v24 = vrot.slane %v569_v63, %v1990_v16 }
 0x1ea   : > { %v1729_v9 = vpop.eup %1728 }
 0x1eb   : > { %537 = vrot.lane.b32.xlu0 %v1729_v9, %s1852_s22 }
 0x1ee   : > { %v1731_v12 = vpop.eup %1730 }
 0x1ef   : > { %572 = vrot.lane.b32.xlu1 %v1731_v12, %s1852_s22  ;;  %583 = vperm.xlu0 %1710, %v581_v11  }
 0x1f3   : > { %613 = vperm.xlu1 %1711, %v611_v13  }
 0x25d   : > { %v538_v14 = vpop.permute.xlu0 %537 }
 0x25e   : > { %v540_v18 = vmul.f32 %v1725_v49, %v538_v14 }
 0x260   : > { %v593_v19 = vrot.slane %v540_v18, %v1990_v16 }
 0x261   : > { %v573_v20 = vpop.permute.xlu1 %572 }
 0x262   : > { %v575_v21 = vmul.f32 %v1727_v52, %v573_v20  ;;  %594 = vrot.lane.b32.xlu1 %v593_v19, %s1851_s17 }
 0x264   : > { %v623_v23 = vrot.slane %v575_v21, %v1990_v16 }
 0x266   : > { %606 = vrot.lane.b32.xlu1 %v605_v22, %s1854_s30  ;;  %624 = vrot.lane.b32.xlu0 %v623_v23, %s1851_s17 }
 0x26a   : > { %636 = vrot.lane.b32.xlu0 %v635_v24, %s1854_s30  ;;  %v584_v27 = vpop.permute.xlu0 %583 }
 0x26b   : > { %vm585_vm5 = vcmp.eq.s32.totalorder %v584_v27, 1 }
 0x26e   : > { %v614_v25 = vpop.permute.xlu1 %613 }
 0x26f   : > { %vm615_vm7 = vcmp.eq.s32.totalorder %v614_v25, 1  ;;  %v816_v25 = vstv %s815_s10 }
 0x270   : > { %vm817_vm8 = vcmp.gt.s32.totalorder %v2034_v5, %v816_v25 }
 0x2d4   : > { %v595_v29 = vpop.permute.xlu1 %594 }
 0x2d5   : > { %v2052_v30 = vsel %vm585_vm5, %v595_v29, %v1974_v7  ;;  %v2055_v31 = vsel %vm585_vm5, %v595_v29, 0.0  ;;  %v819_v29 = vstv %s818_s11 }
 0x2d6   : > { %642 = vst.msk [vmem:[%s1936_s21] sm:$0x3] %vm641_vm6, %v2055_v31  ;;  %v651_v32 = vpack.c.bf16 %v2052_v30, %v2052_v30  ;;  %vm820_vm9 = vcmp.gt.s32.totalorder %v2034_v5, %v819_v29 }
 0x2d8   : > { %1636 = vmatmul.mubr.msk.bf16.vlgmr.msra.gmra.mxu0 %vm396_vm2, %v651_v32  ;;  %v625_v33 = vpop.permute.xlu0 %624  ;;  %v607_v51 = vpop.permute.xlu1 %606  ;;  %v821_v32 = vsel %vm817_vm8, 1, %v1853_v55 }
 0x2d9   : > { %v2065_v34 = vsel %vm615_vm7, %v625_v33, %v1976_v8  ;;  %v2068_v7 = vsel %vm615_vm7, %v625_v33, 0.0  ;;  %1648 = vmatpush3.bf16.msra.mxu0 %v1947_v1  ;;  %1651 = vmatprep.mubr.msk.bf16.mxu0 %vm1849_vm1, %v1848_v2  ;;  %v1562_v8 = vld [vmem:[%s1926_s14 + $0x1] sm:$0x1]  ;;  %v2094_v53 = vsel %vm585_vm5, %v607_v51, %v1987_v15 }
 0x2da   : > { %1561 = vst.msk [vmem:[%s1941_s25 + $0x6] sm:$0x3] %vm641_vm6, %v2068_v7  ;;  %v700_v35 = vpack.c.bf16 %v2065_v34, %v2065_v34  ;;  %1649 = vmatprep.subr.bf16.mxu0 %v1848_v2  ;;  %v649_v36 = vunpack.c.l.bf16 %v1562_v8  ;;  %v759_v56 = vrot.slane %v2094_v53, %v1990_v16 }
 0x2dc   : > { %1644 = vmatmul.mubr.msk.bf16.vlgmr.msra.gmra.mxu1 %vm396_vm2, %v700_v35  ;;  %v650_v38 = vadd.f32 %v649_v36, %v2017_v26  ;;  %v637_v54 = vpop.permute.xlu0 %636  ;;  %v851_v35 = vsel %vm820_vm9, 1, %v1853_v55 }
 0x2dd   : > { %1656 = vmatpush3.bf16.msra.mxu1 %v1954_v3  ;;  %1650 = vmatpush3.bf16.msra.mxu0 %v1960_v4  ;;  %v2101_v58 = vsel %vm615_vm7, %v637_v54, %v1993_v17 }
 0x2de   : > { %1657 = vmatprep.subr.bf16.mxu1 %v1848_v2  ;;  %1659 = vmatprep.mubr.msk.bf16.mxu1 %vm1849_vm1, %v1848_v2  ;;  %v794_v59 = vrot.slane %v2101_v58, %v1990_v16 }
 0x2df   : > { %1663 = vmatprep.subr.bf16.mxu0 %v1848_v2 }
 0x2e1   : > { %1658 = vmatpush3.bf16.msra.mxu1 %v1969_v6 }
 0x2e2   : > { %1671 = vmatprep.subr.bf16.mxu1 %v1848_v2 }
 0x398   : > { %v689_v40 = vpop.f32.mrf.mxu0 }
 0x399   : > { %v695_v41 = vadd.f32 %v689_v40, %v650_v38 }
 0x39a   : > { %v1637_v43 = vpop.f32.mrf.mxu0 }
 0x39b   : > { %1732 = vtanh.f32 %v695_v41  ;;  %v1566_v15 = vmul.f32 -1.442695, %v695_v41 }
 0x39c   : > { %v692_v44 = vpop.f32.mrf.mxu0  ;;  %v738_v45 = vpop.f32.mrf.mxu1 }
 0x39d   : > { %v744_v46 = vadd.f32 %v738_v45, %v699_v42 }
 0x39e   : > { %v1638_v47 = vpop.f32.mrf.mxu0  ;;  %v1645_v48 = vpop.f32.mrf.mxu1 }
 0x39f   : > { %1734 = vtanh.f32 %v744_v46  ;;  %v1567_v60 = vmul.f32 -1.442695, %v744_v46 }
 0x3a0   : > { %v741_v49 = vpop.f32.mrf.mxu1  ;;  %1736 = vpow2.f32 %v1566_v15 }
 0x3a1   : > { %1738 = vpow2.f32 %v1567_v60 }
 0x3a2   : > { %v1646_v50 = vpop.f32.mrf.mxu1 }
 0x3a8   : > { %v1733_v52 = vpop.eup %1732 }
 0x3a9   : > { %765 = vrot.lane.b32.xlu1 %v1733_v52, %s1852_s22  ;;  %v1572_v52 = vld [vmem:[%s1931_s18 + $0x1] sm:$0x1] }
 0x3ac   : > { %v1735_v57 = vpop.eup %1734 }
 0x3ad   : > { %760 = vrot.lane.b32.xlu1 %v759_v56, %s1851_s17  ;;  %800 = vrot.lane.b32.xlu0 %v1735_v57, %s1852_s22  ;;  %v1737_v61 = vpop.eup %1736  ;;  %v938_v56 = vunpack.c.l.bf16 %v1572_v52 }
 0x3ae   : > { %v748_v62 = vadd.f32 1.0, %v1737_v61  ;;  %v1739_v63 = vpop.eup %1738 }
 0x3af   : > { %v783_v0 = vadd.f32 1.0, %v1739_v63  ;;  %v939_v15 = vadd.f32 %v938_v56, %v2019_v28 }
 0x3b0   : > { %1740 = vrcp.f32 %v748_v62 }
 0x3b1   : > { %795 = vrot.lane.b32.xlu0 %v794_v59, %s1851_s17  ;;  %1742 = vrcp.f32 %v783_v0 }
 0x3bd   : > { %v1741_v17 = vpop.eup %1740 }
 0x3be   : > { %v1743_v11 = vpop.eup %1742 }
 0x41b   : > { %v766_v9 = vpop.permute.xlu1 %765 }
 0x41c   : > { %v768_v10 = vmul.f32 %v1741_v17, %v766_v9 }
 0x41e   : > { %770 = vrot.lane.b32.xlu1 %v768_v10, %s1851_s17 }
 0x41f   : > { %v801_v12 = vpop.permute.xlu0 %800  ;;  %v761_v14 = vpop.permute.xlu1 %760 }
 0x420   : > { %v803_v13 = vmul.f32 %v1743_v11, %v801_v12  ;;  %v763_v18 = vmul.f32 %v1741_v17, %v761_v14 }
 0x422   : > { %805 = vrot.lane.b32.xlu0 %v803_v13, %s1851_s17 }
 0x423   : > { %v796_v19 = vpop.permute.xlu0 %795 }
 0x424   : > { %v798_v22 = vmul.f32 %v1743_v11, %v796_v19 }
 0x490   : > { %v771_v20 = vpop.permute.xlu1 %770 }
 0x491   : > { %v773_v21 = vadd.f32 %v771_v20, %v763_v18 }
 0x493   : > { %1744 = vtanh.f32 %v773_v21  ;;  %v845_v40 = vrot.slane %v773_v21, %v1990_v16 }
 0x494   : > { %v806_v23 = vpop.permute.xlu0 %805 }
 0x495   : > { %v808_v24 = vadd.f32 %v806_v23, %v798_v22 }
 0x497   : > { %1746 = vtanh.f32 %v808_v24  ;;  %v875_v42 = vrot.slane %v808_v24, %v1990_v16 }
 0x4a0   : > { %v1745_v27 = vpop.eup %1744 }
 0x4a1   : > { %776 = vrot.lane.b32.xlu1 %v1745_v27, %s1852_s22 }
 0x4a4   : > { %v1747_v33 = vpop.eup %1746 }
 0x4a5   : > { %823 = vperm.xlu1 %1711, %v821_v32   ;;  %811 = vrot.lane.b32.xlu0 %v1747_v33, %s1852_s22 }
 0x4a9   : > { %853 = vperm.xlu0 %1710, %v851_v35  }
 0x513   : > { %v777_v8 = vpop.permute.xlu1 %776 }
 0x514   : > { %v779_v36 = vmul.f32 %v1741_v17, %v777_v8 }
 0x516   : > { %v833_v37 = vrot.slane %v779_v36, %v1990_v16 }
 0x517   : > { %v812_v38 = vpop.permute.xlu0 %811 }
 0x518   : > { %v814_v39 = vmul.f32 %v1743_v11, %v812_v38  ;;  %834 = vrot.lane.b32.xlu1 %v833_v37, %s1851_s17 }
 0x51a   : > { %v863_v41 = vrot.slane %v814_v39, %v1990_v16 }
 0x51c   : > { %846 = vrot.lane.b32.xlu1 %v845_v40, %s1854_s30  ;;  %864 = vrot.lane.b32.xlu0 %v863_v41, %s1851_s17  ;;  %v1056_v40 = vstv %s1055_s12 }
 0x51d   : > { %vm1057_vm12 = vcmp.gt.s32.totalorder %v2034_v5, %v1056_v40 }
 0x520   : > { %876 = vrot.lane.b32.xlu0 %v875_v42, %s1854_s30  ;;  %v824_v43 = vpop.permute.xlu1 %823  ;;  %v1059_v42 = vstv %s1058_s13 }
 0x521   : > { %vm825_vm10 = vcmp.eq.s32.totalorder %v824_v43, 1  ;;  %v1061_v43 = vsel %vm1057_vm12, 1, %v1853_v55  ;;  %vm1060_vm13 = vcmp.gt.s32.totalorder %v2034_v5, %v1059_v42 }
 0x524   : > { %v854_v44 = vpop.permute.xlu0 %853 }
 0x525   : > { %vm855_vm11 = vcmp.eq.s32.totalorder %v854_v44, 1 }
 0x58a   : > { %v835_v45 = vpop.permute.xlu1 %834 }
 0x58b   : > { %v2128_v46 = vsel %vm825_vm10, %v835_v45, %v2052_v30  ;;  %v2131_v47 = vsel %vm825_vm10, %v835_v45, 0.0  ;;  %v1091_v45 = vsel %vm1060_vm13, 1, %v1853_v55 }
 0x58c   : > { %1568 = vst.msk [vmem:[%s1936_s21 + $0x2] sm:$0x3] %vm641_vm6, %v2131_v47  ;;  %v891_v48 = vpack.c.bf16 %v2128_v46, %v2128_v46 }
 0x58e   : > { %1652 = vmatmul.mubr.msk.bf16.vlgmr.msra.gmra.mxu0 %vm396_vm2, %v891_v48  ;;  %v865_v49 = vpop.permute.xlu0 %864  ;;  %v847_v0 = vpop.permute.xlu1 %846 }
 0x58f   : > { %v2141_v50 = vsel %vm855_vm11, %v865_v49, %v2065_v34  ;;  %v2144_v30 = vsel %vm855_vm11, %v865_v49, 0.0  ;;  %1664 = vmatpush3.bf16.msra.mxu0 %v1947_v1  ;;  %1667 = vmatprep.mubr.msk.bf16.mxu0 %vm1849_vm1, %v1848_v2  ;;  %v1570_v1 = vld [vmem:[%s1926_s14 + $0x2] sm:$0x1]  ;;  %v2168_v9 = vsel %vm825_vm10, %v847_v0, %v2094_v53  ;;  %v1176_v0 = vld [vmem:[%s1931_s18] sm:$0x1] }
 0x590   : > { %1569 = vst.msk [vmem:[%s1941_s25 + $0x4] sm:$0x3] %vm641_vm6, %v2144_v30  ;;  %v940_v51 = vpack.c.bf16 %v2141_v50, %v2141_v50  ;;  %1665 = vmatprep.subr.bf16.mxu0 %v1848_v2  ;;  %v889_v34 = vunpack.c.l.bf16 %v1570_v1  ;;  %v999_v11 = vrot.slane %v2168_v9, %v1990_v16 }
 0x592   : > { %1660 = vmatmul.mubr.msk.bf16.vlgmr.msra.gmra.mxu1 %vm396_vm2, %v940_v51  ;;  %v890_v54 = vadd.f32 %v889_v34, %v2017_v26  ;;  %v877_v10 = vpop.permute.xlu0 %876 }
 0x593   : > { %1672 = vmatpush3.bf16.msra.mxu1 %v1954_v3  ;;  %1666 = vmatpush3.bf16.msra.mxu0 %v1960_v4  ;;  %v2175_v13 = vsel %vm855_vm11, %v877_v10, %v2101_v58  ;;  %v1177_v10 = vunpack.c.l.bf16 %v1176_v0 }
 0x594   : > { %1673 = vmatprep.subr.bf16.mxu1 %v1848_v2  ;;  %1675 = vmatprep.mubr.msk.bf16.mxu1 %vm1849_vm1, %v1848_v2  ;;  %v1034_v14 = vrot.slane %v2175_v13, %v1990_v16 }
 0x597   : > { %1674 = vmatpush3.bf16.msra.mxu1 %v1969_v6 }
 0x64e   : > { %v929_v57 = vpop.f32.mrf.mxu0 }
 0x64f   : > { %v935_v59 = vadd.f32 %v929_v57, %v890_v54 }
 0x650   : > { %v1653_v3 = vpop.f32.mrf.mxu0 }
 0x651   : > { %1748 = vtanh.f32 %v935_v59  ;;  %v1574_v53 = vmul.f32 -1.442695, %v935_v59  ;;  %v885_v59 = vadd.f32 %v2131_v47, %v2055_v31  ;;  %v886_v31 = vadd.f32 %v2144_v30, %v2068_v7  ;;  %v1578_v7 = vld [vmem:[%s1926_s14 + $0x3] sm:$0x1]  ;;  %s1294_s14 = sadd.s32 3, %s1914_s29 }
 0x652   : > { %v932_v4 = vpop.f32.mrf.mxu0  ;;  %v978_v60 = vpop.f32.mrf.mxu1  ;;  %v1129_v30 = vunpack.c.l.bf16 %v1578_v7 }
 0x653   : > { %v984_v61 = vadd.f32 %v978_v60, %v939_v15 }
 0x654   : > { %v1654_v62 = vpop.f32.mrf.mxu0  ;;  %v1661_v63 = vpop.f32.mrf.mxu1 }
 0x655   : > { %1750 = vtanh.f32 %v984_v61  ;;  %v1575_v18 = vmul.f32 -1.442695, %v984_v61 }
 0x656   : > { %v981_v2 = vpop.f32.mrf.mxu1  ;;  %1752 = vpow2.f32 %v1574_v53 }
 0x657   : > { %1754 = vpow2.f32 %v1575_v18 }
 0x658   : > { %v1662_v6 = vpop.f32.mrf.mxu1 }
 0x65e   : > { %v1749_v17 = vpop.eup %1748 }
 0x65f   : > { %1005 = vrot.lane.b32.xlu1 %v1749_v17, %s1852_s22  ;;  %v1130_v17 = vadd.f32 %v1129_v30, %v2017_v26 }
 0x662   : > { %v1751_v12 = vpop.eup %1750 }
 0x663   : > { %1000 = vrot.lane.b32.xlu1 %v999_v11, %s1851_s17  ;;  %1040 = vrot.lane.b32.xlu0 %v1751_v12, %s1852_s22  ;;  %v1753_v19 = vpop.eup %1752  ;;  %v1178_v12 = vadd.f32 %v1177_v10, %v2019_v28 }
 0x664   : > { %v988_v20 = vadd.f32 1.0, %v1753_v19  ;;  %v1755_v21 = vpop.eup %1754 }
 0x665   : > { %v1023_v22 = vadd.f32 1.0, %v1755_v21 }
 0x666   : > { %1756 = vrcp.f32 %v988_v20 }
 0x667   : > { %1035 = vrot.lane.b32.xlu0 %v1034_v14, %s1851_s17  ;;  %1758 = vrcp.f32 %v1023_v22 }
 0x673   : > { %v1757_v58 = vpop.eup %1756 }
 0x674   : > { %v1759_v25 = vpop.eup %1758 }
 0x6d1   : > { %v1006_v23 = vpop.permute.xlu1 %1005 }
 0x6d2   : > { %v1008_v24 = vmul.f32 %v1757_v58, %v1006_v23 }
 0x6d4   : > { %1010 = vrot.lane.b32.xlu1 %v1008_v24, %s1851_s17 }
 0x6d5   : > { %v1041_v27 = vpop.permute.xlu0 %1040  ;;  %v1001_v32 = vpop.permute.xlu1 %1000 }
 0x6d6   : > { %v1043_v29 = vmul.f32 %v1759_v25, %v1041_v27  ;;  %v1003_v33 = vmul.f32 %v1757_v58, %v1001_v32 }
 0x6d8   : > { %1045 = vrot.lane.b32.xlu0 %v1043_v29, %s1851_s17 }
 0x6d9   : > { %v1036_v35 = vpop.permute.xlu0 %1035 }
 0x6da   : > { %v1038_v37 = vmul.f32 %v1759_v25, %v1036_v35 }
 0x746   : > { %v1011_v8 = vpop.permute.xlu1 %1010 }
 0x747   : > { %v1013_v36 = vadd.f32 %v1011_v8, %v1003_v33 }
 0x749   : > { %1760 = vtanh.f32 %v1013_v36  ;;  %v1085_v52 = vrot.slane %v1013_v36, %v1990_v16 }
 0x74a   : > { %v1046_v38 = vpop.permute.xlu0 %1045 }
 0x74b   : > { %v1048_v39 = vadd.f32 %v1046_v38, %v1038_v37 }
 0x74d   : > { %1762 = vtanh.f32 %v1048_v39  ;;  %v1115_v56 = vrot.slane %v1048_v39, %v1990_v16 }
 0x756   : > { %v1761_v41 = vpop.eup %1760 }
 0x757   : > { %1016 = vrot.lane.b32.xlu1 %v1761_v41, %s1852_s22 }
 0x75a   : > { %v1763_v44 = vpop.eup %1762 }
 0x75b   : > { %1063 = vperm.xlu1 %1711, %v1061_v43   ;;  %1051 = vrot.lane.b32.xlu0 %v1763_v44, %s1852_s22 }
 0x75f   : > { %1093 = vperm.xlu0 %1710, %v1091_v45  }
 0x7c9   : > { %v1017_v48 = vpop.permute.xlu1 %1016 }
 0x7ca   : > { %v1019_v49 = vmul.f32 %v1757_v58, %v1017_v48 }
 0x7cc   : > { %v1073_v51 = vrot.slane %v1019_v49, %v1990_v16 }
 0x7cd   : > { %v1052_v1 = vpop.permute.xlu0 %1051 }
 0x7ce   : > { %v1054_v34 = vmul.f32 %v1759_v25, %v1052_v1  ;;  %1074 = vrot.lane.b32.xlu1 %v1073_v51, %s1851_s17 }
 0x7d0   : > { %v1103_v54 = vrot.slane %v1054_v34, %v1990_v16 }
 0x7d2   : > { %1086 = vrot.lane.b32.xlu1 %v1085_v52, %s1854_s30  ;;  %1104 = vrot.lane.b32.xlu0 %v1103_v54, %s1851_s17  ;;  %v1295_v52 = vstv %s1294_s14 }
 0x7d3   : > { %vm1296_vm0 = vcmp.gt.s32.totalorder %v2034_v5, %v1295_v52 }
 0x7d6   : > { %1116 = vrot.lane.b32.xlu0 %v1115_v56, %s1854_s30  ;;  %v1064_v57 = vpop.permute.xlu1 %1063  ;;  %v1297_v56 = vstv %s1918_s9 }
 0x7d7   : > { %vm1065_vm14 = vcmp.eq.s32.totalorder %v1064_v57, 1  ;;  %v1299_v57 = vsel %vm1296_vm0, 1, %v1853_v55  ;;  %vm1298_vm1 = vcmp.gt.s32.totalorder %v2034_v5, %v1297_v56 }
 0x7da   : > { %v1094_v15 = vpop.permute.xlu0 %1093 }
 0x7db   : > { %vm1095_vm15 = vcmp.eq.s32.totalorder %v1094_v15, 1  ;;  %v1329_v15 = vsel %vm1298_vm1, 1, %v1853_v55 }
 0x840   : > { %v1075_v3 = vpop.permute.xlu1 %1074 }
 0x841   : > { %v2204_v4 = vsel %vm1065_vm14, %v1075_v3, %v2128_v46  ;;  %v1090_v60 = vsel %vm1065_vm14, %v1075_v3, 0.0 }
 0x842   : > { %1576 = vst.msk [vmem:[%s1936_s21 + $0x4] sm:$0x3] %vm641_vm6, %v1090_v60  ;;  %v2209_v61 = vadd.f32 %v1090_v60, %v885_v59  ;;  %v1131_v62 = vpack.c.bf16 %v2204_v4, %v2204_v4 }
 0x844   : > { %1668 = vmatmul.mubr.msk.bf16.vlgmr.msra.gmra.mxu0 %vm396_vm2, %v1131_v62  ;;  %v1105_v47 = vpop.permute.xlu0 %1104  ;;  %v1087_v23 = vpop.permute.xlu1 %1086 }
 0x845   : > { %v2218_v46 = vsel %vm1095_vm15, %v1105_v47, %v2141_v50  ;;  %v1120_v63 = vsel %vm1095_vm15, %v1105_v47, 0.0  ;;  %v2234_v26 = vsel %vm1065_vm14, %v1087_v23, %v2168_v9 }
 0x846   : > { %1577 = vst.msk [vmem:[%s1941_s25 + $0x2] sm:$0x3] %vm641_vm6, %v1120_v63  ;;  %v2223_v2 = vadd.f32 %v1120_v63, %v886_v31  ;;  %v1179_v6 = vpack.c.bf16 %v2218_v46, %v2218_v46  ;;  %v1238_v28 = vrot.slane %v2234_v26, %v1990_v16 }
 0x848   : > { %1676 = vmatmul.mubr.msk.bf16.vlgmr.msra.gmra.mxu1 %vm396_vm2, %v1179_v6  ;;  %v1117_v25 = vpop.permute.xlu0 %1116 }
 0x849   : > { %v2241_v29 = vsel %vm1095_vm15, %v1117_v25, %v2175_v13 }
 0x84a   : > { %v1273_v32 = vrot.slane %v2241_v29, %v1990_v16 }
 0x904   : > { %v1169_v11 = vpop.f32.mrf.mxu0 }
 0x905   : > { %v1175_v50 = vadd.f32 %v1169_v11, %v1130_v17  ;;  %v1368_v17 = vld [vmem:[#allocation6] sm:$0x3] }
 0x906   : > { %v1669_v14 = vpop.f32.mrf.mxu0 }
 0x907   : > { %1764 = vtanh.f32 %v1175_v50  ;;  %v1581_v9 = vmul.f32 -1.442695, %v1175_v50 }
 0x908   : > { %v1172_v53 = vpop.f32.mrf.mxu0  ;;  %v1217_v18 = vpop.f32.mrf.mxu1 }
 0x909   : > { %v1223_v19 = vadd.f32 %v1217_v18, %v1178_v12  ;;  %v1371_v18 = vld [vmem:[#allocation8] sm:$0x3] }
 0x90a   : > { %v1670_v20 = vpop.f32.mrf.mxu0  ;;  %v1677_v21 = vpop.f32.mrf.mxu1 }
 0x90b   : > { %1766 = vtanh.f32 %v1223_v19  ;;  %v1582_v33 = vmul.f32 -1.442695, %v1223_v19 }
 0x90c   : > { %v1220_v22 = vpop.f32.mrf.mxu1  ;;  %1768 = vpow2.f32 %v1581_v9 }
 0x90d   : > { %1770 = vpow2.f32 %v1582_v33 }
 0x90e   : > { %v1678_v58 = vpop.f32.mrf.mxu1 }
 0x914   : > { %v1765_v24 = vpop.eup %1764 }
 0x915   : > { %1244 = vrot.lane.b32.xlu1 %v1765_v24, %s1852_s22 }
 0x918   : > { %v1767_v27 = vpop.eup %1766 }
 0x919   : > { %1239 = vrot.lane.b32.xlu1 %v1238_v28, %s1851_s17  ;;  %1279 = vrot.lane.b32.xlu0 %v1767_v27, %s1852_s22  ;;  %v1769_v35 = vpop.eup %1768 }
 0x91a   : > { %v1227_v8 = vadd.f32 1.0, %v1769_v35  ;;  %v1771_v36 = vpop.eup %1770 }
 0x91b   : > { %v1262_v37 = vadd.f32 1.0, %v1771_v36 }
 0x91c   : > { %1772 = vrcp.f32 %v1227_v8 }
 0x91d   : > { %1274 = vrot.lane.b32.xlu0 %v1273_v32, %s1851_s17  ;;  %1774 = vrcp.f32 %v1262_v37 }
 0x929   : > { %v1773_v13 = vpop.eup %1772 }
 0x92a   : > { %v1775_v40 = vpop.eup %1774 }
 0x987   : > { %v1245_v38 = vpop.permute.xlu1 %1244 }
 0x988   : > { %v1247_v39 = vmul.f32 %v1773_v13, %v1245_v38 }
 0x98a   : > { %1249 = vrot.lane.b32.xlu1 %v1247_v39, %s1851_s17 }
 0x98b   : > { %v1280_v41 = vpop.permute.xlu0 %1279  ;;  %v1240_v43 = vpop.permute.xlu1 %1239 }
 0x98c   : > { %v1282_v42 = vmul.f32 %v1775_v40, %v1280_v41  ;;  %v1242_v44 = vmul.f32 %v1773_v13, %v1240_v43 }
 0x98e   : > { %1284 = vrot.lane.b32.xlu0 %v1282_v42, %s1851_s17 }
 0x98f   : > { %v1275_v45 = vpop.permute.xlu0 %1274 }
 0x990   : > { %v1277_v51 = vmul.f32 %v1775_v40, %v1275_v45 }
 0x9fc   : > { %v1250_v48 = vpop.permute.xlu1 %1249 }
 0x9fd   : > { %v1252_v49 = vadd.f32 %v1250_v48, %v1242_v44 }
 0x9ff   : > { %1776 = vtanh.f32 %v1252_v49  ;;  %v1323_v63 = vrot.slane %v1252_v49, %v1990_v16 }
 0xa00   : > { %v1285_v1 = vpop.permute.xlu0 %1284 }
 0xa01   : > { %v1287_v34 = vadd.f32 %v1285_v1, %v1277_v51 }
 0xa03   : > { %1778 = vtanh.f32 %v1287_v34  ;;  %v1353_v55 = vrot.slane %v1287_v34, %v1990_v16 }
 0xa0c   : > { %v1777_v54 = vpop.eup %1776 }
 0xa0d   : > { %1255 = vrot.lane.b32.xlu1 %v1777_v54, %s1852_s22 }
 0xa10   : > { %v1779_v59 = vpop.eup %1778 }
 0xa11   : > { %1301 = vperm.xlu1 %1711, %v1299_v57   ;;  %1290 = vrot.lane.b32.xlu0 %v1779_v59, %s1852_s22 }
 0xa15   : > { %1331 = vperm.xlu0 %1710, %v1329_v15  }
 0xa7f   : > { %v1256_v3 = vpop.permute.xlu1 %1255 }
 0xa80   : > { %v1258_v60 = vmul.f32 %v1773_v13, %v1256_v3 }
 0xa82   : > { %v1311_v62 = vrot.slane %v1258_v60, %v1990_v16 }
 0xa83   : > { %v1291_v31 = vpop.permute.xlu0 %1290 }
 0xa84   : > { %v1293_v47 = vmul.f32 %v1775_v40, %v1291_v31  ;;  %1312 = vrot.lane.b32.xlu1 %v1311_v62, %s1851_s17 }
 0xa86   : > { %v1341_v6 = vrot.slane %v1293_v47, %v1990_v16 }
 0xa88   : > { %1324 = vrot.lane.b32.xlu1 %v1323_v63, %s1854_s30  ;;  %1342 = vrot.lane.b32.xlu0 %v1341_v6, %s1851_s17 }
 0xa8c   : > { %1354 = vrot.lane.b32.xlu0 %v1353_v55, %s1854_s30  ;;  %v1302_v7 = vpop.permute.xlu1 %1301 }
 0xa8d   : > { %vm1303_vm2 = vcmp.eq.s32.totalorder %v1302_v7, 1 }
 0xa90   : > { %v1332_v30 = vpop.permute.xlu0 %1331 }
 0xa91   : > { %vm1333_vm3 = vcmp.eq.s32.totalorder %v1332_v30, 1 }
 0xaf6   : > { %v1313_v0 = vpop.permute.xlu1 %1312 }
 0xaf7   : > { %v1315_v10 = vsel %vm1303_vm2, %v1313_v0, %v2204_v4  ;;  %v1328_v11 = vsel %vm1303_vm2, %v1313_v0, 0.0 }
 0xaf8   : > { %1583 = vst.msk [vmem:[%s1936_s21 + $0x6] sm:$0x3] %vm641_vm6, %v1328_v11  ;;  %v1362_v50 = vadd.f32 %v1328_v11, %v2209_v61  ;;  %1364 = vst.msk [vmem:[#allocation2] sm:$0x3] %vm641_vm6, %v1315_v10 }
 0xafa   : > { %v1369_v12 = vadd.f32 %v1368_v17, %v1362_v50  ;;  %v1325_v16 = vpop.permute.xlu1 %1324  ;;  %v1343_v14 = vpop.permute.xlu0 %1342 }
 0xafb   : > { %v1327_v53 = vsel %vm1303_vm2, %v1325_v16, %v2234_v26  ;;  %v1345_v19 = vsel %vm1333_vm3, %v1343_v14, %v2218_v46  ;;  %v1358_v20 = vsel %vm1333_vm3, %v1343_v14, 0.0 }
 0xafc   : > { %1370 = vst.msk [vmem:[#allocation6] sm:$0x3] %vm641_vm6, %v1369_v12  ;;  %1365 = vst.msk [vmem:[#allocation3] sm:$0x3] %vm641_vm6, %v1327_v53  ;;  %v1363_v4 = vadd.f32 %v1358_v20, %v2223_v2  ;;  %1377 = sbr.rel (%p1584_p6) target bundleno = 2962 (0xb92), region = 48 }
 0xafd   : > { %1361 = vst.msk [vmem:[%s1941_s25] sm:$0x3] %vm641_vm6, %v1358_v20  ;;  %1366 = vst.msk [vmem:[#allocation4] sm:$0x3] %vm641_vm6, %v1345_v19 }
 0xafe   : > { %v1372_v61 = vadd.f32 %v1371_v18, %v1363_v4  ;;  %v1355_v21 = vpop.permute.xlu0 %1354 }
 0xaff   : > { %v1357_v22 = vsel %vm1333_vm3, %v1355_v21, %v2241_v29 }
 0xb00   : > { %1373 = vst.msk [vmem:[#allocation8] sm:$0x3] %vm641_vm6, %v1372_v61  ;;  %1367 = vst.msk [vmem:[#allocation5] sm:$0x3] %vm641_vm6, %v1357_v22 }
 0xb01   : > { %v1378_v46 = vcvt.s32.f32 %v2034_v5  ;;  %v1855_v58 = vmov 0  }
 0xb02   : > { %1780 = vset.pattern.permute.xlu0 %v1855_v58 }
 0xb03   : > { %v1379_v23 = vmax.f32 %v1378_v46, 1.0  ;;  %v1382_v24 = vld [vmem:[#allocation6] sm:$0x3] }
 0xb05   : > { %1781 = vrcp.f32 %v1379_v23 }
 0xb07   : > { %v1390_v26 = vld [vmem:[#allocation8] sm:$0x3] }
 0xb12   : > { %v1782_v2 = vpop.eup %1781 }
 0xb13   : > { %1385 = vperm.xlu0 %1780, %v1782_v2  }
 0xb8e   : > { %v1386_v25 = vpop.permute.xlu0 %1385 }
 0xb8f   : > { %v1388_v28 = vmul.f32 %v1386_v25, %v1382_v24  ;;  %v1391_v27 = vmul.f32 %v1390_v26, %v1386_v25 }
 0xb91   : > { %1389 = vst.msk [vmem:[#allocation6] sm:$0x3] %vm641_vm6, %v1388_v28  ;;  %1392 = vst.msk [vmem:[#allocation8] sm:$0x3] %vm641_vm6, %v1391_v27 }
 0xb92 PF: > { %p1687_p7 = scmp.eq.s32.totalorder %s1909_s28, 1  ;;  %s1856_s29 = smov [#allocation6]  }
 0xb93   : > { %s1420_s9 = sshll.u32 %s1856_s29, 4  ;;  %s1857_s18 = smov [#allocation8]   ;;  %s1421_s9 = int_to_ptr.vmem [resolvable:$true] %s1420_s9 }
 0xb94   : > { %s1431_s21 = sshll.u32 %s1857_s18, 4  ;;  %s1783_s25 = scalar_lea.vmem %s1421_s9, 32  ;;  %s1432_s21 = int_to_ptr.vmem [resolvable:$true] %s1431_s21 }
 0xb95   : > { %p1784_p8 = scmp.ne.s32.totalorder %s1421_s9, %s1783_s25  ;;  %p1790_p11 = scmp.lt.s32.totalorder %s1421_s9, %s1421_s9 }
 0xb96   : > { %p1791_p12 = scmp.lt.s32.totalorder %s1783_s25, %s1783_s25 }
 0xb97   : > { %p1785_p9 = pnand %p1784_p8, %p1687_p7 }
 0xb98   : > { %p1792_p13 = por %p1791_p12, %p1790_p11 }
 0xb99   : > { %p1786_p10 = pneg %p1785_p9 }
 0xb9b   : > { %p1793_p0 = pnand %p1792_p13, %p1786_p10 }
 0xb9d   : > { %1796 = shalt.err (!%p1793_p0)
}
 0xb9e   : > { %1680 = dma.vmem_to_hbm [thread:$0]  (%p1687_p7), %s1421_s9, 32, %s2319_s7, [#allocation7]  }
 0xb9f   : > { %s1807_s17 = scalar_lea.vmem %s1432_s21, 32  ;;  %p1814_p4 = scmp.lt.s32.totalorder %s1432_s21, %s1432_s21 }
 0xba0   : > { %p1808_p1 = scmp.ne.s32.totalorder %s1432_s21, %s1807_s17  ;;  %p1815_p5 = scmp.lt.s32.totalorder %s1807_s17, %s1807_s17 }
 0xba2   : > { %p1809_p2 = pnand %p1808_p1, %p1687_p7  ;;  %p1816_p6 = por %p1815_p5, %p1814_p4 }
 0xba4   : > { %p1810_p3 = pneg %p1809_p2 }
 0xba6   : > { %p1817_p8 = pnand %p1816_p6, %p1810_p3 }
 0xba8   : > { %1820 = shalt.err (!%p1817_p8)
}
 0xba9   : > { %1682 = dma.vmem_to_hbm [thread:$0]  (%p1687_p7), %s1432_s21, 32, %s2320_s8, [#allocation9]  }
 0xbaa   : > { %1836 = dma.done.wait (%p1687_p7), [#allocation7], 32  }
 0xbab   : > { %1838 = vsyncadd (%p1687_p7), [#allocation7], 4294967264 }
 0xbac   : > { %1840 = dma.done.wait (%p1687_p7), [#allocation9], 32  }
 0xbad   : > { %1842 = vsyncadd (%p1687_p7), [#allocation9], 4294967264 }
 0xbae PF: > { %s21_s27 = sadd.s32 1, %s1845_s27  }
 0xbaf   : > { %p18_p9 = scmp.ge.s32.totalorder %s21_s27, 4  }
 0xbb1   :  { %20 = sbr.rel (!%p18_p9) target bundleno = 2 (0x2), region = 122 }
 0xbb6   :  { %1465 = vsyncpa [#allocation7], 1 }
 0xbb7   :  { %1467 = vsyncpa [#allocation7 + $0x1], 1 }
 0xbb8   :  { %1468 = vsyncpa [#allocation9], 1 }

// kernel: bilstm_layer_forward.3
= control target key start
LH: loop header
LB: loop body
LE: loop exit
PB: predicated region body
PF: predicated region fallthrough
CT: control target
= control target key end

     0   :  { %14 = vsyncpa [#allocation7], 0  ;;  %s2598_s0 = inlined_call_operand.vmem [shape: s32[2,1], index: 0, kind: input, shape index: {}]   ;;  %s2599_s1 = inlined_call_operand.vmem [shape: bf16[8,2,128], index: 1, kind: input, shape index: {}]   ;;  %s2600_s2 = inlined_call_operand.vmem [shape: bf16[8,2,128], index: 2, kind: input, shape index: {}]   ;;  %s2601_s3 = inlined_call_operand.vmem [shape: bf16[2,32,128], index: 3, kind: input, shape index: {}]   ;;  %s2602_s4 = inlined_call_operand.vmem [shape: f32[2,128], index: 4, kind: input, shape index: {}]   ;;  %s2603_s5 = inlined_call_operand.hbm [shape: f32[8,2,32], index: 5, kind: output, shape index: {0}]   ;;  %s2604_s6 = inlined_call_operand.hbm [shape: f32[8,2,32], index: 6, kind: output, shape index: {1}]   ;;  %s2605_s7 = inlined_call_operand.vmem [shape: f32[2,32], index: 7, kind: output, shape index: {2}]   ;;  %s2606_s8 = inlined_call_operand.vmem [shape: f32[2,32], index: 8, kind: output, shape index: {3}]  }
   0x1   :  { %16 = vsyncpa [#allocation7 + $0x1], 0 }
   0x2   :  { %17 = vsyncpa [#allocation9], 0 }
   0x3   :  { %19 = vsyncpa [#allocation9 + $0x1], 0  ;;  %s1999_s27 = smov 0   ;;  %s2001_s28 = smov 0  }
   0x4   :  { %s2003_s29 = smov 0   ;;  %s2005_s30 = smov 0  }
   0x5   :  { %s2007_s9 = smov 0   ;;  %s2009_s10 = smov 0  }
   0x6   :  { %s2011_s11 = smov 0  }
   0x7 LB: > { %2616 = sst [smem:[#allocation12_spill]] %s1916_s27  ;;  %s2035_s12 = sadd.s32 4294967295, %s1940_s11   ;;  %s1940_s11 = sphi %s2011_s11, %s2634_s11   ;;  %s1936_s10 = sphi %s2009_s10, %s2638_s10   ;;  %s1932_s9 = sphi %s2007_s9, %s2642_s9   ;;  %s1928_s30 = sphi %s2005_s30, %s2641_s30   ;;  %s1924_s29 = sphi %s2003_s29, %s2636_s29   ;;  %s1920_s28 = sphi %s2001_s28, %s2640_s28   ;;  %s1916_s27 = sphi %s1999_s27, %s2639_s27  }
   0x8   : > { %2617 = sst [smem:[#allocation13_spill]] %s1924_s29  ;;  %s1533_s13 = sadd.s32 4294967294, %s1940_s11  }
   0x9   : > { %2618 = sst [smem:[#allocation14_spill]] %s1936_s10  ;;  %s2039_s14 = sadd.s32 1, %s1940_s11  }
   0xa   : > { %2619 = sst [smem:[#allocation15_spill]] %s2039_s14  ;;  %s149_s15 = sadd.s32 1, %s1936_s10 }
   0xb   : > { %s146_s16 = ssub.s32 %s1940_s11, %s2039_s14  ;;  %p159_p0 = scmp.ne.s32.totalorder %s1936_s10, %s1932_s9 }
   0xc   : > { %p147_p1 = scmp.eq.s32.totalorder %s146_s16, 0  ;;  %p160_p2 = scmp.eq.s32.totalorder %s2035_s12, 1 }
   0xd   : > { %p165_p3 = scmp.ne.s32.totalorder %s1932_s9, %s1928_s30  ;;  %p2049_p4 = scmp.eq.s32.totalorder %s1533_s13, 1 }
   0xe   : > { %s2054_s18 = scalar_select %p147_p1, %s1936_s10, %s149_s15  }
   0xf   : > { %p2058_p5 = por %p160_p2, %p159_p0  ;;  %p2064_p6 = por %p2049_p4, %p165_p3 }
  0x10   : > { %2621 = sst [smem:[#allocation16_spill]] %s2054_s18  ;;  %s172_s21 = ssub.s32 1, %s1940_s11 }
  0x11   : > { %s2623_s20 = scalar_select %p2064_p6, 1, 0 }
  0x12   : > { %s173_s22 = ssub.s32 1, %s2039_s14  ;;  %s177_s24 = sadd.s32 1, %s1924_s29 }
  0x13   : > { %2624 = sst [smem:[#allocation17_spill]] %s2623_s20  ;;  %s174_s23 = ssub.s32 %s172_s21, %s173_s22 }
  0x14   : > { %p175_p7 = scmp.eq.s32.totalorder %s174_s23, 0  ;;  %p187_p8 = scmp.ne.s32.totalorder %s1924_s29, %s1920_s28 }
  0x15   : > { %p193_p9 = scmp.ne.s32.totalorder %s1920_s28, %s1916_s27  ;;  %p1536_p10 = scmp.ge.s32.totalorder %s1940_s11, 1 }
  0x16   : > { %s2077_s25 = scalar_select %p175_p7, %s1924_s29, %s177_s24  }
  0x17   : > { %p2081_p11 = por %p187_p8, %p160_p2  ;;  %p2087_p12 = por %p193_p9, %p2049_p4 }
  0x18   : > { %2625 = sst [smem:[#allocation18_spill]] %s2077_s25  ;;  %p281_p13 = scmp.lt.s32.totalorder %s1940_s11, 3 }
  0x19   : > { %s2627_s13 = scalar_select %p2087_p12, 1, 0 }
  0x1a   : > { %p282_p0 = pnand %p1536_p10, %p281_p13 }
  0x1b   : > { %2628 = sst [smem:[#allocation19_spill]] %s2627_s13  ;;  %s2609_s15 = sand.u32 (!%p282_p0), 1, %s1932_s9  }
  0x1c   : > { %285 = sbr.rel (%p282_p0) target bundleno = 3033 (0xbd9), region = 40  ;;  %s2610_s16 = sand.u32 (!%p282_p0), 1, %s1920_s28  }
  0x1d   : > { %s1537_s21 = sshll.u32 (!%p282_p0), %s2609_s15, 3  ;;  %s1538_s17 = sshll.u32 (!%p282_p0), %s2610_s16, 3 }
  0x1e   : > { %s2099_s22 = sshll.u32 (!%p282_p0), %s2035_s12, 2  ;;  %s329_s23 = ssub.s32 (!%p282_p0), 1, %s2035_s12 }
  0x1f   : > { %p325_p1 = scmp.lt.s32.totalorder (!%p282_p0), %s2099_s22, 7  ;;  %s2105_s24 = sshll.u32 (!%p282_p0), %s329_s23, 2 }
  0x20   : > { %p331_p2 = scmp.lt.s32.totalorder (!%p282_p0), %s2105_s24, 7  ;;  %s2120_s27 = scalar_lea.vmem (!%p282_p0), [#allocation6], %s1537_s21 }
  0x21   : > { %s326_s18 = scalar_select %p325_p1, %s2099_s22, 7 }
  0x22   : > { %s332_s10 = scalar_select %p331_p2, %s2105_s24, 7 }
  0x23   : > { %s2113_s15 = scalar_lea.vmem %s2599_s1, %s326_s18  ;;  %s2122_s20 = scalar_lea.vmem [#allocation8], %s1538_s17 }
  0x24   : > { %s2118_s13 = scalar_lea.vmem %s2600_s2, %s332_s10  ;;  %p1541_p3 = scmp.ne.s32.totalorder %s2035_s12, 0 }
  0x26   : > { %343 = sbr.rel (%p1541_p3) target bundleno = 47 (0x2f), region = 44 }
  0x2b   : > { %vm344_vm0 = vcmask 254976   ;;  %v1942_v0 = vmov 0.0  }
  0x2c   : > { %345 = vst.msk [vmem:[#allocation2] sm:$0x3] %vm344_vm0, %v1942_v0  ;;  %346 = vst.msk [vmem:[#allocation3] sm:$0x3] %vm344_vm0, %v1942_v0 }
  0x2d   : > { %347 = vst.msk [vmem:[#allocation4] sm:$0x3] %vm344_vm0, %v1942_v0  ;;  %348 = vst.msk [vmem:[#allocation5] sm:$0x3] %vm344_vm0, %v1942_v0 }
  0x2e   : > { %349 = vst.msk [vmem:[%s2605_s7] sm:$0x3] %vm344_vm0, %v1942_v0  ;;  %350 = vst.msk [vmem:[%s2606_s8] sm:$0x3] %vm344_vm0, %v1942_v0 }
  0x2f PF: > { %v2134_v1 = vld [vmem:[%s2601_s3 + $0x8] sm:$0xff]   ;;  %v1943_v2 = vmov 0.0   ;;  %v2141_v3 = vld [vmem:[%s2601_s3 + $0x18] sm:$0xff]   ;;  %v2147_v4 = vld [vmem:[%s2601_s3] sm:$0xff]   ;;  %vm1944_vm1 = vmmov 0   ;;  %v370_v5 = vlaneseq  ;;  %vm388_vm2 = vcmask 261120  }
  0x30   : > { %1611 = vmatprep.subr.bf16.mxu0 %v1943_v2  ;;  %1619 = vmatprep.subr.bf16.mxu1 %v1943_v2  ;;  %v2156_v6 = vld [vmem:[%s2601_s3 + $0x10] sm:$0xff]   ;;  %v1945_v12 = vmov 1983009808   ;;  %s1946_s25 = smov 32   ;;  %v360_v21 = vld [vmem:[%s2602_s4] sm:$0x3]  ;;  %v568_v0 = vstv %s2099_s22 }
  0x31   : > { %1612 = vmatpush3.bf16.msra.mxu0 %v2134_v1  ;;  %1615 = vmatprep.mubr.msk.bf16.mxu0 %vm1944_vm1, %v1943_v2  ;;  %v371_v11 = vshrl.u32 %v370_v5, 7  ;;  %v507_v13 = vunpack.c.l.s4 %v1945_v12  ;;  %v368_v22 = vld [vmem:[%s2113_s15] sm:$0x1]  ;;  %v1547_v24 = vld [vmem:[%s2118_s13 + $0x3] sm:$0x1]  ;;  %s1947_s17 = smov 64  }
  0x32   : > { %1620 = vmatpush3.bf16.msra.mxu1 %v2141_v3  ;;  %1613 = vmatprep.subr.bf16.mxu0 %v1943_v2  ;;  %v369_v25 = vunpack.c.l.bf16 %v368_v22  ;;  %v435_v27 = vunpack.c.l.bf16 %v1547_v24  ;;  %v1948_v55 = vmov 0   ;;  %s570_s29 = sadd.s32 3, %s2105_s24  ;;  %v2221_v5 = vld [vmem:[%s2598_s0] sm:$0x3]  ;;  %s1949_s10 = smov 96   ;;  %vm633_vm6 = vcmask 254976  }
  0x33   : > { %1621 = vmatprep.subr.bf16.mxu1 %v1943_v2  ;;  %1623 = vmatprep.mubr.msk.bf16.mxu1 %vm1944_vm1, %v1943_v2  ;;  %v2161_v7 = vld [vmem:[#allocation2] sm:$0x3]  ;;  %v508_v14 = vunpack.c.0.s8 %v507_v13  ;;  %v2174_v15 = vld [vmem:[#allocation3] sm:$0x3]  ;;  %v372_v20 = vsub.s32 0, %v371_v11  ;;  %v438_v23 = vsub.s32 1, %v371_v11  ;;  %vm569_vm3 = vcmp.gt.s32.totalorder %v2221_v5, %v568_v0 }
  0x34   : > { %v2163_v8 = vld [vmem:[#allocation4] sm:$0x3]  ;;  %v375_v9 = vpack.c.bf16 %v2161_v7, %v2161_v7  ;;  %v2180_v17 = vld [vmem:[#allocation5] sm:$0x3]  ;;  %1754 = vset.pattern.permute.xlu1 %v1948_v55  ;;  %1753 = vset.pattern.permute.xlu0 %v1948_v55  ;;  %s807_s16 = sadd.s32 1, %s2099_s22  ;;  %s810_s21 = sadd.s32 2, %s2105_s24 }
  0x35   : > { %1614 = vmatpush3.bf16.msra.mxu0 %v2147_v4  ;;  %v441_v10 = vpack.c.bf16 %v2163_v8, %v2163_v8  ;;  %v2177_v16 = vsub.s32 %v508_v14, %v371_v11  ;;  %v2204_v26 = vrot.slane %v360_v21, %v372_v20  ;;  %v2206_v28 = vrot.slane %v360_v21, %v438_v23  ;;  %s1050_s18 = sadd.s32 1, %s2105_s24  ;;  %p1576_p4 = scmp.ne.s32.totalorder %s2035_s12, 1 }
  0x36   : > { %1622 = vmatpush3.bf16.msra.mxu1 %v2156_v6  ;;  %1627 = vmatprep.subr.bf16.mxu0 %v1943_v2  ;;  %v573_v11 = vsel %vm569_vm3, 1, %v1948_v55 }
  0x37   : > { %1635 = vmatprep.subr.bf16.mxu1 %v1943_v2  ;;  %v512_v18 = vrot.slane %v2174_v15, %v2177_v16  ;;  %v547_v19 = vrot.slane %v2180_v17, %v2177_v16  ;;  %v374_v29 = vadd.f32 %v2204_v26, %v369_v25  ;;  %v440_v30 = vadd.f32 %v2206_v28, %v435_v27 }
  0x38   : > { %1616 = vmatmul.mubr.msk.bf16.vlgmr.msra.gmra.mxu0 %vm388_vm2, %v375_v9 }
  0x39   : > { %1624 = vmatmul.mubr.msk.bf16.vlgmr.msra.gmra.mxu1 %vm388_vm2, %v441_v10  ;;  %1628 = vmatpush3.bf16.msra.mxu0 %v2134_v1  ;;  %v571_v10 = vstv %s570_s29  ;;  %s1047_s29 = sadd.s32 2, %s2099_s22 }
  0x3a   : > { %1629 = vmatprep.subr.bf16.mxu0 %v1943_v2  ;;  %1636 = vmatpush3.bf16.msra.mxu1 %v2141_v3  ;;  %vm572_vm4 = vcmp.gt.s32.totalorder %v2221_v5, %v571_v10 }
  0x3b   : > { %1631 = vmatprep.mubr.msk.bf16.mxu0 %vm1944_vm1, %v1943_v2  ;;  %1637 = vmatprep.subr.bf16.mxu1 %v1943_v2  ;;  %v603_v13 = vsel %vm572_vm4, 1, %v1948_v55 }
  0x3c   : > { %1639 = vmatprep.mubr.msk.bf16.mxu1 %vm1944_vm1, %v1943_v2  ;;  %513 = vrot.lane.b32.xlu1 %v512_v18, %s1946_s25 }
  0x3d   : > { %1630 = vmatpush3.bf16.msra.mxu0 %v2147_v4 }
  0x3e   : > { %1638 = vmatpush3.bf16.msra.mxu1 %v2156_v6  ;;  %1643 = vmatprep.subr.bf16.mxu0 %v1943_v2 }
  0x3f   : > { %1651 = vmatprep.subr.bf16.mxu1 %v1943_v2 }
  0x40   : > { %548 = vrot.lane.b32.xlu1 %v547_v19, %s1946_s25 }
  0xae   : > { %v514_v56 = vpop.permute.xlu1 %513 }
  0xb2   : > { %v549_v58 = vpop.permute.xlu1 %548 }
  0xf8   : > { %v426_v31 = vpop.f32.mrf.mxu0 }
  0xf9   : > { %v432_v32 = vadd.f32 %v426_v31, %v374_v29  ;;  %v491_v33 = vpop.f32.mrf.mxu1 }
  0xfa   : > { %v497_v34 = vadd.f32 %v491_v33, %v440_v30  ;;  %v1617_v35 = vpop.f32.mrf.mxu0 }
  0xfb   : > { %1759 = vtanh.f32 %v432_v32  ;;  %v1625_v36 = vpop.f32.mrf.mxu1  ;;  %v1551_v43 = vmul.f32 -1.442695, %v432_v32 }
  0xfc   : > { %v429_v37 = vpop.f32.mrf.mxu0  ;;  %1761 = vtanh.f32 %v497_v34  ;;  %v1552_v44 = vmul.f32 -1.442695, %v497_v34 }
  0xfd   : > { %v494_v38 = vpop.f32.mrf.mxu1  ;;  %1763 = vpow2.f32 %v1551_v43  ;;  %v1556_v37 = vld [vmem:[%s2118_s13 + $0x2] sm:$0x1] }
  0xfe   : > { %v1618_v39 = vpop.f32.mrf.mxu0  ;;  %1765 = vpow2.f32 %v1552_v44 }
  0xff   : > { %v1626_v40 = vpop.f32.mrf.mxu1  ;;  %v690_v39 = vunpack.c.l.bf16 %v1556_v37 }
 0x108   : > { %v1760_v41 = vpop.eup %1759 }
 0x109   : > { %518 = vrot.lane.b32.xlu0 %v1760_v41, %s1947_s17  ;;  %v1762_v42 = vpop.eup %1761 }
 0x10a   : > { %v1764_v45 = vpop.eup %1763 }
 0x10b   : > { %v501_v46 = vadd.f32 1.0, %v1764_v45  ;;  %v1766_v47 = vpop.eup %1765 }
 0x10c   : > { %v536_v48 = vadd.f32 1.0, %v1766_v47 }
 0x10d   : > { %553 = vrot.lane.b32.xlu0 %v1762_v42, %s1947_s17  ;;  %1767 = vrcp.f32 %v501_v46  ;;  %v691_v42 = vadd.f32 %v690_v39, %v2206_v28 }
 0x10e   : > { %1769 = vrcp.f32 %v536_v48 }
 0x11a   : > { %v1768_v49 = vpop.eup %1767 }
 0x11b   : > { %v1770_v52 = vpop.eup %1769  ;;  %v516_v57 = vmul.f32 %v1768_v49, %v514_v56 }
 0x11c   : > { %v551_v61 = vmul.f32 %v1770_v52, %v549_v58 }
 0x17b   : > { %v519_v50 = vpop.permute.xlu0 %518 }
 0x17c   : > { %v521_v51 = vmul.f32 %v1768_v49, %v519_v50 }
 0x17e   : > { %523 = vrot.lane.b32.xlu0 %v521_v51, %s1946_s25 }
 0x17f   : > { %v554_v53 = vpop.permute.xlu0 %553 }
 0x180   : > { %v556_v54 = vmul.f32 %v1770_v52, %v554_v53 }
 0x182   : > { %558 = vrot.lane.b32.xlu1 %v556_v54, %s1946_s25 }
 0x1f0   : > { %v524_v59 = vpop.permute.xlu0 %523 }
 0x1f1   : > { %v526_v60 = vadd.f32 %v524_v59, %v516_v57 }
 0x1f3   : > { %1771 = vtanh.f32 %v526_v60  ;;  %v597_v22 = vrot.slane %v526_v60, %v2177_v16 }
 0x1f4   : > { %v559_v62 = vpop.permute.xlu1 %558 }
 0x1f5   : > { %v561_v63 = vadd.f32 %v559_v62, %v551_v61 }
 0x1f7   : > { %1773 = vtanh.f32 %v561_v63  ;;  %v627_v24 = vrot.slane %v561_v63, %v2177_v16 }
 0x200   : > { %v1772_v9 = vpop.eup %1771 }
 0x201   : > { %529 = vrot.lane.b32.xlu0 %v1772_v9, %s1947_s17 }
 0x204   : > { %v1774_v12 = vpop.eup %1773 }
 0x205   : > { %564 = vrot.lane.b32.xlu1 %v1774_v12, %s1947_s17  ;;  %575 = vperm.xlu0 %1753, %v573_v11  }
 0x209   : > { %605 = vperm.xlu1 %1754, %v603_v13  }
 0x273   : > { %v530_v14 = vpop.permute.xlu0 %529 }
 0x274   : > { %v532_v18 = vmul.f32 %v1768_v49, %v530_v14 }
 0x276   : > { %v585_v19 = vrot.slane %v532_v18, %v2177_v16 }
 0x277   : > { %v565_v20 = vpop.permute.xlu1 %564 }
 0x278   : > { %v567_v21 = vmul.f32 %v1770_v52, %v565_v20  ;;  %586 = vrot.lane.b32.xlu1 %v585_v19, %s1946_s25 }
 0x27a   : > { %v615_v23 = vrot.slane %v567_v21, %v2177_v16 }
 0x27c   : > { %598 = vrot.lane.b32.xlu1 %v597_v22, %s1949_s10  ;;  %616 = vrot.lane.b32.xlu0 %v615_v23, %s1946_s25 }
 0x280   : > { %628 = vrot.lane.b32.xlu0 %v627_v24, %s1949_s10  ;;  %v576_v27 = vpop.permute.xlu0 %575 }
 0x281   : > { %vm577_vm5 = vcmp.eq.s32.totalorder %v576_v27, 1 }
 0x284   : > { %v606_v25 = vpop.permute.xlu1 %605 }
 0x285   : > { %vm607_vm7 = vcmp.eq.s32.totalorder %v606_v25, 1  ;;  %v808_v25 = vstv %s807_s16 }
 0x286   : > { %vm809_vm8 = vcmp.gt.s32.totalorder %v2221_v5, %v808_v25 }
 0x2ea   : > { %v587_v29 = vpop.permute.xlu1 %586 }
 0x2eb   : > { %v2239_v30 = vsel %vm577_vm5, %v587_v29, %v2161_v7  ;;  %v2242_v31 = vsel %vm577_vm5, %v587_v29, 0.0  ;;  %v811_v29 = vstv %s810_s21 }
 0x2ec   : > { %634 = vst.msk [vmem:[%s2120_s27] sm:$0x3] %vm633_vm6, %v2242_v31  ;;  %v643_v32 = vpack.c.bf16 %v2239_v30, %v2239_v30  ;;  %vm812_vm9 = vcmp.gt.s32.totalorder %v2221_v5, %v811_v29 }
 0x2ee   : > { %1632 = vmatmul.mubr.msk.bf16.vlgmr.msra.gmra.mxu0 %vm388_vm2, %v643_v32  ;;  %v617_v33 = vpop.permute.xlu0 %616  ;;  %v599_v51 = vpop.permute.xlu1 %598  ;;  %v813_v32 = vsel %vm809_vm8, 1, %v1948_v55 }
 0x2ef   : > { %v2252_v34 = vsel %vm607_vm7, %v617_v33, %v2163_v8  ;;  %v2255_v7 = vsel %vm607_vm7, %v617_v33, 0.0  ;;  %1644 = vmatpush3.bf16.msra.mxu0 %v2134_v1  ;;  %1647 = vmatprep.mubr.msk.bf16.mxu0 %vm1944_vm1, %v1943_v2  ;;  %v1554_v8 = vld [vmem:[%s2113_s15 + $0x1] sm:$0x1]  ;;  %v2281_v53 = vsel %vm577_vm5, %v599_v51, %v2174_v15 }
 0x2f0   : > { %1553 = vst.msk [vmem:[%s2122_s20 + $0x6] sm:$0x3] %vm633_vm6, %v2255_v7  ;;  %v692_v35 = vpack.c.bf16 %v2252_v34, %v2252_v34  ;;  %1645 = vmatprep.subr.bf16.mxu0 %v1943_v2  ;;  %v641_v36 = vunpack.c.l.bf16 %v1554_v8  ;;  %v751_v56 = vrot.slane %v2281_v53, %v2177_v16 }
 0x2f2   : > { %1640 = vmatmul.mubr.msk.bf16.vlgmr.msra.gmra.mxu1 %vm388_vm2, %v692_v35  ;;  %v642_v38 = vadd.f32 %v641_v36, %v2204_v26  ;;  %v629_v54 = vpop.permute.xlu0 %628  ;;  %v843_v35 = vsel %vm812_vm9, 1, %v1948_v55 }
 0x2f3   : > { %1652 = vmatpush3.bf16.msra.mxu1 %v2141_v3  ;;  %1646 = vmatpush3.bf16.msra.mxu0 %v2147_v4  ;;  %v2288_v58 = vsel %vm607_vm7, %v629_v54, %v2180_v17 }
 0x2f4   : > { %1653 = vmatprep.subr.bf16.mxu1 %v1943_v2  ;;  %1655 = vmatprep.mubr.msk.bf16.mxu1 %vm1944_vm1, %v1943_v2  ;;  %v786_v59 = vrot.slane %v2288_v58, %v2177_v16 }
 0x2f5   : > { %1659 = vmatprep.subr.bf16.mxu0 %v1943_v2 }
 0x2f7   : > { %1654 = vmatpush3.bf16.msra.mxu1 %v2156_v6 }
 0x2f8   : > { %1667 = vmatprep.subr.bf16.mxu1 %v1943_v2 }
 0x3ae   : > { %v681_v40 = vpop.f32.mrf.mxu0 }
 0x3af   : > { %v687_v41 = vadd.f32 %v681_v40, %v642_v38 }
 0x3b0   : > { %v1633_v43 = vpop.f32.mrf.mxu0 }
 0x3b1   : > { %1775 = vtanh.f32 %v687_v41  ;;  %v1558_v15 = vmul.f32 -1.442695, %v687_v41 }
 0x3b2   : > { %v684_v44 = vpop.f32.mrf.mxu0  ;;  %v730_v45 = vpop.f32.mrf.mxu1 }
 0x3b3   : > { %v736_v46 = vadd.f32 %v730_v45, %v691_v42 }
 0x3b4   : > { %v1634_v47 = vpop.f32.mrf.mxu0  ;;  %v1641_v48 = vpop.f32.mrf.mxu1 }
 0x3b5   : > { %1777 = vtanh.f32 %v736_v46  ;;  %v1559_v60 = vmul.f32 -1.442695, %v736_v46 }
 0x3b6   : > { %v733_v49 = vpop.f32.mrf.mxu1  ;;  %1779 = vpow2.f32 %v1558_v15 }
 0x3b7   : > { %1781 = vpow2.f32 %v1559_v60 }
 0x3b8   : > { %v1642_v50 = vpop.f32.mrf.mxu1 }
 0x3be   : > { %v1776_v52 = vpop.eup %1775 }
 0x3bf   : > { %757 = vrot.lane.b32.xlu1 %v1776_v52, %s1947_s17  ;;  %v1564_v52 = vld [vmem:[%s2118_s13 + $0x1] sm:$0x1] }
 0x3c2   : > { %v1778_v57 = vpop.eup %1777 }
 0x3c3   : > { %752 = vrot.lane.b32.xlu1 %v751_v56, %s1946_s25  ;;  %792 = vrot.lane.b32.xlu0 %v1778_v57, %s1947_s17  ;;  %v1780_v61 = vpop.eup %1779  ;;  %v930_v56 = vunpack.c.l.bf16 %v1564_v52 }
 0x3c4   : > { %v740_v62 = vadd.f32 1.0, %v1780_v61  ;;  %v1782_v63 = vpop.eup %1781 }
 0x3c5   : > { %v775_v0 = vadd.f32 1.0, %v1782_v63  ;;  %v931_v15 = vadd.f32 %v930_v56, %v2206_v28 }
 0x3c6   : > { %1783 = vrcp.f32 %v740_v62 }
 0x3c7   : > { %787 = vrot.lane.b32.xlu0 %v786_v59, %s1946_s25  ;;  %1785 = vrcp.f32 %v775_v0 }
 0x3d3   : > { %v1784_v17 = vpop.eup %1783 }
 0x3d4   : > { %v1786_v11 = vpop.eup %1785 }
 0x431   : > { %v758_v9 = vpop.permute.xlu1 %757 }
 0x432   : > { %v760_v10 = vmul.f32 %v1784_v17, %v758_v9 }
 0x434   : > { %762 = vrot.lane.b32.xlu1 %v760_v10, %s1946_s25 }
 0x435   : > { %v793_v12 = vpop.permute.xlu0 %792  ;;  %v753_v14 = vpop.permute.xlu1 %752 }
 0x436   : > { %v795_v13 = vmul.f32 %v1786_v11, %v793_v12  ;;  %v755_v18 = vmul.f32 %v1784_v17, %v753_v14 }
 0x438   : > { %797 = vrot.lane.b32.xlu0 %v795_v13, %s1946_s25 }
 0x439   : > { %v788_v19 = vpop.permute.xlu0 %787 }
 0x43a   : > { %v790_v22 = vmul.f32 %v1786_v11, %v788_v19 }
 0x4a6   : > { %v763_v20 = vpop.permute.xlu1 %762 }
 0x4a7   : > { %v765_v21 = vadd.f32 %v763_v20, %v755_v18 }
 0x4a9   : > { %1787 = vtanh.f32 %v765_v21  ;;  %v837_v40 = vrot.slane %v765_v21, %v2177_v16 }
 0x4aa   : > { %v798_v23 = vpop.permute.xlu0 %797 }
 0x4ab   : > { %v800_v24 = vadd.f32 %v798_v23, %v790_v22 }
 0x4ad   : > { %1789 = vtanh.f32 %v800_v24  ;;  %v867_v42 = vrot.slane %v800_v24, %v2177_v16 }
 0x4b6   : > { %v1788_v27 = vpop.eup %1787 }
 0x4b7   : > { %768 = vrot.lane.b32.xlu1 %v1788_v27, %s1947_s17 }
 0x4ba   : > { %v1790_v33 = vpop.eup %1789 }
 0x4bb   : > { %815 = vperm.xlu1 %1754, %v813_v32   ;;  %803 = vrot.lane.b32.xlu0 %v1790_v33, %s1947_s17 }
 0x4bf   : > { %845 = vperm.xlu0 %1753, %v843_v35  }
 0x529   : > { %v769_v8 = vpop.permute.xlu1 %768 }
 0x52a   : > { %v771_v36 = vmul.f32 %v1784_v17, %v769_v8 }
 0x52c   : > { %v825_v37 = vrot.slane %v771_v36, %v2177_v16 }
 0x52d   : > { %v804_v38 = vpop.permute.xlu0 %803 }
 0x52e   : > { %v806_v39 = vmul.f32 %v1786_v11, %v804_v38  ;;  %826 = vrot.lane.b32.xlu1 %v825_v37, %s1946_s25 }
 0x530   : > { %v855_v41 = vrot.slane %v806_v39, %v2177_v16 }
 0x532   : > { %838 = vrot.lane.b32.xlu1 %v837_v40, %s1949_s10  ;;  %856 = vrot.lane.b32.xlu0 %v855_v41, %s1946_s25  ;;  %v1048_v40 = vstv %s1047_s29 }
 0x533   : > { %vm1049_vm12 = vcmp.gt.s32.totalorder %v2221_v5, %v1048_v40 }
 0x536   : > { %868 = vrot.lane.b32.xlu0 %v867_v42, %s1949_s10  ;;  %v816_v43 = vpop.permute.xlu1 %815  ;;  %v1051_v42 = vstv %s1050_s18 }
 0x537   : > { %vm817_vm10 = vcmp.eq.s32.totalorder %v816_v43, 1  ;;  %v1053_v43 = vsel %vm1049_vm12, 1, %v1948_v55  ;;  %vm1052_vm13 = vcmp.gt.s32.totalorder %v2221_v5, %v1051_v42 }
 0x53a   : > { %v846_v44 = vpop.permute.xlu0 %845 }
 0x53b   : > { %vm847_vm11 = vcmp.eq.s32.totalorder %v846_v44, 1 }
 0x5a0   : > { %v827_v45 = vpop.permute.xlu1 %826 }
 0x5a1   : > { %v2315_v46 = vsel %vm817_vm10, %v827_v45, %v2239_v30  ;;  %v2318_v47 = vsel %vm817_vm10, %v827_v45, 0.0  ;;  %v1083_v45 = vsel %vm1052_vm13, 1, %v1948_v55 }
 0x5a2   : > { %1560 = vst.msk [vmem:[%s2120_s27 + $0x2] sm:$0x3] %vm633_vm6, %v2318_v47  ;;  %v883_v48 = vpack.c.bf16 %v2315_v46, %v2315_v46 }
 0x5a4   : > { %1648 = vmatmul.mubr.msk.bf16.vlgmr.msra.gmra.mxu0 %vm388_vm2, %v883_v48  ;;  %v857_v49 = vpop.permute.xlu0 %856  ;;  %v839_v0 = vpop.permute.xlu1 %838 }
 0x5a5   : > { %v2328_v50 = vsel %vm847_vm11, %v857_v49, %v2252_v34  ;;  %v2331_v30 = vsel %vm847_vm11, %v857_v49, 0.0  ;;  %1660 = vmatpush3.bf16.msra.mxu0 %v2134_v1  ;;  %1663 = vmatprep.mubr.msk.bf16.mxu0 %vm1944_vm1, %v1943_v2  ;;  %v1562_v1 = vld [vmem:[%s2113_s15 + $0x2] sm:$0x1]  ;;  %v2355_v9 = vsel %vm817_vm10, %v839_v0, %v2281_v53  ;;  %v1168_v0 = vld [vmem:[%s2118_s13] sm:$0x1]  ;;  %s1286_s13 = sadd.s32 3, %s2099_s22 }
 0x5a6   : > { %1561 = vst.msk [vmem:[%s2122_s20 + $0x4] sm:$0x3] %vm633_vm6, %v2331_v30  ;;  %v932_v51 = vpack.c.bf16 %v2328_v50, %v2328_v50  ;;  %1661 = vmatprep.subr.bf16.mxu0 %v1943_v2  ;;  %v881_v34 = vunpack.c.l.bf16 %v1562_v1  ;;  %v991_v11 = vrot.slane %v2355_v9, %v2177_v16 }
 0x5a8   : > { %1656 = vmatmul.mubr.msk.bf16.vlgmr.msra.gmra.mxu1 %vm388_vm2, %v932_v51  ;;  %v882_v54 = vadd.f32 %v881_v34, %v2204_v26  ;;  %v869_v10 = vpop.permute.xlu0 %868 }
 0x5a9   : > { %1668 = vmatpush3.bf16.msra.mxu1 %v2141_v3  ;;  %1662 = vmatpush3.bf16.msra.mxu0 %v2147_v4  ;;  %v2362_v13 = vsel %vm847_vm11, %v869_v10, %v2288_v58  ;;  %v1169_v10 = vunpack.c.l.bf16 %v1168_v0 }
 0x5aa   : > { %1669 = vmatprep.subr.bf16.mxu1 %v1943_v2  ;;  %1671 = vmatprep.mubr.msk.bf16.mxu1 %vm1944_vm1, %v1943_v2  ;;  %v1026_v14 = vrot.slane %v2362_v13, %v2177_v16 }
 0x5ad   : > { %1670 = vmatpush3.bf16.msra.mxu1 %v2156_v6 }
 0x664   : > { %v921_v57 = vpop.f32.mrf.mxu0 }
 0x665   : > { %v927_v59 = vadd.f32 %v921_v57, %v882_v54 }
 0x666   : > { %v1649_v3 = vpop.f32.mrf.mxu0 }
 0x667   : > { %1791 = vtanh.f32 %v927_v59  ;;  %v1566_v53 = vmul.f32 -1.442695, %v927_v59  ;;  %v877_v59 = vadd.f32 %v2318_v47, %v2242_v31  ;;  %v878_v31 = vadd.f32 %v2331_v30, %v2255_v7  ;;  %v1570_v7 = vld [vmem:[%s2113_s15 + $0x3] sm:$0x1] }
 0x668   : > { %v924_v4 = vpop.f32.mrf.mxu0  ;;  %v970_v60 = vpop.f32.mrf.mxu1  ;;  %v1121_v30 = vunpack.c.l.bf16 %v1570_v7 }
 0x669   : > { %v976_v61 = vadd.f32 %v970_v60, %v931_v15 }
 0x66a   : > { %v1650_v62 = vpop.f32.mrf.mxu0  ;;  %v1657_v63 = vpop.f32.mrf.mxu1 }
 0x66b   : > { %1793 = vtanh.f32 %v976_v61  ;;  %v1567_v18 = vmul.f32 -1.442695, %v976_v61 }
 0x66c   : > { %v973_v2 = vpop.f32.mrf.mxu1  ;;  %1795 = vpow2.f32 %v1566_v53 }
 0x66d   : > { %1797 = vpow2.f32 %v1567_v18 }
 0x66e   : > { %v1658_v6 = vpop.f32.mrf.mxu1 }
 0x674   : > { %v1792_v17 = vpop.eup %1791 }
 0x675   : > { %997 = vrot.lane.b32.xlu1 %v1792_v17, %s1947_s17  ;;  %v1122_v17 = vadd.f32 %v1121_v30, %v2204_v26 }
 0x678   : > { %v1794_v12 = vpop.eup %1793 }
 0x679   : > { %992 = vrot.lane.b32.xlu1 %v991_v11, %s1946_s25  ;;  %1032 = vrot.lane.b32.xlu0 %v1794_v12, %s1947_s17  ;;  %v1796_v19 = vpop.eup %1795  ;;  %v1170_v12 = vadd.f32 %v1169_v10, %v2206_v28 }
 0x67a   : > { %v980_v20 = vadd.f32 1.0, %v1796_v19  ;;  %v1798_v21 = vpop.eup %1797 }
 0x67b   : > { %v1015_v22 = vadd.f32 1.0, %v1798_v21 }
 0x67c   : > { %1799 = vrcp.f32 %v980_v20 }
 0x67d   : > { %1027 = vrot.lane.b32.xlu0 %v1026_v14, %s1946_s25  ;;  %1801 = vrcp.f32 %v1015_v22 }
 0x689   : > { %v1800_v58 = vpop.eup %1799 }
 0x68a   : > { %v1802_v25 = vpop.eup %1801 }
 0x6e7   : > { %v998_v23 = vpop.permute.xlu1 %997 }
 0x6e8   : > { %v1000_v24 = vmul.f32 %v1800_v58, %v998_v23 }
 0x6ea   : > { %1002 = vrot.lane.b32.xlu1 %v1000_v24, %s1946_s25 }
 0x6eb   : > { %v1033_v27 = vpop.permute.xlu0 %1032  ;;  %v993_v32 = vpop.permute.xlu1 %992 }
 0x6ec   : > { %v1035_v29 = vmul.f32 %v1802_v25, %v1033_v27  ;;  %v995_v33 = vmul.f32 %v1800_v58, %v993_v32 }
 0x6ee   : > { %1037 = vrot.lane.b32.xlu0 %v1035_v29, %s1946_s25 }
 0x6ef   : > { %v1028_v35 = vpop.permute.xlu0 %1027 }
 0x6f0   : > { %v1030_v37 = vmul.f32 %v1802_v25, %v1028_v35 }
 0x75c   : > { %v1003_v8 = vpop.permute.xlu1 %1002 }
 0x75d   : > { %v1005_v36 = vadd.f32 %v1003_v8, %v995_v33 }
 0x75f   : > { %1803 = vtanh.f32 %v1005_v36  ;;  %v1077_v52 = vrot.slane %v1005_v36, %v2177_v16 }
 0x760   : > { %v1038_v38 = vpop.permute.xlu0 %1037 }
 0x761   : > { %v1040_v39 = vadd.f32 %v1038_v38, %v1030_v37 }
 0x763   : > { %1805 = vtanh.f32 %v1040_v39  ;;  %v1107_v56 = vrot.slane %v1040_v39, %v2177_v16 }
 0x76c   : > { %v1804_v41 = vpop.eup %1803 }
 0x76d   : > { %1008 = vrot.lane.b32.xlu1 %v1804_v41, %s1947_s17 }
 0x770   : > { %v1806_v44 = vpop.eup %1805 }
 0x771   : > { %1055 = vperm.xlu1 %1754, %v1053_v43   ;;  %1043 = vrot.lane.b32.xlu0 %v1806_v44, %s1947_s17 }
 0x775   : > { %1085 = vperm.xlu0 %1753, %v1083_v45  }
 0x7df   : > { %v1009_v48 = vpop.permute.xlu1 %1008 }
 0x7e0   : > { %v1011_v49 = vmul.f32 %v1800_v58, %v1009_v48 }
 0x7e2   : > { %v1065_v51 = vrot.slane %v1011_v49, %v2177_v16 }
 0x7e3   : > { %v1044_v1 = vpop.permute.xlu0 %1043 }
 0x7e4   : > { %v1046_v34 = vmul.f32 %v1802_v25, %v1044_v1  ;;  %1066 = vrot.lane.b32.xlu1 %v1065_v51, %s1946_s25 }
 0x7e6   : > { %v1095_v54 = vrot.slane %v1046_v34, %v2177_v16 }
 0x7e8   : > { %1078 = vrot.lane.b32.xlu1 %v1077_v52, %s1949_s10  ;;  %1096 = vrot.lane.b32.xlu0 %v1095_v54, %s1946_s25  ;;  %v1287_v52 = vstv %s1286_s13 }
 0x7e9   : > { %vm1288_vm0 = vcmp.gt.s32.totalorder %v2221_v5, %v1287_v52 }
 0x7ec   : > { %1108 = vrot.lane.b32.xlu0 %v1107_v56, %s1949_s10  ;;  %v1056_v57 = vpop.permute.xlu1 %1055  ;;  %v1289_v56 = vstv %s2105_s24 }
 0x7ed   : > { %vm1057_vm14 = vcmp.eq.s32.totalorder %v1056_v57, 1  ;;  %v1291_v57 = vsel %vm1288_vm0, 1, %v1948_v55  ;;  %vm1290_vm1 = vcmp.gt.s32.totalorder %v2221_v5, %v1289_v56 }
 0x7f0   : > { %v1086_v15 = vpop.permute.xlu0 %1085 }
 0x7f1   : > { %vm1087_vm15 = vcmp.eq.s32.totalorder %v1086_v15, 1  ;;  %v1321_v15 = vsel %vm1290_vm1, 1, %v1948_v55 }
 0x856   : > { %v1067_v3 = vpop.permute.xlu1 %1066 }
 0x857   : > { %v2391_v4 = vsel %vm1057_vm14, %v1067_v3, %v2315_v46  ;;  %v1082_v60 = vsel %vm1057_vm14, %v1067_v3, 0.0 }
 0x858   : > { %1568 = vst.msk [vmem:[%s2120_s27 + $0x4] sm:$0x3] %vm633_vm6, %v1082_v60  ;;  %v2396_v61 = vadd.f32 %v1082_v60, %v877_v59  ;;  %v1123_v62 = vpack.c.bf16 %v2391_v4, %v2391_v4 }
 0x85a   : > { %1664 = vmatmul.mubr.msk.bf16.vlgmr.msra.gmra.mxu0 %vm388_vm2, %v1123_v62  ;;  %v1097_v47 = vpop.permute.xlu0 %1096  ;;  %v1079_v23 = vpop.permute.xlu1 %1078 }
 0x85b   : > { %v2405_v46 = vsel %vm1087_vm15, %v1097_v47, %v2328_v50  ;;  %v1112_v63 = vsel %vm1087_vm15, %v1097_v47, 0.0  ;;  %v2421_v26 = vsel %vm1057_vm14, %v1079_v23, %v2355_v9 }
 0x85c   : > { %1569 = vst.msk [vmem:[%s2122_s20 + $0x2] sm:$0x3] %vm633_vm6, %v1112_v63  ;;  %v2410_v2 = vadd.f32 %v1112_v63, %v878_v31  ;;  %v1171_v6 = vpack.c.bf16 %v2405_v46, %v2405_v46  ;;  %v1230_v28 = vrot.slane %v2421_v26, %v2177_v16 }
 0x85e   : > { %1672 = vmatmul.mubr.msk.bf16.vlgmr.msra.gmra.mxu1 %vm388_vm2, %v1171_v6  ;;  %v1109_v25 = vpop.permute.xlu0 %1108 }
 0x85f   : > { %v2428_v29 = vsel %vm1087_vm15, %v1109_v25, %v2362_v13 }
 0x860   : > { %v1265_v32 = vrot.slane %v2428_v29, %v2177_v16 }
 0x91a   : > { %v1161_v11 = vpop.f32.mrf.mxu0 }
 0x91b   : > { %v1167_v50 = vadd.f32 %v1161_v11, %v1122_v17  ;;  %v1360_v17 = vld [vmem:[%s2605_s7] sm:$0x3] }
 0x91c   : > { %v1665_v14 = vpop.f32.mrf.mxu0 }
 0x91d   : > { %1807 = vtanh.f32 %v1167_v50  ;;  %v1573_v9 = vmul.f32 -1.442695, %v1167_v50 }
 0x91e   : > { %v1164_v53 = vpop.f32.mrf.mxu0  ;;  %v1209_v18 = vpop.f32.mrf.mxu1 }
 0x91f   : > { %v1215_v19 = vadd.f32 %v1209_v18, %v1170_v12  ;;  %v1363_v18 = vld [vmem:[%s2606_s8] sm:$0x3] }
 0x920   : > { %v1666_v20 = vpop.f32.mrf.mxu0  ;;  %v1673_v21 = vpop.f32.mrf.mxu1 }
 0x921   : > { %1809 = vtanh.f32 %v1215_v19  ;;  %v1574_v33 = vmul.f32 -1.442695, %v1215_v19 }
 0x922   : > { %v1212_v22 = vpop.f32.mrf.mxu1  ;;  %1811 = vpow2.f32 %v1573_v9 }
 0x923   : > { %1813 = vpow2.f32 %v1574_v33 }
 0x924   : > { %v1674_v58 = vpop.f32.mrf.mxu1 }
 0x92a   : > { %v1808_v24 = vpop.eup %1807 }
 0x92b   : > { %1236 = vrot.lane.b32.xlu1 %v1808_v24, %s1947_s17 }
 0x92e   : > { %v1810_v27 = vpop.eup %1809 }
 0x92f   : > { %1231 = vrot.lane.b32.xlu1 %v1230_v28, %s1946_s25  ;;  %1271 = vrot.lane.b32.xlu0 %v1810_v27, %s1947_s17  ;;  %v1812_v35 = vpop.eup %1811 }
 0x930   : > { %v1219_v8 = vadd.f32 1.0, %v1812_v35  ;;  %v1814_v36 = vpop.eup %1813 }
 0x931   : > { %v1254_v37 = vadd.f32 1.0, %v1814_v36 }
 0x932   : > { %1815 = vrcp.f32 %v1219_v8 }
 0x933   : > { %1266 = vrot.lane.b32.xlu0 %v1265_v32, %s1946_s25  ;;  %1817 = vrcp.f32 %v1254_v37 }
 0x93f   : > { %v1816_v13 = vpop.eup %1815 }
 0x940   : > { %v1818_v40 = vpop.eup %1817 }
 0x99d   : > { %v1237_v38 = vpop.permute.xlu1 %1236 }
 0x99e   : > { %v1239_v39 = vmul.f32 %v1816_v13, %v1237_v38 }
 0x9a0   : > { %1241 = vrot.lane.b32.xlu1 %v1239_v39, %s1946_s25 }
 0x9a1   : > { %v1272_v41 = vpop.permute.xlu0 %1271  ;;  %v1232_v43 = vpop.permute.xlu1 %1231 }
 0x9a2   : > { %v1274_v42 = vmul.f32 %v1818_v40, %v1272_v41  ;;  %v1234_v44 = vmul.f32 %v1816_v13, %v1232_v43 }
 0x9a4   : > { %1276 = vrot.lane.b32.xlu0 %v1274_v42, %s1946_s25 }
 0x9a5   : > { %v1267_v45 = vpop.permute.xlu0 %1266 }
 0x9a6   : > { %v1269_v51 = vmul.f32 %v1818_v40, %v1267_v45 }
 0xa12   : > { %v1242_v48 = vpop.permute.xlu1 %1241 }
 0xa13   : > { %v1244_v49 = vadd.f32 %v1242_v48, %v1234_v44 }
 0xa15   : > { %1819 = vtanh.f32 %v1244_v49  ;;  %v1315_v63 = vrot.slane %v1244_v49, %v2177_v16 }
 0xa16   : > { %v1277_v1 = vpop.permute.xlu0 %1276 }
 0xa17   : > { %v1279_v34 = vadd.f32 %v1277_v1, %v1269_v51 }
 0xa19   : > { %1821 = vtanh.f32 %v1279_v34  ;;  %v1345_v55 = vrot.slane %v1279_v34, %v2177_v16 }
 0xa22   : > { %v1820_v54 = vpop.eup %1819 }
 0xa23   : > { %1247 = vrot.lane.b32.xlu1 %v1820_v54, %s1947_s17 }
 0xa26   : > { %v1822_v59 = vpop.eup %1821 }
 0xa27   : > { %1293 = vperm.xlu1 %1754, %v1291_v57   ;;  %1282 = vrot.lane.b32.xlu0 %v1822_v59, %s1947_s17 }
 0xa2b   : > { %1323 = vperm.xlu0 %1753, %v1321_v15  }
 0xa95   : > { %v1248_v3 = vpop.permute.xlu1 %1247 }
 0xa96   : > { %v1250_v60 = vmul.f32 %v1816_v13, %v1248_v3 }
 0xa98   : > { %v1303_v62 = vrot.slane %v1250_v60, %v2177_v16 }
 0xa99   : > { %v1283_v31 = vpop.permute.xlu0 %1282 }
 0xa9a   : > { %v1285_v47 = vmul.f32 %v1818_v40, %v1283_v31  ;;  %1304 = vrot.lane.b32.xlu1 %v1303_v62, %s1946_s25 }
 0xa9c   : > { %v1333_v6 = vrot.slane %v1285_v47, %v2177_v16 }
 0xa9e   : > { %1316 = vrot.lane.b32.xlu1 %v1315_v63, %s1949_s10  ;;  %1334 = vrot.lane.b32.xlu0 %v1333_v6, %s1946_s25 }
 0xaa2   : > { %1346 = vrot.lane.b32.xlu0 %v1345_v55, %s1949_s10  ;;  %v1294_v7 = vpop.permute.xlu1 %1293 }
 0xaa3   : > { %vm1295_vm2 = vcmp.eq.s32.totalorder %v1294_v7, 1 }
 0xaa6   : > { %v1324_v30 = vpop.permute.xlu0 %1323 }
 0xaa7   : > { %vm1325_vm3 = vcmp.eq.s32.totalorder %v1324_v30, 1 }
 0xb0c   : > { %v1305_v0 = vpop.permute.xlu1 %1304 }
 0xb0d   : > { %v1307_v10 = vsel %vm1295_vm2, %v1305_v0, %v2391_v4  ;;  %v1320_v11 = vsel %vm1295_vm2, %v1305_v0, 0.0 }
 0xb0e   : > { %1575 = vst.msk [vmem:[%s2120_s27 + $0x6] sm:$0x3] %vm633_vm6, %v1320_v11  ;;  %v1354_v50 = vadd.f32 %v1320_v11, %v2396_v61  ;;  %1356 = vst.msk [vmem:[#allocation2] sm:$0x3] %vm633_vm6, %v1307_v10 }
 0xb10   : > { %v1361_v16 = vadd.f32 %v1360_v17, %v1354_v50  ;;  %v1317_v12 = vpop.permute.xlu1 %1316  ;;  %v1335_v14 = vpop.permute.xlu0 %1334 }
 0xb11   : > { %v1319_v53 = vsel %vm1295_vm2, %v1317_v12, %v2421_v26  ;;  %v1337_v19 = vsel %vm1325_vm3, %v1335_v14, %v2405_v46  ;;  %v1350_v4 = vsel %vm1325_vm3, %v1335_v14, 0.0 }
 0xb12   : > { %1362 = vst.msk [vmem:[%s2605_s7] sm:$0x3] %vm633_vm6, %v1361_v16  ;;  %1357 = vst.msk [vmem:[#allocation3] sm:$0x3] %vm633_vm6, %v1319_v53  ;;  %v1355_v61 = vadd.f32 %v1350_v4, %v2410_v2  ;;  %1369 = sbr.rel (%p1576_p4) target bundleno = 2984 (0xba8), region = 48 }
 0xb13   : > { %1353 = vst.msk [vmem:[%s2122_s20] sm:$0x3] %vm633_vm6, %v1350_v4  ;;  %1358 = vst.msk [vmem:[#allocation4] sm:$0x3] %vm633_vm6, %v1337_v19 }
 0xb14   : > { %v1364_v20 = vadd.f32 %v1363_v18, %v1355_v61  ;;  %v1347_v21 = vpop.permute.xlu0 %1346 }
 0xb15   : > { %v1349_v22 = vsel %vm1325_vm3, %v1347_v21, %v2428_v29 }
 0xb16   : > { %1365 = vst.msk [vmem:[%s2606_s8] sm:$0x3] %vm633_vm6, %v1364_v20  ;;  %1359 = vst.msk [vmem:[#allocation5] sm:$0x3] %vm633_vm6, %v1349_v22 }
 0xb17   : > { %v1370_v46 = vcvt.s32.f32 %v2221_v5  ;;  %v1950_v58 = vmov 0  }
 0xb18   : > { %1823 = vset.pattern.permute.xlu0 %v1950_v58 }
 0xb19   : > { %v1371_v2 = vmax.f32 %v1370_v46, 1.0  ;;  %v1374_v24 = vld [vmem:[%s2605_s7] sm:$0x3] }
 0xb1b   : > { %1824 = vrcp.f32 %v1371_v2 }
 0xb1d   : > { %v1382_v26 = vld [vmem:[%s2606_s8] sm:$0x3] }
 0xb28   : > { %v1825_v23 = vpop.eup %1824 }
 0xb29   : > { %1377 = vperm.xlu0 %1823, %v1825_v23  }
 0xba4   : > { %v1378_v25 = vpop.permute.xlu0 %1377 }
 0xba5   : > { %v1380_v28 = vmul.f32 %v1378_v25, %v1374_v24  ;;  %v1383_v27 = vmul.f32 %v1382_v26, %v1378_v25 }
 0xba7   : > { %1381 = vst.msk [vmem:[%s2605_s7] sm:$0x3] %vm633_vm6, %v1380_v28  ;;  %1384 = vst.msk [vmem:[%s2606_s8] sm:$0x3] %vm633_vm6, %v1383_v27 }
 0xba8 PF: > { %s1585_s10 = sshll.u32 %s2035_s12, 7  ;;  %s1404_s18 = sshll.u32 %s2120_s27, 4  ;;  %s2504_s18 = int_to_ptr.vmem [resolvable:$true] %s1404_s18 }
 0xba9   : > { %s2501_s29 = scalar_lea.hbm %s2603_s5, %s1585_s10  ;;  %s2629_s13 = sand.u32 1, %s1932_s9  }
 0xbaa   : > { %s2508_s15 = scalar_lea.sflag [#allocation7], %s2629_s13  ;;  %s1826_s22 = scalar_lea.vmem %s2504_s18, 128 }
 0xbab   : > { %p1827_p7 = scmp.ne.s32.totalorder %s2504_s18, %s1826_s22  ;;  %s1951_s24 = smov [#allocation6]  }
 0xbac   : > { %s1830_s17 = sshll.u32 %s1951_s24, 4  ;;  %s1831_s17 = int_to_ptr.vmem [resolvable:$false] %s1830_s17 }
 0xbad   : > { %p1828_p8 = pnand %p1827_p7, %p2058_p5  ;;  %s1832_s14 = scalar_lea.vmem %s1831_s17, 256 }
 0xbae   : > { %p1833_p10 = scmp.lt.s32.totalorder %s2504_s18, %s1831_s17  ;;  %p1834_p13 = scmp.lt.s32.totalorder %s1832_s14, %s1826_s22 }
 0xbaf   : > { %p1829_p9 = pneg %p1828_p8 }
 0xbb0   : > { %p1835_p0 = por %p1834_p13, %p1833_p10 }
 0xbb2   : > { %p1836_p1 = pnand %p1835_p0, %p1829_p9 }
 0xbb4   : > { %1839 = shalt.err (!%p1836_p1)
}
 0xbb5   : > { %s1840_s27 = scalar_lea.hbm %s2501_s29, 128  ;;  %s1844_s21 = scalar_lea.hbm %s2603_s5, 256 }
 0xbb6   : > { %p1841_p2 = scmp.ne.s32.totalorder %s2501_s29, %s1840_s27  ;;  %p1845_p7 = scmp.lt.s32.totalorder %s2501_s29, %s2603_s5 }
 0xbb7   : > { %p1846_p8 = scmp.lt.s32.totalorder %s1844_s21, %s1840_s27 }
 0xbb8   : > { %p1842_p3 = pnand %p1841_p2, %p2058_p5 }
 0xbb9   : > { %p1847_p9 = por %p1846_p8, %p1845_p7 }
 0xbba   : > { %p1843_p4 = pneg %p1842_p3 }
 0xbbc   : > { %p1848_p10 = pnand %p1847_p9, %p1843_p4 }
 0xbbe   : > { %1851 = shalt.err (!%p1848_p10)
}
 0xbbf   : > { %s1952_s22 = smov 2   ;;  %s1586_s17 = sshll.u32 %s329_s23, 7 }
 0xbc0   : > { %1675 = dma.vmem_to_hbm [thread:$0]  (%p2058_p5), %s2504_s18, 128, %s2501_s29, %s2508_s15, %s1946_s25, %s1946_s25, %s1952_s22  }
 0xbc1   : > { %s2539_s10 = scalar_lea.hbm %s2604_s6, %s1586_s17  ;;  %s1421_s16 = sshll.u32 %s2122_s20, 4  ;;  %s2542_s16 = int_to_ptr.vmem [resolvable:$true] %s1421_s16 }
 0xbc2   : > { %s2630_s19 = sand.u32 1, %s1920_s28   ;;  %s1852_s13 = scalar_lea.vmem %s2542_s16, 128 }
 0xbc3   : > { %s1391_s21 = scalar_lea.sflag [#allocation9], %s2630_s19  ;;  %p1853_p13 = scmp.ne.s32.totalorder %s2542_s16, %s1852_s13 }
 0xbc4   : > { %s1953_s12 = smov [#allocation8]  }
 0xbc5   : > { %p1854_p0 = pnand %p1853_p13, %p2081_p11  ;;  %s1856_s23 = sshll.u32 %s1953_s12, 4  ;;  %s1857_s23 = int_to_ptr.vmem [resolvable:$false] %s1856_s23 }
 0xbc6   : > { %s1858_s29 = scalar_lea.vmem %s1857_s23, 256  ;;  %p1859_p1 = scmp.lt.s32.totalorder %s2542_s16, %s1857_s23 }
 0xbc7   : > { %p1855_p5 = pneg %p1854_p0  ;;  %p1860_p2 = scmp.lt.s32.totalorder %s1858_s29, %s1852_s13 }
 0xbc9   : > { %p1861_p3 = por %p1860_p2, %p1859_p1 }
 0xbcb   : > { %p1862_p4 = pnand %p1861_p3, %p1855_p5 }
 0xbcd   : > { %1865 = shalt.err (!%p1862_p4)
}
 0xbce   : > { %s1866_s20 = scalar_lea.hbm %s2539_s10, 128  ;;  %s1870_s24 = scalar_lea.hbm %s2604_s6, 256 }
 0xbcf   : > { %p1867_p7 = scmp.ne.s32.totalorder %s2539_s10, %s1866_s20  ;;  %p1871_p10 = scmp.lt.s32.totalorder %s2539_s10, %s2604_s6 }
 0xbd0   : > { %p1872_p13 = scmp.lt.s32.totalorder %s1870_s24, %s1866_s20 }
 0xbd1   : > { %p1868_p8 = pnand %p1867_p7, %p2081_p11 }
 0xbd2   : > { %p1873_p0 = por %p1872_p13, %p1871_p10 }
 0xbd3   : > { %p1869_p9 = pneg %p1868_p8 }
 0xbd5   : > { %p1874_p5 = pnand %p1873_p0, %p1869_p9 }
 0xbd7   : > { %1877 = shalt.err (!%p1874_p5)
}
 0xbd8   : > { %1676 = dma.vmem_to_hbm [thread:$0]  (%p2081_p11), %s2542_s16, 128, %s2539_s10, %s1391_s21, %s1946_s25, %s1946_s25, %s1952_s22  }
 0xbd9 PF: > { %p1686_p1 = scmp.ge.s32.totalorder %s1940_s11, 2  ;;  %s1448_s19 = sand.u32 1, %s1928_s30  }
 0xbda   : > { %s1449_s13 = scalar_lea.sflag [#allocation7], %s1448_s19 }
 0xbdb   : > { %p1680_p2 = pnand %p1686_p1, %p2064_p6 }
 0xbdd   : > { %p1681_p3 = pneg %p1680_p2 }
 0xbdf   : > { %1907 = dma.done.wait (%p1681_p3), %s1449_s13, 128  }
 0xbe0   : > { %1909 = vsyncadd (%p1681_p3), %s1449_s13, 4294967168  ;;  %s2632_s12 = sld [smem:[#allocation12_spill]]  ;;  %p1683_p4 = pnand %p1686_p1, %p2087_p12 }
 0xbe2   : > { %p1684_p7 = pneg %p1683_p4 }
 0xbe6   : > { %s1457_s23 = sand.u32 1, %s2632_s12  }
 0xbe7   : > { %s1458_s29 = scalar_lea.sflag [#allocation9], %s1457_s23 }
 0xbe8   : > { %1911 = dma.done.wait (%p1684_p7), %s1458_s29, 128  }
 0xbe9   : > { %1913 = vsyncadd (%p1684_p7), %s1458_s29, 4294967168  ;;  %s2634_s11 = sld [smem:[#allocation15_spill]]  ;;  %s2639_s27 = smov %s1920_s28 }
 0xbea   : > { %s2635_s25 = sld [smem:[#allocation13_spill]]  ;;  %s2641_s30 = smov %s1932_s9 }
 0xbeb   : > { %s2636_s29 = sld [smem:[#allocation18_spill]] }
 0xbec   : > { %s2637_s22 = sld [smem:[#allocation14_spill]] }
 0xbed   : > { %s2638_s10 = sld [smem:[#allocation16_spill]] }
 0xbef   : > { %p22_p6 = scmp.ge.s32.totalorder %s2634_s11, 4  }
 0xbf0   : > { %s2640_s28 = smov %s2635_s25 }
 0xbf1   :  { %24 = sbr.rel (!%p22_p6) target bundleno = 7 (0x7), region = 131 }
 0xbf2   : > { %s2642_s9 = smov %s2637_s22 }
 0xbf6   :  { %1463 = vsyncpa [#allocation7], 1 }
 0xbf7   :  { %1465 = vsyncpa [#allocation7 + $0x1], 1 }
 0xbf8   :  { %1466 = vsyncpa [#allocation9], 1 }
 0xbf9   :  { %1468 = vsyncpa [#allocation9 + $0x1], 1 }

</bundles_post_ra>
